<compile_context>
chip_gen: v6e
topology: v6e:2x2x1
jax: 0.10.0
libtpu: 0.0.40
codegen_flags: <defaults>
</compile_context>

<pallas_src>
import functools

import jax
import jax.numpy as jnp
from jax.experimental import pallas as pl
from jax.experimental.pallas import tpu as pltpu

EPS = 1e-6

# ----------------------------------------------------------------------------
# Tiling / VMEM knobs
# ----------------------------------------------------------------------------
_TM_CANDIDATES = (1024, 512, 256, 128, 64, 32, 16, 8)
_TILE_VMEM_BUDGET = 10 << 20           # approx per-call VMEM working-set target
_VMEM_LIMIT_BYTES = 32 * 1024 * 1024   # safe on v5e/v6e (128 MiB) and v7x (64 MiB)


def _pick_tm(m, bytes_per_row):
    """Largest M-tile that divides m, fits the VMEM budget and (if possible)
    yields >= 2 grid steps so both v7x TensorCores get work."""
    single = None
    for cand in _TM_CANDIDATES:
        if cand > m or m % cand:
            continue
        if cand * bytes_per_row > _TILE_VMEM_BUDGET:
            continue
        if m // cand >= 2:
            return cand
        if single is None:
            single = cand
    if single is not None:
        return single
    # TODO(synk): pad M to a multiple of 8 instead of falling back to one block.
    return m


def _compiler_params():
    return pltpu.CompilerParams(dimension_semantics=("parallel",),
                                vmem_limit_bytes=_VMEM_LIMIT_BYTES)


# ----------------------------------------------------------------------------
# In-kernel helpers / kernels
# ----------------------------------------------------------------------------
def _vn_leaky(p, d, negative_slope):
    """Vector-neuron leaky ReLU on (3, tm, C) feature (p) / direction (d) slabs."""
    dot = p[0] * d[0] + p[1] * d[1] + p[2] * d[2]               # (tm, C)
    dsq = d[0] * d[0] + d[1] * d[1] + d[2] * d[2]
    coef = jnp.where(dot >= 0.0, 0.0,
                     dot * pl.reciprocal(dsq + EPS, approx=True))
    y = p - coef * d                                            # broadcast over vec
    if negative_slope == 0.0:
        return y
    return negative_slope * p + (1.0 - negative_slope) * y


def conv_pos_pool_kernel(x_ref, w_ref, o_ref, *, negative_slope):
    # Fused VNLinearLeakyReLU(3 -> cout) + mean over the k neighbours.
    # x: (3, k, tm, 3)   w = [Wf | Wd]: (3, 2*cout)   o: (3, tm, cout)
    v, kk, tm, cin = x_ref.shape
    cout = o_ref.shape[-1]
    w = w_ref[...]
    acc = jnp.zeros((v, tm, cout), jnp.float32)
    for j in range(kk):                       # static unroll over neighbours
        xj = x_ref[:, j, :, :].astype(jnp.float32).reshape(v * tm, cin)
        pd = jnp.dot(xj, w, preferred_element_type=jnp.float32)
        pd = pd.reshape(v, tm, 2 * cout)
        acc = acc + _vn_leaky(pd[..., :cout], pd[..., cout:], negative_slope)
    o_ref[...] = (acc * (1.0 / kk)).astype(o_ref.dtype)


def vn_linear_kernel(x_ref, w_ref, o_ref):
    # x: (3, tm, cin), w: (cin, cout) -> o: (3, tm, cout); one fused matmul.
    v, tm, cin = x_ref.shape
    cout = w_ref.shape[1]
    x = x_ref[...].astype(jnp.float32).reshape(v * tm, cin)
    y = jnp.dot(x, w_ref[...], preferred_element_type=jnp.float32)
    o_ref[...] = y.reshape(v, tm, cout).astype(o_ref.dtype)


def vn_resnet_block_kernel(x_ref, wds_ref, w0_ref, wd1_ref, w1_ref, o_ref):
    # VNResnetBlockFC: fc_1(actvn_1(fc_0(actvn_0(x)))) + shortcut(x)
    # wds = [map_to_dir_0 | shortcut]; both consume x -> one matmul.
    v, tm, cin = x_ref.shape
    h = w0_ref.shape[1]
    x = x_ref[...].astype(jnp.float32)
    x_flat = x.reshape(v * tm, cin)
    ds = jnp.dot(x_flat, wds_ref[...], preferred_element_type=jnp.float32)
    d0 = ds[:, :cin].reshape(v, tm, cin)
    x_s = ds[:, cin:]                                           # shortcut, (v*tm, h)
    a0 = _vn_leaky(x, d0, 0.0)                                  # actvn_0
    net = jnp.dot(a0.reshape(v * tm, cin), w0_ref[...],
                  preferred_element_type=jnp.float32)           # fc_0
    d1 = jnp.dot(net, wd1_ref[...], preferred_element_type=jnp.float32)
    a1 = _vn_leaky(net.reshape(v, tm, h), d1.reshape(v, tm, h), 0.0)  # actvn_1
    dx = jnp.dot(a1.reshape(v * tm, h), w1_ref[...],
                 preferred_element_type=jnp.float32)            # fc_1
    o_ref[...] = (x_s + dx).reshape(v, tm, h).astype(o_ref.dtype)


# ----------------------------------------------------------------------------
# pallas_call wrappers
# ----------------------------------------------------------------------------
def conv_pos_pool(feat, wf, wd, negative_slope):
    """feat: (3, k, M, 3) -> (3, M, cout) (VN-linear-leaky + mean over k)."""
    v, k, m, cin = feat.shape
    cout = wf.shape[1]
    w_fd = jnp.concatenate([wf, wd], axis=1)                    # (cin, 2*cout)
    # Input block's last dim (=3) is lane-padded to 128 in VMEM -> ~512 B/row
    # per (vec, k) slice per buffer; plus output + in-kernel temporaries.
    row_bytes = 2 * 3 * k * 512 + 12 * 8 * cout
    tm = _pick_tm(m, row_bytes)
    kern = functools.partial(conv_pos_pool_kernel, negative_slope=negative_slope)
    return pl.pallas_call(
        kern,
        out_shape=jax.ShapeDtypeStruct((v, m, cout), jnp.float32),
        grid_spec=pltpu.PrefetchScalarGridSpec(
            num_scalar_prefetch=0,
            grid=(pl.cdiv(m, tm),),
            in_specs=[pl.BlockSpec((v, k, tm, cin), lambda i: (0, 0, i, 0)),
                      pl.BlockSpec(w_fd.shape, lambda i: (0, 0))],
            out_specs=pl.BlockSpec((v, tm, cout), lambda i: (0, i, 0))),
        compiler_params=_compiler_params(),
    )(feat, w_fd)


def _vn_rowwise_call(kernel, x, weights, cout, row_bytes):
    """Common wrapper: tile over the M axis, weights replicated per tile."""
    v, m, cin = x.shape
    tm = _pick_tm(m, row_bytes)
    in_specs = [pl.BlockSpec((v, tm, cin), lambda i: (0, i, 0))]
    in_specs += [pl.BlockSpec(w.shape, lambda i: (0, 0)) for w in weights]
    return pl.pallas_call(
        kernel,
        out_shape=jax.ShapeDtypeStruct((v, m, cout), jnp.float32),
        grid_spec=pltpu.PrefetchScalarGridSpec(
            num_scalar_prefetch=0,
            grid=(pl.cdiv(m, tm),),
            in_specs=in_specs,
            out_specs=pl.BlockSpec((v, tm, cout), lambda i: (0, i, 0))),
        compiler_params=_compiler_params(),
    )(x, *weights)


def vn_linear(x, w):
    cin, cout = w.shape
    row_bytes = 12 * (3 * cin + 3 * cout)
    return _vn_rowwise_call(vn_linear_kernel, x, [w], cout, row_bytes)


def vn_resnet_block(x, pb):
    cin = pb['wd0'].shape[0]
    h = pb['w0'].shape[1]
    wds = jnp.concatenate([pb['wd0'], pb['ws']], axis=1)        # (cin, cin + h)
    row_bytes = 12 * (3 * cin + 8 * h)
    return _vn_rowwise_call(vn_resnet_block_kernel, x,
                            [wds, pb['w0'], pb['wd1'], pb['w1']], h, row_bytes)


# ----------------------------------------------------------------------------
# Plain-JAX glue (graph features, tiny tail) + pure-JAX reference
# ----------------------------------------------------------------------------
_HP = jax.lax.Precision.HIGHEST


def _jax_vn_leaky(x, d, slope):
    dot = jnp.sum(x * d, axis=0, keepdims=True)
    dsq = jnp.sum(d * d, axis=0, keepdims=True)
    coef = jnp.where(dot >= 0.0, 0.0, dot / (dsq + EPS))
    return slope * x + (1.0 - slope) * (x - coef * d)


def _jax_linear(x, w):
    return jnp.einsum('...c,co->...o', x, w, precision=_HP)


def _graph_feature_cross(p, k):
    """get_graph_feature_cross for dim=3 points -> (3vec, k, B*N, 3ch)."""
    # TODO(synk): top-k neighbour selection has no clean Pallas equivalent;
    # knn / gather / cross-product stay in plain JAX.
    b, n, _ = p.shape
    sq = jnp.sum(p * p, axis=-1)
    inner = jnp.einsum('bnd,bmd->bnm', p, p)
    neg_dist = -(sq[:, :, None] + sq[:, None, :] - 2.0 * inner)
    idx = jax.lax.top_k(neg_dist, k)[1]                         # (B, N, k)
    nbrs = jax.vmap(lambda pts, ids: pts[ids])(p, idx)          # (B, N, k, 3)
    center = jnp.broadcast_to(p[:, :, None, :], nbrs.shape)
    cross = jnp.cross(nbrs, center)
    # channel order matches torch.cat((feature - x, x, cross), dim=3)
    feat = jnp.stack([nbrs - center, center, cross], axis=-1)   # (B,N,k,3v,3c)
    return jnp.transpose(feat, (3, 2, 0, 1, 4)).reshape(3, k, b * n, 3)


# ----------------------------------------------------------------------------
# Parameters (deterministic, synthetic) and forward pass
# ----------------------------------------------------------------------------
def init_params(key, hidden_dim, c_dim):
    h = hidden_dim
    keys = jax.random.split(key, 5 + 5 * 5)
    it = iter(keys)

    def lin(cin, cout):
        return (jax.random.normal(next(it), (cin, cout), jnp.float32)
                / jnp.sqrt(float(cin)))

    params = {
        'conv_pos_wf': lin(3, 128),       # VNLinearLeakyReLU(3, 128) map_to_feat
        'conv_pos_wd': lin(3, 128),       #                           map_to_dir
        'fc_pos_w': lin(128, 2 * h),      # VNLinear(128, 2H)
        'actvn_c_wd': lin(h, h),          # VNLeakyReLU(H) map_to_dir
        'fc_c_w': lin(h, c_dim),          # VNLinear(H, c_dim)
    }
    for b in range(5):
        # NOTE: the reference zero-inits fc_1 (w1); random values exercise the
        # full compute path (forward semantics unchanged).
        params[f'block{b}'] = {
            'wd0': lin(2 * h, 2 * h),     # actvn_0 map_to_dir
            'w0': lin(2 * h, h),          # fc_0
            'wd1': lin(h, h),             # actvn_1 map_to_dir
            'w1': lin(h, h),              # fc_1
            'ws': lin(2 * h, h),          # shortcut
        }
    return params


def vnn_resnet_pointnet_forward(p, params, k, hidden_dim, c_dim):
    b, n, _ = p.shape
    h = hidden_dim
    m = b * n

    feat = _graph_feature_cross(p, k)                           # (3, k, M, 3)

    # conv_pos (VNLinearLeakyReLU 3->128, slope 0.2) fused with mean over k.
    net = conv_pos_pool(feat, params['conv_pos_wf'], params['conv_pos_wd'], 0.2)
    net = vn_linear(net, params['fc_pos_w'])                    # (3, M, 2H)

    net = vn_resnet_block(net, params['block0'])                # (3, M, H)
    for blk in range(1, 5):
        nb = net.reshape(3, b, n, h)
        pooled = jnp.broadcast_to(jnp.mean(nb, axis=2, keepdims=True), nb.shape)
        net = jnp.concatenate([nb, pooled], axis=-1).reshape(3, m, 2 * h)
        net = vn_resnet_block(net, params[f'block{blk}'])       # (3, M, H)

    # last_pool + actvn_c + fc_c on a (3, B, H) tensor: plain JAX — a
    # pallas_call launch costs more than this much work (perf-review item).
    net = jnp.mean(net.reshape(3, b, n, h), axis=2)             # (3, B, H)
    act = _jax_vn_leaky(net, _jax_linear(net, params['actvn_c_wd']), 0.2)
    c = _jax_linear(act, params['fc_c_w'])                      # (3, B, c_dim)
    return jnp.transpose(c, (1, 2, 0))                          # (B, c_dim, 3)


# ----------------------------------------------------------------------------
# Pure-JAX reference (same math, no Pallas) for a sanity check
# ----------------------------------------------------------------------------
def _ref_block(x, pb):
    a0 = _jax_vn_leaky(x, _jax_linear(x, pb['wd0']), 0.0)
    net = _jax_linear(a0, pb['w0'])
    a1 = _jax_vn_leaky(net, _jax_linear(net, pb['wd1']), 0.0)
    return _jax_linear(x, pb['ws']) + _jax_linear(a1, pb['w1'])


def reference_forward(p, params, k, hidden_dim, c_dim):
    b, n, _ = p.shape
    h = hidden_dim
    feat = _graph_feature_cross(p, k)                           # (3, k, M, 3)
    pf = _jax_linear(feat, params['conv_pos_wf'])
    df = _jax_linear(feat, params['conv_pos_wd'])
    net = jnp.mean(_jax_vn_leaky(pf, df, 0.2), axis=1)          # (3, M, 128)
    net = _jax_linear(net, params['fc_pos_w'])
    net = _ref_block(net, params['block0'])
    for blk in range(1, 5):
        nb = net.reshape(3, b, n, h)
        pooled = jnp.broadcast_to(jnp.mean(nb, axis=2, keepdims=True), nb.shape)
        net = jnp.concatenate([nb, pooled], axis=-1).reshape(3, b * n, 2 * h)
        net = _ref_block(net, params[f'block{blk}'])
    net = jnp.mean(net.reshape(3, b, n, h), axis=2)
    act = _jax_vn_leaky(net, _jax_linear(net, params['actvn_c_wd']), 0.2)
    c = _jax_linear(act, params['fc_c_w'])
    return jnp.transpose(c, (1, 2, 0))


# ----------------------------------------------------------------------------
if __name__ == "__main__":
    key = jax.random.PRNGKey(0)
    kp, kx = jax.random.split(key)

    # Small shapes consistent with the module (defaults c_dim=128, hidden=128,
    # k=20, scaled down).  hidden=64 keeps all in-kernel channel slices
    # 128-lane aligned, matching the production layout.
    B, N, K, HID, CDIM = 2, 16, 8, 64, 32
    params = init_params(kp, HID, CDIM)
    p = jax.random.normal(kx, (B, N, 3), jnp.float32)

    fwd = jax.jit(functools.partial(vnn_resnet_pointnet_forward,
                                    k=K, hidden_dim=HID, c_dim=CDIM))
    c = jax.block_until_ready(fwd(p, params))

    assert c.shape == (B, CDIM, 3), c.shape
    assert bool(jnp.all(jnp.isfinite(c)))

    c_ref = reference_forward(p, params, K, HID, CDIM)
    err = float(jnp.max(jnp.abs(c - c_ref)))
    scale = max(1.0, float(jnp.max(jnp.abs(c_ref))))
    # 2e-2 relative (5x tighter than the previous revision): covers MXU f32
    # pass-count differences between the Mosaic and XLA matmul lowerings plus
    # the in-kernel EUP approximate reciprocal; the reference runs at
    # Precision.HIGHEST.
    assert err <= 2e-2 * scale, (err, scale)

    print("KERNEL_OK")
</pallas_src>

<mosaic_0001>
module attributes {stable_mosaic.version = 11 : i64} {
  func.func @vn_linear_kernel(%arg0: i32, %arg1: memref<3x16x128xf32, #tpu.memory_space<vmem>>, %arg2: memref<128x128xf32, #tpu.memory_space<vmem>>, %arg3: memref<3x16x128xf32, #tpu.memory_space<vmem>>) attributes {dimension_semantics = [#tpu.dimension_semantics<parallel>], iteration_bounds = array<i64: 2>, scalar_prefetch = 0 : i64, scratch_operands = 0 : i64, tpu.core_type = #tpu.core_type<tc>, window_params = [{transform_indices = @transform_0, window_bounds = array<i64: 3, 16, 128>}, {pipeline_mode = #tpu.pipeline_mode<synchronous>, transform_indices = @transform_1, window_bounds = array<i64: 128, 128>}, {transform_indices = @transform_2, window_bounds = array<i64: 3, 16, 128>}]} {
    %c0 = arith.constant 0 : index
    %c0_0 = arith.constant 0 : index
    %c0_1 = arith.constant 0 : index
    %0 = vector.load %arg1[%c0, %c0_0, %c0_1] : memref<3x16x128xf32, #tpu.memory_space<vmem>>, vector<3x16x128xf32>
    %1 = vector.shape_cast %0 : vector<3x16x128xf32> to vector<48x128xf32>
    %c0_2 = arith.constant 0 : index
    %c0_3 = arith.constant 0 : index
    %2 = vector.load %arg2[%c0_2, %c0_3] : memref<128x128xf32, #tpu.memory_space<vmem>>, vector<128x128xf32>
    %cst = arith.constant dense<0.000000e+00> : vector<48x128xf32>
    %3 = tpu.matmul %1, %2, %cst {dimension_numbers = #tpu.dot_dimension_numbers<[1], [0], [0], [1], [0, 0, 1, 1], [], []>} : vector<48x128xf32>, vector<128x128xf32>, vector<48x128xf32> -> vector<48x128xf32>
    %4 = vector.shape_cast %3 : vector<48x128xf32> to vector<3x16x128xf32>
    %c0_4 = arith.constant 0 : index
    %c0_5 = arith.constant 0 : index
    %c0_6 = arith.constant 0 : index
    %5 = vector.load %arg3[%c0_4, %c0_5, %c0_6] : memref<3x16x128xf32, #tpu.memory_space<vmem>>, vector<3x16x128xf32>
    tpu.vector_store %arg3[%c0_4, %c0_5, %c0_6], %4 {strides = array<i32>} : memref<3x16x128xf32, #tpu.memory_space<vmem>>, vector<3x16x128xf32>,
    return
  }
  func.func @transform_0(%arg0: i32) -> (i32, i32, i32) {
    %c0_i32 = arith.constant 0 : i32
    %c0_i32_0 = arith.constant 0 : i32
    %c0_i32_1 = arith.constant 0 : i32
    return %c0_i32, %arg0, %c0_i32_0 : i32, i32, i32
  }
  func.func @transform_1(%arg0: i32) -> (i32, i32) {
    %c0_i32 = arith.constant 0 : i32
    %c0_i32_0 = arith.constant 0 : i32
    %c0_i32_1 = arith.constant 0 : i32
    return %c0_i32, %c0_i32_0 : i32, i32
  }
  func.func @transform_2(%arg0: i32) -> (i32, i32, i32) {
    %c0_i32 = arith.constant 0 : i32
    %c0_i32_0 = arith.constant 0 : i32
    %c0_i32_1 = arith.constant 0 : i32
    return %c0_i32, %arg0, %c0_i32_0 : i32, i32, i32
  }
}

module attributes {stable_mosaic.version = 11 : i64} {
  func.func @conv_pos_pool_kernel(%arg0: i32, %arg1: memref<3x8x16x3xf32, #tpu.memory_space<vmem>>, %arg2: memref<3x256xf32, #tpu.memory_space<vmem>>, %arg3: memref<3x16x128xf32, #tpu.memory_space<vmem>>) attributes {dimension_semantics = [#tpu.dimension_semantics<parallel>], iteration_bounds = array<i64: 2>, scalar_prefetch = 0 : i64, scratch_operands = 0 : i64, tpu.core_type = #tpu.core_type<tc>, window_params = [{transform_indices = @transform_0, window_bounds = array<i64: 3, 8, 16, 3>}, {pipeline_mode = #tpu.pipeline_mode<synchronous>, transform_indices = @transform_1, window_bounds = array<i64: 3, 256>}, {transform_indices = @transform_2, window_bounds = array<i64: 3, 16, 128>}]} {
    %c0 = arith.constant 0 : index
    %c0_0 = arith.constant 0 : index
    %0 = vector.load %arg2[%c0, %c0_0] : memref<3x256xf32, #tpu.memory_space<vmem>>, vector<3x256xf32>
    %cst = arith.constant 0.000000e+00 : f32
    %1 = vector.broadcast %cst : f32 to vector<3x16x128xf32>
    %c0_1 = arith.constant 0 : index
    %c0_2 = arith.constant 0 : index
    %c0_3 = arith.constant 0 : index
    %c0_4 = arith.constant 0 : index
    %2 = vector.load %arg1[%c0_1, %c0_2, %c0_3, %c0_4] : memref<3x8x16x3xf32, #tpu.memory_space<vmem>>, vector<3x1x16x3xf32>
    %3 = vector.shape_cast %2 : vector<3x1x16x3xf32> to vector<3x16x3xf32>
    %4 = vector.shape_cast %3 : vector<3x16x3xf32> to vector<48x3xf32>
    %cst_5 = arith.constant dense<0.000000e+00> : vector<48x256xf32>
    %5 = tpu.matmul %4, %0, %cst_5 {dimension_numbers = #tpu.dot_dimension_numbers<[1], [0], [0], [1], [0, 0, 1, 1], [], []>} : vector<48x3xf32>, vector<3x256xf32>, vector<48x256xf32> -> vector<48x256xf32>
    %6 = vector.shape_cast %5 : vector<48x256xf32> to vector<3x16x256xf32>
    %7 = vector.extract_strided_slice %6 {offsets = [0, 0, 0], sizes = [3, 16, 128], strides = [1, 1, 1]} : vector<3x16x256xf32> to vector<3x16x128xf32>
    %8 = vector.extract_strided_slice %6 {offsets = [0, 0, 128], sizes = [3, 16, 128], strides = [1, 1, 1]} : vector<3x16x256xf32> to vector<3x16x128xf32>
    %9 = vector.extract_strided_slice %7 {offsets = [0, 0, 0], sizes = [1, 16, 128], strides = [1, 1, 1]} : vector<3x16x128xf32> to vector<1x16x128xf32>
    %10 = vector.shape_cast %9 : vector<1x16x128xf32> to vector<16x128xf32>
    %11 = vector.extract_strided_slice %8 {offsets = [0, 0, 0], sizes = [1, 16, 128], strides = [1, 1, 1]} : vector<3x16x128xf32> to vector<1x16x128xf32>
    %12 = vector.shape_cast %11 : vector<1x16x128xf32> to vector<16x128xf32>
    %13 = arith.mulf %10, %12 : vector<16x128xf32>
    %14 = vector.extract_strided_slice %7 {offsets = [1, 0, 0], sizes = [1, 16, 128], strides = [1, 1, 1]} : vector<3x16x128xf32> to vector<1x16x128xf32>
    %15 = vector.shape_cast %14 : vector<1x16x128xf32> to vector<16x128xf32>
    %16 = vector.extract_strided_slice %8 {offsets = [1, 0, 0], sizes = [1, 16, 128], strides = [1, 1, 1]} : vector<3x16x128xf32> to vector<1x16x128xf32>
    %17 = vector.shape_cast %16 : vector<1x16x128xf32> to vector<16x128xf32>
    %18 = arith.mulf %15, %17 : vector<16x128xf32>
    %19 = arith.addf %13, %18 : vector<16x128xf32>
    %20 = vector.extract_strided_slice %7 {offsets = [2, 0, 0], sizes = [1, 16, 128], strides = [1, 1, 1]} : vector<3x16x128xf32> to vector<1x16x128xf32>
    %21 = vector.shape_cast %20 : vector<1x16x128xf32> to vector<16x128xf32>
    %22 = vector.extract_strided_slice %8 {offsets = [2, 0, 0], sizes = [1, 16, 128], strides = [1, 1, 1]} : vector<3x16x128xf32> to vector<1x16x128xf32>
    %23 = vector.shape_cast %22 : vector<1x16x128xf32> to vector<16x128xf32>
    %24 = arith.mulf %21, %23 : vector<16x128xf32>
    %25 = arith.addf %19, %24 : vector<16x128xf32>
    %26 = vector.extract_strided_slice %8 {offsets = [0, 0, 0], sizes = [1, 16, 128], strides = [1, 1, 1]} : vector<3x16x128xf32> to vector<1x16x128xf32>
    %27 = vector.shape_cast %26 : vector<1x16x128xf32> to vector<16x128xf32>
    %28 = vector.extract_strided_slice %8 {offsets = [0, 0, 0], sizes = [1, 16, 128], strides = [1, 1, 1]} : vector<3x16x128xf32> to vector<1x16x128xf32>
    %29 = vector.shape_cast %28 : vector<1x16x128xf32> to vector<16x128xf32>
    %30 = arith.mulf %27, %29 : vector<16x128xf32>
    %31 = vector.extract_strided_slice %8 {offsets = [1, 0, 0], sizes = [1, 16, 128], strides = [1, 1, 1]} : vector<3x16x128xf32> to vector<1x16x128xf32>
    %32 = vector.shape_cast %31 : vector<1x16x128xf32> to vector<16x128xf32>
    %33 = vector.extract_strided_slice %8 {offsets = [1, 0, 0], sizes = [1, 16, 128], strides = [1, 1, 1]} : vector<3x16x128xf32> to vector<1x16x128xf32>
    %34 = vector.shape_cast %33 : vector<1x16x128xf32> to vector<16x128xf32>
    %35 = arith.mulf %32, %34 : vector<16x128xf32>
    %36 = arith.addf %30, %35 : vector<16x128xf32>
    %37 = vector.extract_strided_slice %8 {offsets = [2, 0, 0], sizes = [1, 16, 128], strides = [1, 1, 1]} : vector<3x16x128xf32> to vector<1x16x128xf32>
    %38 = vector.shape_cast %37 : vector<1x16x128xf32> to vector<16x128xf32>
    %39 = vector.extract_strided_slice %8 {offsets = [2, 0, 0], sizes = [1, 16, 128], strides = [1, 1, 1]} : vector<3x16x128xf32> to vector<1x16x128xf32>
    %40 = vector.shape_cast %39 : vector<1x16x128xf32> to vector<16x128xf32>
    %41 = arith.mulf %38, %40 : vector<16x128xf32>
    %42 = arith.addf %36, %41 : vector<16x128xf32>
    %cst_6 = arith.constant 0.000000e+00 : f32
    %43 = vector.broadcast %cst_6 : f32 to vector<16x128xf32>
    %44 = arith.cmpf oge, %25, %43 : vector<16x128xf32>
    %cst_7 = arith.constant 9.99999997E-7 : f32
    %45 = vector.broadcast %cst_7 : f32 to vector<16x128xf32>
    %46 = arith.addf %42, %45 : vector<16x128xf32>
    %47 = tpu.reciprocal %46 {approx = true} : vector<16x128xf32> -> vector<16x128xf32>
    %48 = arith.mulf %25, %47 : vector<16x128xf32>
    %cst_8 = arith.constant 0.000000e+00 : f32
    %49 = vector.broadcast %cst_8 : f32 to vector<16x128xf32>
    %50 = arith.select %44, %49, %48 : vector<16x128xi1>, vector<16x128xf32>
    %51 = vector.shape_cast %50 : vector<16x128xf32> to vector<1x16x128xf32>
    %52 = vector.broadcast %51 : vector<1x16x128xf32> to vector<3x16x128xf32>
    %53 = arith.mulf %52, %8 : vector<3x16x128xf32>
    %54 = arith.subf %7, %53 : vector<3x16x128xf32>
    %cst_9 = arith.constant 2.000000e-01 : f32
    %55 = vector.broadcast %cst_9 : f32 to vector<3x16x128xf32>
    %56 = arith.mulf %55, %7 : vector<3x16x128xf32>
    %cst_10 = arith.constant 8.000000e-01 : f32
    %57 = vector.broadcast %cst_10 : f32 to vector<3x16x128xf32>
    %58 = arith.mulf %57, %54 : vector<3x16x128xf32>
    %59 = arith.addf %56, %58 : vector<3x16x128xf32>
    %60 = arith.addf %1, %59 : vector<3x16x128xf32>
    %c0_11 = arith.constant 0 : index
    %c1 = arith.constant 1 : index
    %c0_12 = arith.constant 0 : index
    %c0_13 = arith.constant 0 : index
    %61 = vector.load %arg1[%c0_11, %c1, %c0_12, %c0_13] : memref<3x8x16x3xf32, #tpu.memory_space<vmem>>, vector<3x1x16x3xf32>
    %62 = vector.shape_cast %61 : vector<3x1x16x3xf32> to vector<3x16x3xf32>
    %63 = vector.shape_cast %62 : vector<3x16x3xf32> to vector<48x3xf32>
    %cst_14 = arith.constant dense<0.000000e+00> : vector<48x256xf32>
    %64 = tpu.matmul %63, %0, %cst_14 {dimension_numbers = #tpu.dot_dimension_numbers<[1], [0], [0], [1], [0, 0, 1, 1], [], []>} : vector<48x3xf32>, vector<3x256xf32>, vector<48x256xf32> -> vector<48x256xf32>
    %65 = vector.shape_cast %64 : vector<48x256xf32> to vector<3x16x256xf32>
    %66 = vector.extract_strided_slice %65 {offsets = [0, 0, 0], sizes = [3, 16, 128], strides = [1, 1, 1]} : vector<3x16x256xf32> to vector<3x16x128xf32>
    %67 = vector.extract_strided_slice %65 {offsets = [0, 0, 128], sizes = [3, 16, 128], strides = [1, 1, 1]} : vector<3x16x256xf32> to vector<3x16x128xf32>
    %68 = vector.extract_strided_slice %66 {offsets = [0, 0, 0], sizes = [1, 16, 128], strides = [1, 1, 1]} : vector<3x16x128xf32> to vector<1x16x128xf32>
    %69 = vector.shape_cast %68 : vector<1x16x128xf32> to vector<16x128xf32>
    %70 = vector.extract_strided_slice %67 {offsets = [0, 0, 0], sizes = [1, 16, 128], strides = [1, 1, 1]} : vector<3x16x128xf32> to vector<1x16x128xf32>
    %71 = vector.shape_cast %70 : vector<1x16x128xf32> to vector<16x128xf32>
    %72 = arith.mulf %69, %71 : vector<16x128xf32>
    %73 = vector.extract_strided_slice %66 {offsets = [1, 0, 0], sizes = [1, 16, 128], strides = [1, 1, 1]} : vector<3x16x128xf32> to vector<1x16x128xf32>
    %74 = vector.shape_cast %73 : vector<1x16x128xf32> to vector<16x128xf32>
    %75 = vector.extract_strided_slice %67 {offsets = [1, 0, 0], sizes = [1, 16, 128], strides = [1, 1, 1]} : vector<3x16x128xf32> to vector<1x16x128xf32>
    %76 = vector.shape_cast %75 : vector<1x16x128xf32> to vector<16x128xf32>
    %77 = arith.mulf %74, %76 : vector<16x128xf32>
    %78 = arith.addf %72, %77 : vector<16x128xf32>
    %79 = vector.extract_strided_slice %66 {offsets = [2, 0, 0], sizes = [1, 16, 128], strides = [1, 1, 1]} : vector<3x16x128xf32> to vector<1x16x128xf32>
    %80 = vector.shape_cast %79 : vector<1x16x128xf32> to vector<16x128xf32>
    %81 = vector.extract_strided_slice %67 {offsets = [2, 0, 0], sizes = [1, 16, 128], strides = [1, 1, 1]} : vector<3x16x128xf32> to vector<1x16x128xf32>
    %82 = vector.shape_cast %81 : vector<1x16x128xf32> to vector<16x128xf32>
    %83 = arith.mulf %80, %82 : vector<16x128xf32>
    %84 = arith.addf %78, %83 : vector<16x128xf32>
    %85 = vector.extract_strided_slice %67 {offsets = [0, 0, 0], sizes = [1, 16, 128], strides = [1, 1, 1]} : vector<3x16x128xf32> to vector<1x16x128xf32>
    %86 = vector.shape_cast %85 : vector<1x16x128xf32> to vector<16x128xf32>
    %87 = vector.extract_strided_slice %67 {offsets = [0, 0, 0], sizes = [1, 16, 128], strides = [1, 1, 1]} : vector<3x16x128xf32> to vector<1x16x128xf32>
    %88 = vector.shape_cast %87 : vector<1x16x128xf32> to vector<16x128xf32>
    %89 = arith.mulf %86, %88 : vector<16x128xf32>
    %90 = vector.extract_strided_slice %67 {offsets = [1, 0, 0], sizes = [1, 16, 128], strides = [1, 1, 1]} : vector<3x16x128xf32> to vector<1x16x128xf32>
    %91 = vector.shape_cast %90 : vector<1x16x128xf32> to vector<16x128xf32>
    %92 = vector.extract_strided_slice %67 {offsets = [1, 0, 0], sizes = [1, 16, 128], strides = [1, 1, 1]} : vector<3x16x128xf32> to vector<1x16x128xf32>
    %93 = vector.shape_cast %92 : vector<1x16x128xf32> to vector<16x128xf32>
    %94 = arith.mulf %91, %93 : vector<16x128xf32>
    %95 = arith.addf %89, %94 : vector<16x128xf32>
    %96 = vector.extract_strided_slice %67 {offsets = [2, 0, 0], sizes = [1, 16, 128], strides = [1, 1, 1]} : vector<3x16x128xf32> to vector<1x16x128xf32>
    %97 = vector.shape_cast %96 : vector<1x16x128xf32> to vector<16x128xf32>
    %98 = vector.extract_strided_slice %67 {offsets = [2, 0, 0], sizes = [1, 16, 128], strides = [1, 1, 1]} : vector<3x16x128xf32> to vector<1x16x128xf32>
    %99 = vector.shape_cast %98 : vector<1x16x128xf32> to vector<16x128xf32>
    %100 = arith.mulf %97, %99 : vector<16x128xf32>
    %101 = arith.addf %95, %100 : vector<16x128xf32>
    %cst_15 = arith.constant 0.000000e+00 : f32
    %102 = vector.broadcast %cst_15 : f32 to vector<16x128xf32>
    %103 = arith.cmpf oge, %84, %102 : vector<16x128xf32>
    %cst_16 = arith.constant 9.99999997E-7 : f32
    %104 = vector.broadcast %cst_16 : f32 to vector<16x128xf32>
    %105 = arith.addf %101, %104 : vector<16x128xf32>
    %106 = tpu.reciprocal %105 {approx = true} : vector<16x128xf32> -> vector<16x128xf32>
    %107 = arith.mulf %84, %106 : vector<16x128xf32>
    %cst_17 = arith.constant 0.000000e+00 : f32
    %108 = vector.broadcast %cst_17 : f32 to vector<16x128xf32>
    %109 = arith.select %103, %108, %107 : vector<16x128xi1>, vector<16x128xf32>
    %110 = vector.shape_cast %109 : vector<16x128xf32> to vector<1x16x128xf32>
    %111 = vector.broadcast %110 : vector<1x16x128xf32> to vector<3x16x128xf32>
    %112 = arith.mulf %111, %67 : vector<3x16x128xf32>
    %113 = arith.subf %66, %112 : vector<3x16x128xf32>
    %cst_18 = arith.constant 2.000000e-01 : f32
    %114 = vector.broadcast %cst_18 : f32 to vector<3x16x128xf32>
    %115 = arith.mulf %114, %66 : vector<3x16x128xf32>
    %cst_19 = arith.constant 8.000000e-01 : f32
    %116 = vector.broadcast %cst_19 : f32 to vector<3x16x128xf32>
    %117 = arith.mulf %116, %113 : vector<3x16x128xf32>
    %118 = arith.addf %115, %117 : vector<3x16x128xf32>
    %119 = arith.addf %60, %118 : vector<3x16x128xf32>
    %c0_20 = arith.constant 0 : index
    %c2 = arith.constant 2 : index
    %c0_21 = arith.constant 0 : index
    %c0_22 = arith.constant 0 : index
    %120 = vector.load %arg1[%c0_20, %c2, %c0_21, %c0_22] : memref<3x8x16x3xf32, #tpu.memory_space<vmem>>, vector<3x1x16x3xf32>
    %121 = vector.shape_cast %120 : vector<3x1x16x3xf32> to vector<3x16x3xf32>
    %122 = vector.shape_cast %121 : vector<3x16x3xf32> to vector<48x3xf32>
    %cst_23 = arith.constant dense<0.000000e+00> : vector<48x256xf32>
    %123 = tpu.matmul %122, %0, %cst_23 {dimension_numbers = #tpu.dot_dimension_numbers<[1], [0], [0], [1], [0, 0, 1, 1], [], []>} : vector<48x3xf32>, vector<3x256xf32>, vector<48x256xf32> -> vector<48x256xf32>
    %124 = vector.shape_cast %123 : vector<48x256xf32> to vector<3x16x256xf32>
    %125 = vector.extract_strided_slice %124 {offsets = [0, 0, 0], sizes = [3, 16, 128], strides = [1, 1, 1]} : vector<3x16x256xf32> to vector<3x16x128xf32>
    %126 = vector.extract_strided_slice %124 {offsets = [0, 0, 128], sizes = [3, 16, 128], strides = [1, 1, 1]} : vector<3x16x256xf32> to vector<3x16x128xf32>
    %127 = vector.extract_strided_slice %125 {offsets = [0, 0, 0], sizes = [1, 16, 128], strides = [1, 1, 1]} : vector<3x16x128xf32> to vector<1x16x128xf32>
    %128 = vector.shape_cast %127 : vector<1x16x128xf32> to vector<16x128xf32>
    %129 = vector.extract_strided_slice %126 {offsets = [0, 0, 0], sizes = [1, 16, 128], strides = [1, 1, 1]} : vector<3x16x128xf32> to vector<1x16x128xf32>
    %130 = vector.shape_cast %129 : vector<1x16x128xf32> to vector<16x128xf32>
    %131 = arith.mulf %128, %130 : vector<16x128xf32>
    %132 = vector.extract_strided_slice %125 {offsets = [1, 0, 0], sizes = [1, 16, 128], strides = [1, 1, 1]} : vector<3x16x128xf32> to vector<1x16x128xf32>
    %133 = vector.shape_cast %132 : vector<1x16x128xf32> to vector<16x128xf32>
    %134 = vector.extract_strided_slice %126 {offsets = [1, 0, 0], sizes = [1, 16, 128], strides = [1, 1, 1]} : vector<3x16x128xf32> to vector<1x16x128xf32>
    %135 = vector.shape_cast %134 : vector<1x16x128xf32> to vector<16x128xf32>
    %136 = arith.mulf %133, %135 : vector<16x128xf32>
    %137 = arith.addf %131, %136 : vector<16x128xf32>
    %138 = vector.extract_strided_slice %125 {offsets = [2, 0, 0], sizes = [1, 16, 128], strides = [1, 1, 1]} : vector<3x16x128xf32> to vector<1x16x128xf32>
    %139 = vector.shape_cast %138 : vector<1x16x128xf32> to vector<16x128xf32>
    %140 = vector.extract_strided_slice %126 {offsets = [2, 0, 0], sizes = [1, 16, 128], strides = [1, 1, 1]} : vector<3x16x128xf32> to vector<1x16x128xf32>
    %141 = vector.shape_cast %140 : vector<1x16x128xf32> to vector<16x128xf32>
    %142 = arith.mulf %139, %141 : vector<16x128xf32>
    %143 = arith.addf %137, %142 : vector<16x128xf32>
    %144 = vector.extract_strided_slice %126 {offsets = [0, 0, 0], sizes = [1, 16, 128], strides = [1, 1, 1]} : vector<3x16x128xf32> to vector<1x16x128xf32>
    %145 = vector.shape_cast %144 : vector<1x16x128xf32> to vector<16x128xf32>
    %146 = vector.extract_strided_slice %126 {offsets = [0, 0, 0], sizes = [1, 16, 128], strides = [1, 1, 1]} : vector<3x16x128xf32> to vector<1x16x128xf32>
    %147 = vector.shape_cast %146 : vector<1x16x128xf32> to vector<16x128xf32>
    %148 = arith.mulf %145, %147 : vector<16x128xf32>
    %149 = vector.extract_strided_slice %126 {offsets = [1, 0, 0], sizes = [1, 16, 128], strides = [1, 1, 1]} : vector<3x16x128xf32> to vector<1x16x128xf32>
    %150 = vector.shape_cast %149 : vector<1x16x128xf32> to vector<16x128xf32>
    %151 = vector.extract_strided_slice %126 {offsets = [1, 0, 0], sizes = [1, 16, 128], strides = [1, 1, 1]} : vector<3x16x128xf32> to vector<1x16x128xf32>
    %152 = vector.shape_cast %151 : vector<1x16x128xf32> to vector<16x128xf32>
    %153 = arith.mulf %150, %152 : vector<16x128xf32>
    %154 = arith.addf %148, %153 : vector<16x128xf32>
    %155 = vector.extract_strided_slice %126 {offsets = [2, 0, 0], sizes = [1, 16, 128], strides = [1, 1, 1]} : vector<3x16x128xf32> to vector<1x16x128xf32>
    %156 = vector.shape_cast %155 : vector<1x16x128xf32> to vector<16x128xf32>
    %157 = vector.extract_strided_slice %126 {offsets = [2, 0, 0], sizes = [1, 16, 128], strides = [1, 1, 1]} : vector<3x16x128xf32> to vector<1x16x128xf32>
    %158 = vector.shape_cast %157 : vector<1x16x128xf32> to vector<16x128xf32>
    %159 = arith.mulf %156, %158 : vector<16x128xf32>
    %160 = arith.addf %154, %159 : vector<16x128xf32>
    %cst_24 = arith.constant 0.000000e+00 : f32
    %161 = vector.broadcast %cst_24 : f32 to vector<16x128xf32>
    %162 = arith.cmpf oge, %143, %161 : vector<16x128xf32>
    %cst_25 = arith.constant 9.99999997E-7 : f32
    %163 = vector.broadcast %cst_25 : f32 to vector<16x128xf32>
    %164 = arith.addf %160, %163 : vector<16x128xf32>
    %165 = tpu.reciprocal %164 {approx = true} : vector<16x128xf32> -> vector<16x128xf32>
    %166 = arith.mulf %143, %165 : vector<16x128xf32>
    %cst_26 = arith.constant 0.000000e+00 : f32
    %167 = vector.broadcast %cst_26 : f32 to vector<16x128xf32>
    %168 = arith.select %162, %167, %166 : vector<16x128xi1>, vector<16x128xf32>
    %169 = vector.shape_cast %168 : vector<16x128xf32> to vector<1x16x128xf32>
    %170 = vector.broadcast %169 : vector<1x16x128xf32> to vector<3x16x128xf32>
    %171 = arith.mulf %170, %126 : vector<3x16x128xf32>
    %172 = arith.subf %125, %171 : vector<3x16x128xf32>
    %cst_27 = arith.constant 2.000000e-01 : f32
    %173 = vector.broadcast %cst_27 : f32 to vector<3x16x128xf32>
    %174 = arith.mulf %173, %125 : vector<3x16x128xf32>
    %cst_28 = arith.constant 8.000000e-01 : f32
    %175 = vector.broadcast %cst_28 : f32 to vector<3x16x128xf32>
    %176 = arith.mulf %175, %172 : vector<3x16x128xf32>
    %177 = arith.addf %174, %176 : vector<3x16x128xf32>
    %178 = arith.addf %119, %177 : vector<3x16x128xf32>
    %c0_29 = arith.constant 0 : index
    %c3 = arith.constant 3 : index
    %c0_30 = arith.constant 0 : index
    %c0_31 = arith.constant 0 : index
    %179 = vector.load %arg1[%c0_29, %c3, %c0_30, %c0_31] : memref<3x8x16x3xf32, #tpu.memory_space<vmem>>, vector<3x1x16x3xf32>
    %180 = vector.shape_cast %179 : vector<3x1x16x3xf32> to vector<3x16x3xf32>
    %181 = vector.shape_cast %180 : vector<3x16x3xf32> to vector<48x3xf32>
    %cst_32 = arith.constant dense<0.000000e+00> : vector<48x256xf32>
    %182 = tpu.matmul %181, %0, %cst_32 {dimension_numbers = #tpu.dot_dimension_numbers<[1], [0], [0], [1], [0, 0, 1, 1], [], []>} : vector<48x3xf32>, vector<3x256xf32>, vector<48x256xf32> -> vector<48x256xf32>
    %183 = vector.shape_cast %182 : vector<48x256xf32> to vector<3x16x256xf32>
    %184 = vector.extract_strided_slice %183 {offsets = [0, 0, 0], sizes = [3, 16, 128], strides = [1, 1, 1]} : vector<3x16x256xf32> to vector<3x16x128xf32>
    %185 = vector.extract_strided_slice %183 {offsets = [0, 0, 128], sizes = [3, 16, 128], strides = [1, 1, 1]} : vector<3x16x256xf32> to vector<3x16x128xf32>
    %186 = vector.extract_strided_slice %184 {offsets = [0, 0, 0], sizes = [1, 16, 128], strides = [1, 1, 1]} : vector<3x16x128xf32> to vector<1x16x128xf32>
    %187 = vector.shape_cast %186 : vector<1x16x128xf32> to vector<16x128xf32>
    %188 = vector.extract_strided_slice %185 {offsets = [0, 0, 0], sizes = [1, 16, 128], strides = [1, 1, 1]} : vector<3x16x128xf32> to vector<1x16x128xf32>
    %189 = vector.shape_cast %188 : vector<1x16x128xf32> to vector<16x128xf32>
    %190 = arith.mulf %187, %189 : vector<16x128xf32>
    %191 = vector.extract_strided_slice %184 {offsets = [1, 0, 0], sizes = [1, 16, 128], strides = [1, 1, 1]} : vector<3x16x128xf32> to vector<1x16x128xf32>
    %192 = vector.shape_cast %191 : vector<1x16x128xf32> to vector<16x128xf32>
    %193 = vector.extract_strided_slice %185 {offsets = [1, 0, 0], sizes = [1, 16, 128], strides = [1, 1, 1]} : vector<3x16x128xf32> to vector<1x16x128xf32>
    %194 = vector.shape_cast %193 : vector<1x16x128xf32> to vector<16x128xf32>
    %195 = arith.mulf %192, %194 : vector<16x128xf32>
    %196 = arith.addf %190, %195 : vector<16x128xf32>
    %197 = vector.extract_strided_slice %184 {offsets = [2, 0, 0], sizes = [1, 16, 128], strides = [1, 1, 1]} : vector<3x16x128xf32> to vector<1x16x128xf32>
    %198 = vector.shape_cast %197 : vector<1x16x128xf32> to vector<16x128xf32>
    %199 = vector.extract_strided_slice %185 {offsets = [2, 0, 0], sizes = [1, 16, 128], strides = [1, 1, 1]} : vector<3x16x128xf32> to vector<1x16x128xf32>
    %200 = vector.shape_cast %199 : vector<1x16x128xf32> to vector<16x128xf32>
    %201 = arith.mulf %198, %200 : vector<16x128xf32>
    %202 = arith.addf %196, %201 : vector<16x128xf32>
    %203 = vector.extract_strided_slice %185 {offsets = [0, 0, 0], sizes = [1, 16, 128], strides = [1, 1, 1]} : vector<3x16x128xf32> to vector<1x16x128xf32>
    %204 = vector.shape_cast %203 : vector<1x16x128xf32> to vector<16x128xf32>
    %205 = vector.extract_strided_slice %185 {offsets = [0, 0, 0], sizes = [1, 16, 128], strides = [1, 1, 1]} : vector<3x16x128xf32> to vector<1x16x128xf32>
    %206 = vector.shape_cast %205 : vector<1x16x128xf32> to vector<16x128xf32>
    %207 = arith.mulf %204, %206 : vector<16x128xf32>
    %208 = vector.extract_strided_slice %185 {offsets = [1, 0, 0], sizes = [1, 16, 128], strides = [1, 1, 1]} : vector<3x16x128xf32> to vector<1x16x128xf32>
    %209 = vector.shape_cast %208 : vector<1x16x128xf32> to vector<16x128xf32>
    %210 = vector.extract_strided_slice %185 {offsets = [1, 0, 0], sizes = [1, 16, 128], strides = [1, 1, 1]} : vector<3x16x128xf32> to vector<1x16x128xf32>
    %211 = vector.shape_cast %210 : vector<1x16x128xf32> to vector<16x128xf32>
    %212 = arith.mulf %209, %211 : vector<16x128xf32>
    %213 = arith.addf %207, %212 : vector<16x128xf32>
    %214 = vector.extract_strided_slice %185 {offsets = [2, 0, 0], sizes = [1, 16, 128], strides = [1, 1, 1]} : vector<3x16x128xf32> to vector<1x16x128xf32>
    %215 = vector.shape_cast %214 : vector<1x16x128xf32> to vector<16x128xf32>
    %216 = vector.extract_strided_slice %185 {offsets = [2, 0, 0], sizes = [1, 16, 128], strides = [1, 1, 1]} : vector<3x16x128xf32> to vector<1x16x128xf32>
    %217 = vector.shape_cast %216 : vector<1x16x128xf32> to vector<16x128xf32>
    %218 = arith.mulf %215, %217 : vector<16x128xf32>
    %219 = arith.addf %213, %218 : vector<16x128xf32>
    %cst_33 = arith.constant 0.000000e+00 : f32
    %220 = vector.broadcast %cst_33 : f32 to vector<16x128xf32>
    %221 = arith.cmpf oge, %202, %220 : vector<16x128xf32>
    %cst_34 = arith.constant 9.99999997E-7 : f32
    %222 = vector.broadcast %cst_34 : f32 to vector<16x128xf32>
    %223 = arith.addf %219, %222 : vector<16x128xf32>
    %224 = tpu.reciprocal %223 {approx = true} : vector<16x128xf32> -> vector<16x128xf32>
    %225 = arith.mulf %202, %224 : vector<16x128xf32>
    %cst_35 = arith.constant 0.000000e+00 : f32
    %226 = vector.broadcast %cst_35 : f32 to vector<16x128xf32>
    %227 = arith.select %221, %226, %225 : vector<16x128xi1>, vector<16x128xf32>
    %228 = vector.shape_cast %227 : vector<16x128xf32> to vector<1x16x128xf32>
    %229 = vector.broadcast %228 : vector<1x16x128xf32> to vector<3x16x128xf32>
    %230 = arith.mulf %229, %185 : vector<3x16x128xf32>
    %231 = arith.subf %184, %230 : vector<3x16x128xf32>
    %cst_36 = arith.constant 2.000000e-01 : f32
    %232 = vector.broadcast %cst_36 : f32 to vector<3x16x128xf32>
    %233 = arith.mulf %232, %184 : vector<3x16x128xf32>
    %cst_37 = arith.constant 8.000000e-01 : f32
    %234 = vector.broadcast %cst_37 : f32 to vector<3x16x128xf32>
    %235 = arith.mulf %234, %231 : vector<3x16x128xf32>
    %236 = arith.addf %233, %235 : vector<3x16x128xf32>
    %237 = arith.addf %178, %236 : vector<3x16x128xf32>
    %c0_38 = arith.constant 0 : index
    %c4 = arith.constant 4 : index
    %c0_39 = arith.constant 0 : index
    %c0_40 = arith.constant 0 : index
    %238 = vector.load %arg1[%c0_38, %c4, %c0_39, %c0_40] : memref<3x8x16x3xf32, #tpu.memory_space<vmem>>, vector<3x1x16x3xf32>
    %239 = vector.shape_cast %238 : vector<3x1x16x3xf32> to vector<3x16x3xf32>
    %240 = vector.shape_cast %239 : vector<3x16x3xf32> to vector<48x3xf32>
    %cst_41 = arith.constant dense<0.000000e+00> : vector<48x256xf32>
    %241 = tpu.matmul %240, %0, %cst_41 {dimension_numbers = #tpu.dot_dimension_numbers<[1], [0], [0], [1], [0, 0, 1, 1], [], []>} : vector<48x3xf32>, vector<3x256xf32>, vector<48x256xf32> -> vector<48x256xf32>
    %242 = vector.shape_cast %241 : vector<48x256xf32> to vector<3x16x256xf32>
    %243 = vector.extract_strided_slice %242 {offsets = [0, 0, 0], sizes = [3, 16, 128], strides = [1, 1, 1]} : vector<3x16x256xf32> to vector<3x16x128xf32>
    %244 = vector.extract_strided_slice %242 {offsets = [0, 0, 128], sizes = [3, 16, 128], strides = [1, 1, 1]} : vector<3x16x256xf32> to vector<3x16x128xf32>
    %245 = vector.extract_strided_slice %243 {offsets = [0, 0, 0], sizes = [1, 16, 128], strides = [1, 1, 1]} : vector<3x16x128xf32> to vector<1x16x128xf32>
    %246 = vector.shape_cast %245 : vector<1x16x128xf32> to vector<16x128xf32>
    %247 = vector.extract_strided_slice %244 {offsets = [0, 0, 0], sizes = [1, 16, 128], strides = [1, 1, 1]} : vector<3x16x128xf32> to vector<1x16x128xf32>
    %248 = vector.shape_cast %247 : vector<1x16x128xf32> to vector<16x128xf32>
    %249 = arith.mulf %246, %248 : vector<16x128xf32>
    %250 = vector.extract_strided_slice %243 {offsets = [1, 0, 0], sizes = [1, 16, 128], strides = [1, 1, 1]} : vector<3x16x128xf32> to vector<1x16x128xf32>
    %251 = vector.shape_cast %250 : vector<1x16x128xf32> to vector<16x128xf32>
    %252 = vector.extract_strided_slice %244 {offsets = [1, 0, 0], sizes = [1, 16, 128], strides = [1, 1, 1]} : vector<3x16x128xf32> to vector<1x16x128xf32>
    %253 = vector.shape_cast %252 : vector<1x16x128xf32> to vector<16x128xf32>
    %254 = arith.mulf %251, %253 : vector<16x128xf32>
    %255 = arith.addf %249, %254 : vector<16x128xf32>
    %256 = vector.extract_strided_slice %243 {offsets = [2, 0, 0], sizes = [1, 16, 128], strides = [1, 1, 1]} : vector<3x16x128xf32> to vector<1x16x128xf32>
    %257 = vector.shape_cast %256 : vector<1x16x128xf32> to vector<16x128xf32>
    %258 = vector.extract_strided_slice %244 {offsets = [2, 0, 0], sizes = [1, 16, 128], strides = [1, 1, 1]} : vector<3x16x128xf32> to vector<1x16x128xf32>
    %259 = vector.shape_cast %258 : vector<1x16x128xf32> to vector<16x128xf32>
    %260 = arith.mulf %257, %259 : vector<16x128xf32>
    %261 = arith.addf %255, %260 : vector<16x128xf32>
    %262 = vector.extract_strided_slice %244 {offsets = [0, 0, 0], sizes = [1, 16, 128], strides = [1, 1, 1]} : vector<3x16x128xf32> to vector<1x16x128xf32>
    %263 = vector.shape_cast %262 : vector<1x16x128xf32> to vector<16x128xf32>
    %264 = vector.extract_strided_slice %244 {offsets = [0, 0, 0], sizes = [1, 16, 128], strides = [1, 1, 1]} : vector<3x16x128xf32> to vector<1x16x128xf32>
    %265 = vector.shape_cast %264 : vector<1x16x128xf32> to vector<16x128xf32>
    %266 = arith.mulf %263, %265 : vector<16x128xf32>
    %267 = vector.extract_strided_slice %244 {offsets = [1, 0, 0], sizes = [1, 16, 128], strides = [1, 1, 1]} : vector<3x16x128xf32> to vector<1x16x128xf32>
    %268 = vector.shape_cast %267 : vector<1x16x128xf32> to vector<16x128xf32>
    %269 = vector.extract_strided_slice %244 {offsets = [1, 0, 0], sizes = [1, 16, 128], strides = [1, 1, 1]} : vector<3x16x128xf32> to vector<1x16x128xf32>
    %270 = vector.shape_cast %269 : vector<1x16x128xf32> to vector<16x128xf32>
    %271 = arith.mulf %268, %270 : vector<16x128xf32>
    %272 = arith.addf %266, %271 : vector<16x128xf32>
    %273 = vector.extract_strided_slice %244 {offsets = [2, 0, 0], sizes = [1, 16, 128], strides = [1, 1, 1]} : vector<3x16x128xf32> to vector<1x16x128xf32>
    %274 = vector.shape_cast %273 : vector<1x16x128xf32> to vector<16x128xf32>
    %275 = vector.extract_strided_slice %244 {offsets = [2, 0, 0], sizes = [1, 16, 128], strides = [1, 1, 1]} : vector<3x16x128xf32> to vector<1x16x128xf32>
    %276 = vector.shape_cast %275 : vector<1x16x128xf32> to vector<16x128xf32>
    %277 = arith.mulf %274, %276 : vector<16x128xf32>
    %278 = arith.addf %272, %277 : vector<16x128xf32>
    %cst_42 = arith.constant 0.000000e+00 : f32
    %279 = vector.broadcast %cst_42 : f32 to vector<16x128xf32>
    %280 = arith.cmpf oge, %261, %279 : vector<16x128xf32>
    %cst_43 = arith.constant 9.99999997E-7 : f32
    %281 = vector.broadcast %cst_43 : f32 to vector<16x128xf32>
    %282 = arith.addf %278, %281 : vector<16x128xf32>
    %283 = tpu.reciprocal %282 {approx = true} : vector<16x128xf32> -> vector<16x128xf32>
    %284 = arith.mulf %261, %283 : vector<16x128xf32>
    %cst_44 = arith.constant 0.000000e+00 : f32
    %285 = vector.broadcast %cst_44 : f32 to vector<16x128xf32>
    %286 = arith.select %280, %285, %284 : vector<16x128xi1>, vector<16x128xf32>
    %287 = vector.shape_cast %286 : vector<16x128xf32> to vector<1x16x128xf32>
    %288 = vector.broadcast %287 : vector<1x16x128xf32> to vector<3x16x128xf32>
    %289 = arith.mulf %288, %244 : vector<3x16x128xf32>
    %290 = arith.subf %243, %289 : vector<3x16x128xf32>
    %cst_45 = arith.constant 2.000000e-01 : f32
    %291 = vector.broadcast %cst_45 : f32 to vector<3x16x128xf32>
    %292 = arith.mulf %291, %243 : vector<3x16x128xf32>
    %cst_46 = arith.constant 8.000000e-01 : f32
    %293 = vector.broadcast %cst_46 : f32 to vector<3x16x128xf32>
    %294 = arith.mulf %293, %290 : vector<3x16x128xf32>
    %295 = arith.addf %292, %294 : vector<3x16x128xf32>
    %296 = arith.addf %237, %295 : vector<3x16x128xf32>
    %c0_47 = arith.constant 0 : index
    %c5 = arith.constant 5 : index
    %c0_48 = arith.constant 0 : index
    %c0_49 = arith.constant 0 : index
    %297 = vector.load %arg1[%c0_47, %c5, %c0_48, %c0_49] : memref<3x8x16x3xf32, #tpu.memory_space<vmem>>, vector<3x1x16x3xf32>
    %298 = vector.shape_cast %297 : vector<3x1x16x3xf32> to vector<3x16x3xf32>
    %299 = vector.shape_cast %298 : vector<3x16x3xf32> to vector<48x3xf32>
    %cst_50 = arith.constant dense<0.000000e+00> : vector<48x256xf32>
    %300 = tpu.matmul %299, %0, %cst_50 {dimension_numbers = #tpu.dot_dimension_numbers<[1], [0], [0], [1], [0, 0, 1, 1], [], []>} : vector<48x3xf32>, vector<3x256xf32>, vector<48x256xf32> -> vector<48x256xf32>
    %301 = vector.shape_cast %300 : vector<48x256xf32> to vector<3x16x256xf32>
    %302 = vector.extract_strided_slice %301 {offsets = [0, 0, 0], sizes = [3, 16, 128], strides = [1, 1, 1]} : vector<3x16x256xf32> to vector<3x16x128xf32>
    %303 = vector.extract_strided_slice %301 {offsets = [0, 0, 128], sizes = [3, 16, 128], strides = [1, 1, 1]} : vector<3x16x256xf32> to vector<3x16x128xf32>
    %304 = vector.extract_strided_slice %302 {offsets = [0, 0, 0], sizes = [1, 16, 128], strides = [1, 1, 1]} : vector<3x16x128xf32> to vector<1x16x128xf32>
    %305 = vector.shape_cast %304 : vector<1x16x128xf32> to vector<16x128xf32>
    %306 = vector.extract_strided_slice %303 {offsets = [0, 0, 0], sizes = [1, 16, 128], strides = [1, 1, 1]} : vector<3x16x128xf32> to vector<1x16x128xf32>
    %307 = vector.shape_cast %306 : vector<1x16x128xf32> to vector<16x128xf32>
    %308 = arith.mulf %305, %307 : vector<16x128xf32>
    %309 = vector.extract_strided_slice %302 {offsets = [1, 0, 0], sizes = [1, 16, 128], strides = [1, 1, 1]} : vector<3x16x128xf32> to vector<1x16x128xf32>
    %310 = vector.shape_cast %309 : vector<1x16x128xf32> to vector<16x128xf32>
    %311 = vector.extract_strided_slice %303 {offsets = [1, 0, 0], sizes = [1, 16, 128], strides = [1, 1, 1]} : vector<3x16x128xf32> to vector<1x16x128xf32>
    %312 = vector.shape_cast %311 : vector<1x16x128xf32> to vector<16x128xf32>
    %313 = arith.mulf %310, %312 : vector<16x128xf32>
    %314 = arith.addf %308, %313 : vector<16x128xf32>
    %315 = vector.extract_strided_slice %302 {offsets = [2, 0, 0], sizes = [1, 16, 128], strides = [1, 1, 1]} : vector<3x16x128xf32> to vector<1x16x128xf32>
    %316 = vector.shape_cast %315 : vector<1x16x128xf32> to vector<16x128xf32>
    %317 = vector.extract_strided_slice %303 {offsets = [2, 0, 0], sizes = [1, 16, 128], strides = [1, 1, 1]} : vector<3x16x128xf32> to vector<1x16x128xf32>
    %318 = vector.shape_cast %317 : vector<1x16x128xf32> to vector<16x128xf32>
    %319 = arith.mulf %316, %318 : vector<16x128xf32>
    %320 = arith.addf %314, %319 : vector<16x128xf32>
    %321 = vector.extract_strided_slice %303 {offsets = [0, 0, 0], sizes = [1, 16, 128], strides = [1, 1, 1]} : vector<3x16x128xf32> to vector<1x16x128xf32>
    %322 = vector.shape_cast %321 : vector<1x16x128xf32> to vector<16x128xf32>
    %323 = vector.extract_strided_slice %303 {offsets = [0, 0, 0], sizes = [1, 16, 128], strides = [1, 1, 1]} : vector<3x16x128xf32> to vector<1x16x128xf32>
    %324 = vector.shape_cast %323 : vector<1x16x128xf32> to vector<16x128xf32>
    %325 = arith.mulf %322, %324 : vector<16x128xf32>
    %326 = vector.extract_strided_slice %303 {offsets = [1, 0, 0], sizes = [1, 16, 128], strides = [1, 1, 1]} : vector<3x16x128xf32> to vector<1x16x128xf32>
    %327 = vector.shape_cast %326 : vector<1x16x128xf32> to vector<16x128xf32>
    %328 = vector.extract_strided_slice %303 {offsets = [1, 0, 0], sizes = [1, 16, 128], strides = [1, 1, 1]} : vector<3x16x128xf32> to vector<1x16x128xf32>
    %329 = vector.shape_cast %328 : vector<1x16x128xf32> to vector<16x128xf32>
    %330 = arith.mulf %327, %329 : vector<16x128xf32>
    %331 = arith.addf %325, %330 : vector<16x128xf32>
    %332 = vector.extract_strided_slice %303 {offsets = [2, 0, 0], sizes = [1, 16, 128], strides = [1, 1, 1]} : vector<3x16x128xf32> to vector<1x16x128xf32>
    %333 = vector.shape_cast %332 : vector<1x16x128xf32> to vector<16x128xf32>
    %334 = vector.extract_strided_slice %303 {offsets = [2, 0, 0], sizes = [1, 16, 128], strides = [1, 1, 1]} : vector<3x16x128xf32> to vector<1x16x128xf32>
    %335 = vector.shape_cast %334 : vector<1x16x128xf32> to vector<16x128xf32>
    %336 = arith.mulf %333, %335 : vector<16x128xf32>
    %337 = arith.addf %331, %336 : vector<16x128xf32>
    %cst_51 = arith.constant 0.000000e+00 : f32
    %338 = vector.broadcast %cst_51 : f32 to vector<16x128xf32>
    %339 = arith.cmpf oge, %320, %338 : vector<16x128xf32>
    %cst_52 = arith.constant 9.99999997E-7 : f32
    %340 = vector.broadcast %cst_52 : f32 to vector<16x128xf32>
    %341 = arith.addf %337, %340 : vector<16x128xf32>
    %342 = tpu.reciprocal %341 {approx = true} : vector<16x128xf32> -> vector<16x128xf32>
    %343 = arith.mulf %320, %342 : vector<16x128xf32>
    %cst_53 = arith.constant 0.000000e+00 : f32
    %344 = vector.broadcast %cst_53 : f32 to vector<16x128xf32>
    %345 = arith.select %339, %344, %343 : vector<16x128xi1>, vector<16x128xf32>
    %346 = vector.shape_cast %345 : vector<16x128xf32> to vector<1x16x128xf32>
    %347 = vector.broadcast %346 : vector<1x16x128xf32> to vector<3x16x128xf32>
    %348 = arith.mulf %347, %303 : vector<3x16x128xf32>
    %349 = arith.subf %302, %348 : vector<3x16x128xf32>
    %cst_54 = arith.constant 2.000000e-01 : f32
    %350 = vector.broadcast %cst_54 : f32 to vector<3x16x128xf32>
    %351 = arith.mulf %350, %302 : vector<3x16x128xf32>
    %cst_55 = arith.constant 8.000000e-01 : f32
    %352 = vector.broadcast %cst_55 : f32 to vector<3x16x128xf32>
    %353 = arith.mulf %352, %349 : vector<3x16x128xf32>
    %354 = arith.addf %351, %353 : vector<3x16x128xf32>
    %355 = arith.addf %296, %354 : vector<3x16x128xf32>
    %c0_56 = arith.constant 0 : index
    %c6 = arith.constant 6 : index
    %c0_57 = arith.constant 0 : index
    %c0_58 = arith.constant 0 : index
    %356 = vector.load %arg1[%c0_56, %c6, %c0_57, %c0_58] : memref<3x8x16x3xf32, #tpu.memory_space<vmem>>, vector<3x1x16x3xf32>
    %357 = vector.shape_cast %356 : vector<3x1x16x3xf32> to vector<3x16x3xf32>
    %358 = vector.shape_cast %357 : vector<3x16x3xf32> to vector<48x3xf32>
    %cst_59 = arith.constant dense<0.000000e+00> : vector<48x256xf32>
    %359 = tpu.matmul %358, %0, %cst_59 {dimension_numbers = #tpu.dot_dimension_numbers<[1], [0], [0], [1], [0, 0, 1, 1], [], []>} : vector<48x3xf32>, vector<3x256xf32>, vector<48x256xf32> -> vector<48x256xf32>
    %360 = vector.shape_cast %359 : vector<48x256xf32> to vector<3x16x256xf32>
    %361 = vector.extract_strided_slice %360 {offsets = [0, 0, 0], sizes = [3, 16, 128], strides = [1, 1, 1]} : vector<3x16x256xf32> to vector<3x16x128xf32>
    %362 = vector.extract_strided_slice %360 {offsets = [0, 0, 128], sizes = [3, 16, 128], strides = [1, 1, 1]} : vector<3x16x256xf32> to vector<3x16x128xf32>
    %363 = vector.extract_strided_slice %361 {offsets = [0, 0, 0], sizes = [1, 16, 128], strides = [1, 1, 1]} : vector<3x16x128xf32> to vector<1x16x128xf32>
    %364 = vector.shape_cast %363 : vector<1x16x128xf32> to vector<16x128xf32>
    %365 = vector.extract_strided_slice %362 {offsets = [0, 0, 0], sizes = [1, 16, 128], strides = [1, 1, 1]} : vector<3x16x128xf32> to vector<1x16x128xf32>
    %366 = vector.shape_cast %365 : vector<1x16x128xf32> to vector<16x128xf32>
    %367 = arith.mulf %364, %366 : vector<16x128xf32>
    %368 = vector.extract_strided_slice %361 {offsets = [1, 0, 0], sizes = [1, 16, 128], strides = [1, 1, 1]} : vector<3x16x128xf32> to vector<1x16x128xf32>
    %369 = vector.shape_cast %368 : vector<1x16x128xf32> to vector<16x128xf32>
    %370 = vector.extract_strided_slice %362 {offsets = [1, 0, 0], sizes = [1, 16, 128], strides = [1, 1, 1]} : vector<3x16x128xf32> to vector<1x16x128xf32>
    %371 = vector.shape_cast %370 : vector<1x16x128xf32> to vector<16x128xf32>
    %372 = arith.mulf %369, %371 : vector<16x128xf32>
    %373 = arith.addf %367, %372 : vector<16x128xf32>
    %374 = vector.extract_strided_slice %361 {offsets = [2, 0, 0], sizes = [1, 16, 128], strides = [1, 1, 1]} : vector<3x16x128xf32> to vector<1x16x128xf32>
    %375 = vector.shape_cast %374 : vector<1x16x128xf32> to vector<16x128xf32>
    %376 = vector.extract_strided_slice %362 {offsets = [2, 0, 0], sizes = [1, 16, 128], strides = [1, 1, 1]} : vector<3x16x128xf32> to vector<1x16x128xf32>
    %377 = vector.shape_cast %376 : vector<1x16x128xf32> to vector<16x128xf32>
    %378 = arith.mulf %375, %377 : vector<16x128xf32>
    %379 = arith.addf %373, %378 : vector<16x128xf32>
    %380 = vector.extract_strided_slice %362 {offsets = [0, 0, 0], sizes = [1, 16, 128], strides = [1, 1, 1]} : vector<3x16x128xf32> to vector<1x16x128xf32>
    %381 = vector.shape_cast %380 : vector<1x16x128xf32> to vector<16x128xf32>
    %382 = vector.extract_strided_slice %362 {offsets = [0, 0, 0], sizes = [1, 16, 128], strides = [1, 1, 1]} : vector<3x16x128xf32> to vector<1x16x128xf32>
    %383 = vector.shape_cast %382 : vector<1x16x128xf32> to vector<16x128xf32>
    %384 = arith.mulf %381, %383 : vector<16x128xf32>
    %385 = vector.extract_strided_slice %362 {offsets = [1, 0, 0], sizes = [1, 16, 128], strides = [1, 1, 1]} : vector<3x16x128xf32> to vector<1x16x128xf32>
    %386 = vector.shape_cast %385 : vector<1x16x128xf32> to vector<16x128xf32>
    %387 = vector.extract_strided_slice %362 {offsets = [1, 0, 0], sizes = [1, 16, 128], strides = [1, 1, 1]} : vector<3x16x128xf32> to vector<1x16x128xf32>
    %388 = vector.shape_cast %387 : vector<1x16x128xf32> to vector<16x128xf32>
    %389 = arith.mulf %386, %388 : vector<16x128xf32>
    %390 = arith.addf %384, %389 : vector<16x128xf32>
    %391 = vector.extract_strided_slice %362 {offsets = [2, 0, 0], sizes = [1, 16, 128], strides = [1, 1, 1]} : vector<3x16x128xf32> to vector<1x16x128xf32>
    %392 = vector.shape_cast %391 : vector<1x16x128xf32> to vector<16x128xf32>
    %393 = vector.extract_strided_slice %362 {offsets = [2, 0, 0], sizes = [1, 16, 128], strides = [1, 1, 1]} : vector<3x16x128xf32> to vector<1x16x128xf32>
    %394 = vector.shape_cast %393 : vector<1x16x128xf32> to vector<16x128xf32>
    %395 = arith.mulf %392, %394 : vector<16x128xf32>
    %396 = arith.addf %390, %395 : vector<16x128xf32>
    %cst_60 = arith.constant 0.000000e+00 : f32
    %397 = vector.broadcast %cst_60 : f32 to vector<16x128xf32>
    %398 = arith.cmpf oge, %379, %397 : vector<16x128xf32>
    %cst_61 = arith.constant 9.99999997E-7 : f32
    %399 = vector.broadcast %cst_61 : f32 to vector<16x128xf32>
    %400 = arith.addf %396, %399 : vector<16x128xf32>
    %401 = tpu.reciprocal %400 {approx = true} : vector<16x128xf32> -> vector<16x128xf32>
    %402 = arith.mulf %379, %401 : vector<16x128xf32>
    %cst_62 = arith.constant 0.000000e+00 : f32
    %403 = vector.broadcast %cst_62 : f32 to vector<16x128xf32>
    %404 = arith.select %398, %403, %402 : vector<16x128xi1>, vector<16x128xf32>
    %405 = vector.shape_cast %404 : vector<16x128xf32> to vector<1x16x128xf32>
    %406 = vector.broadcast %405 : vector<1x16x128xf32> to vector<3x16x128xf32>
    %407 = arith.mulf %406, %362 : vector<3x16x128xf32>
    %408 = arith.subf %361, %407 : vector<3x16x128xf32>
    %cst_63 = arith.constant 2.000000e-01 : f32
    %409 = vector.broadcast %cst_63 : f32 to vector<3x16x128xf32>
    %410 = arith.mulf %409, %361 : vector<3x16x128xf32>
    %cst_64 = arith.constant 8.000000e-01 : f32
    %411 = vector.broadcast %cst_64 : f32 to vector<3x16x128xf32>
    %412 = arith.mulf %411, %408 : vector<3x16x128xf32>
    %413 = arith.addf %410, %412 : vector<3x16x128xf32>
    %414 = arith.addf %355, %413 : vector<3x16x128xf32>
    %c0_65 = arith.constant 0 : index
    %c7 = arith.constant 7 : index
    %c0_66 = arith.constant 0 : index
    %c0_67 = arith.constant 0 : index
    %415 = vector.load %arg1[%c0_65, %c7, %c0_66, %c0_67] : memref<3x8x16x3xf32, #tpu.memory_space<vmem>>, vector<3x1x16x3xf32>
    %416 = vector.shape_cast %415 : vector<3x1x16x3xf32> to vector<3x16x3xf32>
    %417 = vector.shape_cast %416 : vector<3x16x3xf32> to vector<48x3xf32>
    %cst_68 = arith.constant dense<0.000000e+00> : vector<48x256xf32>
    %418 = tpu.matmul %417, %0, %cst_68 {dimension_numbers = #tpu.dot_dimension_numbers<[1], [0], [0], [1], [0, 0, 1, 1], [], []>} : vector<48x3xf32>, vector<3x256xf32>, vector<48x256xf32> -> vector<48x256xf32>
    %419 = vector.shape_cast %418 : vector<48x256xf32> to vector<3x16x256xf32>
    %420 = vector.extract_strided_slice %419 {offsets = [0, 0, 0], sizes = [3, 16, 128], strides = [1, 1, 1]} : vector<3x16x256xf32> to vector<3x16x128xf32>
    %421 = vector.extract_strided_slice %419 {offsets = [0, 0, 128], sizes = [3, 16, 128], strides = [1, 1, 1]} : vector<3x16x256xf32> to vector<3x16x128xf32>
    %422 = vector.extract_strided_slice %420 {offsets = [0, 0, 0], sizes = [1, 16, 128], strides = [1, 1, 1]} : vector<3x16x128xf32> to vector<1x16x128xf32>
    %423 = vector.shape_cast %422 : vector<1x16x128xf32> to vector<16x128xf32>
    %424 = vector.extract_strided_slice %421 {offsets = [0, 0, 0], sizes = [1, 16, 128], strides = [1, 1, 1]} : vector<3x16x128xf32> to vector<1x16x128xf32>
    %425 = vector.shape_cast %424 : vector<1x16x128xf32> to vector<16x128xf32>
    %426 = arith.mulf %423, %425 : vector<16x128xf32>
    %427 = vector.extract_strided_slice %420 {offsets = [1, 0, 0], sizes = [1, 16, 128], strides = [1, 1, 1]} : vector<3x16x128xf32> to vector<1x16x128xf32>
    %428 = vector.shape_cast %427 : vector<1x16x128xf32> to vector<16x128xf32>
    %429 = vector.extract_strided_slice %421 {offsets = [1, 0, 0], sizes = [1, 16, 128], strides = [1, 1, 1]} : vector<3x16x128xf32> to vector<1x16x128xf32>
    %430 = vector.shape_cast %429 : vector<1x16x128xf32> to vector<16x128xf32>
    %431 = arith.mulf %428, %430 : vector<16x128xf32>
    %432 = arith.addf %426, %431 : vector<16x128xf32>
    %433 = vector.extract_strided_slice %420 {offsets = [2, 0, 0], sizes = [1, 16, 128], strides = [1, 1, 1]} : vector<3x16x128xf32> to vector<1x16x128xf32>
    %434 = vector.shape_cast %433 : vector<1x16x128xf32> to vector<16x128xf32>
    %435 = vector.extract_strided_slice %421 {offsets = [2, 0, 0], sizes = [1, 16, 128], strides = [1, 1, 1]} : vector<3x16x128xf32> to vector<1x16x128xf32>
    %436 = vector.shape_cast %435 : vector<1x16x128xf32> to vector<16x128xf32>
    %437 = arith.mulf %434, %436 : vector<16x128xf32>
    %438 = arith.addf %432, %437 : vector<16x128xf32>
    %439 = vector.extract_strided_slice %421 {offsets = [0, 0, 0], sizes = [1, 16, 128], strides = [1, 1, 1]} : vector<3x16x128xf32> to vector<1x16x128xf32>
    %440 = vector.shape_cast %439 : vector<1x16x128xf32> to vector<16x128xf32>
    %441 = vector.extract_strided_slice %421 {offsets = [0, 0, 0], sizes = [1, 16, 128], strides = [1, 1, 1]} : vector<3x16x128xf32> to vector<1x16x128xf32>
    %442 = vector.shape_cast %441 : vector<1x16x128xf32> to vector<16x128xf32>
    %443 = arith.mulf %440, %442 : vector<16x128xf32>
    %444 = vector.extract_strided_slice %421 {offsets = [1, 0, 0], sizes = [1, 16, 128], strides = [1, 1, 1]} : vector<3x16x128xf32> to vector<1x16x128xf32>
    %445 = vector.shape_cast %444 : vector<1x16x128xf32> to vector<16x128xf32>
    %446 = vector.extract_strided_slice %421 {offsets = [1, 0, 0], sizes = [1, 16, 128], strides = [1, 1, 1]} : vector<3x16x128xf32> to vector<1x16x128xf32>
    %447 = vector.shape_cast %446 : vector<1x16x128xf32> to vector<16x128xf32>
    %448 = arith.mulf %445, %447 : vector<16x128xf32>
    %449 = arith.addf %443, %448 : vector<16x128xf32>
    %450 = vector.extract_strided_slice %421 {offsets = [2, 0, 0], sizes = [1, 16, 128], strides = [1, 1, 1]} : vector<3x16x128xf32> to vector<1x16x128xf32>
    %451 = vector.shape_cast %450 : vector<1x16x128xf32> to vector<16x128xf32>
    %452 = vector.extract_strided_slice %421 {offsets = [2, 0, 0], sizes = [1, 16, 128], strides = [1, 1, 1]} : vector<3x16x128xf32> to vector<1x16x128xf32>
    %453 = vector.shape_cast %452 : vector<1x16x128xf32> to vector<16x128xf32>
    %454 = arith.mulf %451, %453 : vector<16x128xf32>
    %455 = arith.addf %449, %454 : vector<16x128xf32>
    %cst_69 = arith.constant 0.000000e+00 : f32
    %456 = vector.broadcast %cst_69 : f32 to vector<16x128xf32>
    %457 = arith.cmpf oge, %438, %456 : vector<16x128xf32>
    %cst_70 = arith.constant 9.99999997E-7 : f32
    %458 = vector.broadcast %cst_70 : f32 to vector<16x128xf32>
    %459 = arith.addf %455, %458 : vector<16x128xf32>
    %460 = tpu.reciprocal %459 {approx = true} : vector<16x128xf32> -> vector<16x128xf32>
    %461 = arith.mulf %438, %460 : vector<16x128xf32>
    %cst_71 = arith.constant 0.000000e+00 : f32
    %462 = vector.broadcast %cst_71 : f32 to vector<16x128xf32>
    %463 = arith.select %457, %462, %461 : vector<16x128xi1>, vector<16x128xf32>
    %464 = vector.shape_cast %463 : vector<16x128xf32> to vector<1x16x128xf32>
    %465 = vector.broadcast %464 : vector<1x16x128xf32> to vector<3x16x128xf32>
    %466 = arith.mulf %465, %421 : vector<3x16x128xf32>
    %467 = arith.subf %420, %466 : vector<3x16x128xf32>
    %cst_72 = arith.constant 2.000000e-01 : f32
    %468 = vector.broadcast %cst_72 : f32 to vector<3x16x128xf32>
    %469 = arith.mulf %468, %420 : vector<3x16x128xf32>
    %cst_73 = arith.constant 8.000000e-01 : f32
    %470 = vector.broadcast %cst_73 : f32 to vector<3x16x128xf32>
    %471 = arith.mulf %470, %467 : vector<3x16x128xf32>
    %472 = arith.addf %469, %471 : vector<3x16x128xf32>
    %473 = arith.addf %414, %472 : vector<3x16x128xf32>
    %cst_74 = arith.constant 1.250000e-01 : f32
    %474 = vector.broadcast %cst_74 : f32 to vector<3x16x128xf32>
    %475 = arith.mulf %473, %474 : vector<3x16x128xf32>
    %c0_75 = arith.constant 0 : index
    %c0_76 = arith.constant 0 : index
    %c0_77 = arith.constant 0 : index
    %476 = vector.load %arg3[%c0_75, %c0_76, %c0_77] : memref<3x16x128xf32, #tpu.memory_space<vmem>>, vector<3x16x128xf32>
    tpu.vector_store %arg3[%c0_75, %c0_76, %c0_77], %475 {strides = array<i32>} : memref<3x16x128xf32, #tpu.memory_space<vmem>>, vector<3x16x128xf32>,
    return
  }
  func.func @transform_0(%arg0: i32) -> (i32, i32, i32, i32) {
    %c0_i32 = arith.constant 0 : i32
    %c0_i32_0 = arith.constant 0 : i32
    %c0_i32_1 = arith.constant 0 : i32
    %c0_i32_2 = arith.constant 0 : i32
    return %c0_i32, %c0_i32_0, %arg0, %c0_i32_1 : i32, i32, i32, i32
  }
  func.func @transform_1(%arg0: i32) -> (i32, i32) {
    %c0_i32 = arith.constant 0 : i32
    %c0_i32_0 = arith.constant 0 : i32
    %c0_i32_1 = arith.constant 0 : i32
    return %c0_i32, %c0_i32_0 : i32, i32
  }
  func.func @transform_2(%arg0: i32) -> (i32, i32, i32) {
    %c0_i32 = arith.constant 0 : i32
    %c0_i32_0 = arith.constant 0 : i32
    %c0_i32_1 = arith.constant 0 : i32
    return %c0_i32, %arg0, %c0_i32_0 : i32, i32, i32
  }
}

module attributes {stable_mosaic.version = 11 : i64} {
  func.func @vn_resnet_block_kernel(%arg0: i32, %arg1: memref<3x16x128xf32, #tpu.memory_space<vmem>>, %arg2: memref<128x192xf32, #tpu.memory_space<vmem>>, %arg3: memref<128x64xf32, #tpu.memory_space<vmem>>, %arg4: memref<64x64xf32, #tpu.memory_space<vmem>>, %arg5: memref<64x64xf32, #tpu.memory_space<vmem>>, %arg6: memref<3x16x64xf32, #tpu.memory_space<vmem>>) attributes {dimension_semantics = [#tpu.dimension_semantics<parallel>], iteration_bounds = array<i64: 2>, scalar_prefetch = 0 : i64, scratch_operands = 0 : i64, tpu.core_type = #tpu.core_type<tc>, window_params = [{transform_indices = @transform_0, window_bounds = array<i64: 3, 16, 128>}, {pipeline_mode = #tpu.pipeline_mode<synchronous>, transform_indices = @transform_1, window_bounds = array<i64: 128, 192>}, {pipeline_mode = #tpu.pipeline_mode<synchronous>, transform_indices = @transform_2, window_bounds = array<i64: 128, 64>}, {pipeline_mode = #tpu.pipeline_mode<synchronous>, transform_indices = @transform_3, window_bounds = array<i64: 64, 64>}, {pipeline_mode = #tpu.pipeline_mode<synchronous>, transform_indices = @transform_4, window_bounds = array<i64: 64, 64>}, {transform_indices = @transform_5, window_bounds = array<i64: 3, 16, 64>}]} {
    %c0 = arith.constant 0 : index
    %c0_0 = arith.constant 0 : index
    %c0_1 = arith.constant 0 : index
    %0 = vector.load %arg1[%c0, %c0_0, %c0_1] : memref<3x16x128xf32, #tpu.memory_space<vmem>>, vector<3x16x128xf32>
    %1 = vector.shape_cast %0 : vector<3x16x128xf32> to vector<48x128xf32>
    %c0_2 = arith.constant 0 : index
    %c0_3 = arith.constant 0 : index
    %2 = vector.load %arg2[%c0_2, %c0_3] : memref<128x192xf32, #tpu.memory_space<vmem>>, vector<128x192xf32>
    %cst = arith.constant dense<0.000000e+00> : vector<48x192xf32>
    %3 = tpu.matmul %1, %2, %cst {dimension_numbers = #tpu.dot_dimension_numbers<[1], [0], [0], [1], [0, 0, 1, 1], [], []>} : vector<48x128xf32>, vector<128x192xf32>, vector<48x192xf32> -> vector<48x192xf32>
    %4 = vector.extract_strided_slice %3 {offsets = [0, 0], sizes = [48, 128], strides = [1, 1]} : vector<48x192xf32> to vector<48x128xf32>
    %5 = vector.shape_cast %4 : vector<48x128xf32> to vector<3x16x128xf32>
    %6 = vector.extract_strided_slice %3 {offsets = [0, 128], sizes = [48, 64], strides = [1, 1]} : vector<48x192xf32> to vector<48x64xf32>
    %7 = vector.extract_strided_slice %0 {offsets = [0, 0, 0], sizes = [1, 16, 128], strides = [1, 1, 1]} : vector<3x16x128xf32> to vector<1x16x128xf32>
    %8 = vector.shape_cast %7 : vector<1x16x128xf32> to vector<16x128xf32>
    %9 = vector.extract_strided_slice %5 {offsets = [0, 0, 0], sizes = [1, 16, 128], strides = [1, 1, 1]} : vector<3x16x128xf32> to vector<1x16x128xf32>
    %10 = vector.shape_cast %9 : vector<1x16x128xf32> to vector<16x128xf32>
    %11 = arith.mulf %8, %10 : vector<16x128xf32>
    %12 = vector.extract_strided_slice %0 {offsets = [1, 0, 0], sizes = [1, 16, 128], strides = [1, 1, 1]} : vector<3x16x128xf32> to vector<1x16x128xf32>
    %13 = vector.shape_cast %12 : vector<1x16x128xf32> to vector<16x128xf32>
    %14 = vector.extract_strided_slice %5 {offsets = [1, 0, 0], sizes = [1, 16, 128], strides = [1, 1, 1]} : vector<3x16x128xf32> to vector<1x16x128xf32>
    %15 = vector.shape_cast %14 : vector<1x16x128xf32> to vector<16x128xf32>
    %16 = arith.mulf %13, %15 : vector<16x128xf32>
    %17 = arith.addf %11, %16 : vector<16x128xf32>
    %18 = vector.extract_strided_slice %0 {offsets = [2, 0, 0], sizes = [1, 16, 128], strides = [1, 1, 1]} : vector<3x16x128xf32> to vector<1x16x128xf32>
    %19 = vector.shape_cast %18 : vector<1x16x128xf32> to vector<16x128xf32>
    %20 = vector.extract_strided_slice %5 {offsets = [2, 0, 0], sizes = [1, 16, 128], strides = [1, 1, 1]} : vector<3x16x128xf32> to vector<1x16x128xf32>
    %21 = vector.shape_cast %20 : vector<1x16x128xf32> to vector<16x128xf32>
    %22 = arith.mulf %19, %21 : vector<16x128xf32>
    %23 = arith.addf %17, %22 : vector<16x128xf32>
    %24 = vector.extract_strided_slice %5 {offsets = [0, 0, 0], sizes = [1, 16, 128], strides = [1, 1, 1]} : vector<3x16x128xf32> to vector<1x16x128xf32>
    %25 = vector.shape_cast %24 : vector<1x16x128xf32> to vector<16x128xf32>
    %26 = vector.extract_strided_slice %5 {offsets = [0, 0, 0], sizes = [1, 16, 128], strides = [1, 1, 1]} : vector<3x16x128xf32> to vector<1x16x128xf32>
    %27 = vector.shape_cast %26 : vector<1x16x128xf32> to vector<16x128xf32>
    %28 = arith.mulf %25, %27 : vector<16x128xf32>
    %29 = vector.extract_strided_slice %5 {offsets = [1, 0, 0], sizes = [1, 16, 128], strides = [1, 1, 1]} : vector<3x16x128xf32> to vector<1x16x128xf32>
    %30 = vector.shape_cast %29 : vector<1x16x128xf32> to vector<16x128xf32>
    %31 = vector.extract_strided_slice %5 {offsets = [1, 0, 0], sizes = [1, 16, 128], strides = [1, 1, 1]} : vector<3x16x128xf32> to vector<1x16x128xf32>
    %32 = vector.shape_cast %31 : vector<1x16x128xf32> to vector<16x128xf32>
    %33 = arith.mulf %30, %32 : vector<16x128xf32>
    %34 = arith.addf %28, %33 : vector<16x128xf32>
    %35 = vector.extract_strided_slice %5 {offsets = [2, 0, 0], sizes = [1, 16, 128], strides = [1, 1, 1]} : vector<3x16x128xf32> to vector<1x16x128xf32>
    %36 = vector.shape_cast %35 : vector<1x16x128xf32> to vector<16x128xf32>
    %37 = vector.extract_strided_slice %5 {offsets = [2, 0, 0], sizes = [1, 16, 128], strides = [1, 1, 1]} : vector<3x16x128xf32> to vector<1x16x128xf32>
    %38 = vector.shape_cast %37 : vector<1x16x128xf32> to vector<16x128xf32>
    %39 = arith.mulf %36, %38 : vector<16x128xf32>
    %40 = arith.addf %34, %39 : vector<16x128xf32>
    %cst_4 = arith.constant 0.000000e+00 : f32
    %41 = vector.broadcast %cst_4 : f32 to vector<16x128xf32>
    %42 = arith.cmpf oge, %23, %41 : vector<16x128xf32>
    %cst_5 = arith.constant 9.99999997E-7 : f32
    %43 = vector.broadcast %cst_5 : f32 to vector<16x128xf32>
    %44 = arith.addf %40, %43 : vector<16x128xf32>
    %45 = tpu.reciprocal %44 {approx = true} : vector<16x128xf32> -> vector<16x128xf32>
    %46 = arith.mulf %23, %45 : vector<16x128xf32>
    %cst_6 = arith.constant 0.000000e+00 : f32
    %47 = vector.broadcast %cst_6 : f32 to vector<16x128xf32>
    %48 = arith.select %42, %47, %46 : vector<16x128xi1>, vector<16x128xf32>
    %49 = vector.shape_cast %48 : vector<16x128xf32> to vector<1x16x128xf32>
    %50 = vector.broadcast %49 : vector<1x16x128xf32> to vector<3x16x128xf32>
    %51 = arith.mulf %50, %5 : vector<3x16x128xf32>
    %52 = arith.subf %0, %51 : vector<3x16x128xf32>
    %53 = vector.shape_cast %52 : vector<3x16x128xf32> to vector<48x128xf32>
    %c0_7 = arith.constant 0 : index
    %c0_8 = arith.constant 0 : index
    %54 = vector.load %arg3[%c0_7, %c0_8] : memref<128x64xf32, #tpu.memory_space<vmem>>, vector<128x64xf32>
    %cst_9 = arith.constant dense<0.000000e+00> : vector<48x64xf32>
    %55 = tpu.matmul %53, %54, %cst_9 {dimension_numbers = #tpu.dot_dimension_numbers<[1], [0], [0], [1], [0, 0, 1, 1], [], []>} : vector<48x128xf32>, vector<128x64xf32>, vector<48x64xf32> -> vector<48x64xf32>
    %c0_10 = arith.constant 0 : index
    %c0_11 = arith.constant 0 : index
    %56 = vector.load %arg4[%c0_10, %c0_11] : memref<64x64xf32, #tpu.memory_space<vmem>>, vector<64x64xf32>
    %cst_12 = arith.constant dense<0.000000e+00> : vector<48x64xf32>
    %57 = tpu.matmul %55, %56, %cst_12 {dimension_numbers = #tpu.dot_dimension_numbers<[1], [0], [0], [1], [0, 0, 1, 1], [], []>} : vector<48x64xf32>, vector<64x64xf32>, vector<48x64xf32> -> vector<48x64xf32>
    %58 = vector.shape_cast %55 : vector<48x64xf32> to vector<3x16x64xf32>
    %59 = vector.shape_cast %57 : vector<48x64xf32> to vector<3x16x64xf32>
    %60 = vector.extract_strided_slice %58 {offsets = [0, 0, 0], sizes = [1, 16, 64], strides = [1, 1, 1]} : vector<3x16x64xf32> to vector<1x16x64xf32>
    %61 = vector.shape_cast %60 : vector<1x16x64xf32> to vector<16x64xf32>
    %62 = vector.extract_strided_slice %59 {offsets = [0, 0, 0], sizes = [1, 16, 64], strides = [1, 1, 1]} : vector<3x16x64xf32> to vector<1x16x64xf32>
    %63 = vector.shape_cast %62 : vector<1x16x64xf32> to vector<16x64xf32>
    %64 = arith.mulf %61, %63 : vector<16x64xf32>
    %65 = vector.extract_strided_slice %58 {offsets = [1, 0, 0], sizes = [1, 16, 64], strides = [1, 1, 1]} : vector<3x16x64xf32> to vector<1x16x64xf32>
    %66 = vector.shape_cast %65 : vector<1x16x64xf32> to vector<16x64xf32>
    %67 = vector.extract_strided_slice %59 {offsets = [1, 0, 0], sizes = [1, 16, 64], strides = [1, 1, 1]} : vector<3x16x64xf32> to vector<1x16x64xf32>
    %68 = vector.shape_cast %67 : vector<1x16x64xf32> to vector<16x64xf32>
    %69 = arith.mulf %66, %68 : vector<16x64xf32>
    %70 = arith.addf %64, %69 : vector<16x64xf32>
    %71 = vector.extract_strided_slice %58 {offsets = [2, 0, 0], sizes = [1, 16, 64], strides = [1, 1, 1]} : vector<3x16x64xf32> to vector<1x16x64xf32>
    %72 = vector.shape_cast %71 : vector<1x16x64xf32> to vector<16x64xf32>
    %73 = vector.extract_strided_slice %59 {offsets = [2, 0, 0], sizes = [1, 16, 64], strides = [1, 1, 1]} : vector<3x16x64xf32> to vector<1x16x64xf32>
    %74 = vector.shape_cast %73 : vector<1x16x64xf32> to vector<16x64xf32>
    %75 = arith.mulf %72, %74 : vector<16x64xf32>
    %76 = arith.addf %70, %75 : vector<16x64xf32>
    %77 = vector.extract_strided_slice %59 {offsets = [0, 0, 0], sizes = [1, 16, 64], strides = [1, 1, 1]} : vector<3x16x64xf32> to vector<1x16x64xf32>
    %78 = vector.shape_cast %77 : vector<1x16x64xf32> to vector<16x64xf32>
    %79 = vector.extract_strided_slice %59 {offsets = [0, 0, 0], sizes = [1, 16, 64], strides = [1, 1, 1]} : vector<3x16x64xf32> to vector<1x16x64xf32>
    %80 = vector.shape_cast %79 : vector<1x16x64xf32> to vector<16x64xf32>
    %81 = arith.mulf %78, %80 : vector<16x64xf32>
    %82 = vector.extract_strided_slice %59 {offsets = [1, 0, 0], sizes = [1, 16, 64], strides = [1, 1, 1]} : vector<3x16x64xf32> to vector<1x16x64xf32>
    %83 = vector.shape_cast %82 : vector<1x16x64xf32> to vector<16x64xf32>
    %84 = vector.extract_strided_slice %59 {offsets = [1, 0, 0], sizes = [1, 16, 64], strides = [1, 1, 1]} : vector<3x16x64xf32> to vector<1x16x64xf32>
    %85 = vector.shape_cast %84 : vector<1x16x64xf32> to vector<16x64xf32>
    %86 = arith.mulf %83, %85 : vector<16x64xf32>
    %87 = arith.addf %81, %86 : vector<16x64xf32>
    %88 = vector.extract_strided_slice %59 {offsets = [2, 0, 0], sizes = [1, 16, 64], strides = [1, 1, 1]} : vector<3x16x64xf32> to vector<1x16x64xf32>
    %89 = vector.shape_cast %88 : vector<1x16x64xf32> to vector<16x64xf32>
    %90 = vector.extract_strided_slice %59 {offsets = [2, 0, 0], sizes = [1, 16, 64], strides = [1, 1, 1]} : vector<3x16x64xf32> to vector<1x16x64xf32>
    %91 = vector.shape_cast %90 : vector<1x16x64xf32> to vector<16x64xf32>
    %92 = arith.mulf %89, %91 : vector<16x64xf32>
    %93 = arith.addf %87, %92 : vector<16x64xf32>
    %cst_13 = arith.constant 0.000000e+00 : f32
    %94 = vector.broadcast %cst_13 : f32 to vector<16x64xf32>
    %95 = arith.cmpf oge, %76, %94 : vector<16x64xf32>
    %cst_14 = arith.constant 9.99999997E-7 : f32
    %96 = vector.broadcast %cst_14 : f32 to vector<16x64xf32>
    %97 = arith.addf %93, %96 : vector<16x64xf32>
    %98 = tpu.reciprocal %97 {approx = true} : vector<16x64xf32> -> vector<16x64xf32>
    %99 = arith.mulf %76, %98 : vector<16x64xf32>
    %cst_15 = arith.constant 0.000000e+00 : f32
    %100 = vector.broadcast %cst_15 : f32 to vector<16x64xf32>
    %101 = arith.select %95, %100, %99 : vector<16x64xi1>, vector<16x64xf32>
    %102 = vector.shape_cast %101 : vector<16x64xf32> to vector<1x16x64xf32>
    %103 = vector.broadcast %102 : vector<1x16x64xf32> to vector<3x16x64xf32>
    %104 = arith.mulf %103, %59 : vector<3x16x64xf32>
    %105 = arith.subf %58, %104 : vector<3x16x64xf32>
    %106 = vector.shape_cast %105 : vector<3x16x64xf32> to vector<48x64xf32>
    %c0_16 = arith.constant 0 : index
    %c0_17 = arith.constant 0 : index
    %107 = vector.load %arg5[%c0_16, %c0_17] : memref<64x64xf32, #tpu.memory_space<vmem>>, vector<64x64xf32>
    %cst_18 = arith.constant dense<0.000000e+00> : vector<48x64xf32>
    %108 = tpu.matmul %106, %107, %cst_18 {dimension_numbers = #tpu.dot_dimension_numbers<[1], [0], [0], [1], [0, 0, 1, 1], [], []>} : vector<48x64xf32>, vector<64x64xf32>, vector<48x64xf32> -> vector<48x64xf32>
    %109 = arith.addf %6, %108 : vector<48x64xf32>
    %110 = vector.shape_cast %109 : vector<48x64xf32> to vector<3x16x64xf32>
    %c0_19 = arith.constant 0 : index
    %c0_20 = arith.constant 0 : index
    %c0_21 = arith.constant 0 : index
    %111 = vector.load %arg6[%c0_19, %c0_20, %c0_21] : memref<3x16x64xf32, #tpu.memory_space<vmem>>, vector<3x16x64xf32>
    tpu.vector_store %arg6[%c0_19, %c0_20, %c0_21], %110 {strides = array<i32>} : memref<3x16x64xf32, #tpu.memory_space<vmem>>, vector<3x16x64xf32>,
    return
  }
  func.func @transform_0(%arg0: i32) -> (i32, i32, i32) {
    %c0_i32 = arith.constant 0 : i32
    %c0_i32_0 = arith.constant 0 : i32
    %c0_i32_1 = arith.constant 0 : i32
    return %c0_i32, %arg0, %c0_i32_0 : i32, i32, i32
  }
  func.func @transform_1(%arg0: i32) -> (i32, i32) {
    %c0_i32 = arith.constant 0 : i32
    %c0_i32_0 = arith.constant 0 : i32
    %c0_i32_1 = arith.constant 0 : i32
    return %c0_i32, %c0_i32_0 : i32, i32
  }
  func.func @transform_2(%arg0: i32) -> (i32, i32) {
    %c0_i32 = arith.constant 0 : i32
    %c0_i32_0 = arith.constant 0 : i32
    %c0_i32_1 = arith.constant 0 : i32
    return %c0_i32, %c0_i32_0 : i32, i32
  }
  func.func @transform_3(%arg0: i32) -> (i32, i32) {
    %c0_i32 = arith.constant 0 : i32
    %c0_i32_0 = arith.constant 0 : i32
    %c0_i32_1 = arith.constant 0 : i32
    return %c0_i32, %c0_i32_0 : i32, i32
  }
  func.func @transform_4(%arg0: i32) -> (i32, i32) {
    %c0_i32 = arith.constant 0 : i32
    %c0_i32_0 = arith.constant 0 : i32
    %c0_i32_1 = arith.constant 0 : i32
    return %c0_i32, %c0_i32_0 : i32, i32
  }
  func.func @transform_5(%arg0: i32) -> (i32, i32, i32) {
    %c0_i32 = arith.constant 0 : i32
    %c0_i32_0 = arith.constant 0 : i32
    %c0_i32_1 = arith.constant 0 : i32
    return %c0_i32, %arg0, %c0_i32_0 : i32, i32, i32
  }
}

</mosaic_0001>

<bundles_post_ra>
// kernel: vnn_resnet_pointnet_forward.8
= control target key start
LH: loop header
LB: loop body
LE: loop exit
PB: predicated region body
PF: predicated region fallthrough
CT: control target
= control target key end

     0   :  { %s611_s9 = smov 0   ;;  %s613_s10 = smov 0   ;;  %s723_s0 = inlined_call_operand.vmem [shape: f32[3,32,128], index: 0, kind: input, shape index: {}]   ;;  %s724_s1 = inlined_call_operand.vmem [shape: f32[128,128], index: 1, kind: input, shape index: {}]   ;;  %s725_s2 = inlined_call_operand.vmem [shape: f32[3,32,128], index: 2, kind: output, shape index: {}]  }
   0x1   :  { %s615_s11 = smov 0  }
   0x2 LB: > { %s438_s12 = sadd.s32 4294967295, %s594_s11   ;;  %s628_s13 = sadd.s32 1, %s594_s11   ;;  %s594_s11 = sphi %s615_s11, %s729_s11   ;;  %s590_s10 = sphi %s613_s10, %s728_s10   ;;  %s586_s9 = sphi %s611_s9, %s727_s9  }
   0x3   : > { %s16_s14 = ssub.s32 %s594_s11, %s628_s13  ;;  %s19_s15 = sadd.s32 1, %s590_s10 }
   0x4   : > { %p17_p0 = scmp.eq.s32.totalorder %s16_s14, 0  ;;  %p26_p1 = scmp.ne.s32.totalorder %s590_s10, %s586_s9 }
   0x5   : > { %p27_p2 = scmp.eq.s32.totalorder %s594_s11, 0  ;;  %p77_p3 = scmp.eq.s32.totalorder %s438_s12, 1 }
   0x6   : > { %s639_s16 = scalar_select %p17_p0, %s590_s10, %s19_s15  }
   0x7   : > { %p28_p4 = por %p27_p2, %p26_p1  ;;  %p641_p5 = por %p77_p3, %p26_p1 }
   0x8   : > { %p441_p6 = scmp.ge.s32.totalorder %s594_s11, 2 }
   0xa   : > { %102 = sbr.rel (%p441_p6) target bundleno = 22 (0x16), region = 20 }
   0xf   : > { %105 = sbr.rel (!%p28_p4) target bundleno = 22 (0x16), region = 24  ;;  %s107_s18 = sand.u32 (%p28_p4), 1, %s590_s10  }
  0x10   : > { %s449_s19 = sshll.u32 (%p28_p4), %s594_s11, 4  ;;  %s546_s20 = smul.u32 (%p28_p4), 48, %s107_s18 }
  0x11   : > { %s112_s23 = scalar_lea.vmem (%p28_p4), %s723_s0, %s449_s19 }
  0x12   : > { %v151_v0 = vld [vmem:[%s112_s23] sm:$0xff] (%p28_p4)  ;;  %v153_v1 = vld [vmem:[%s112_s23 + $0x8] sm:$0xff] (%p28_p4)  ;;  %s109_s24 = scalar_lea.vmem (%p28_p4), [#allocation2], %s546_s20 }
  0x13   : > { %v155_v2 = vld [vmem:[%s112_s23 + $0x20] sm:$0xff] (%p28_p4)  ;;  %v157_v3 = vld [vmem:[%s112_s23 + $0x28] sm:$0xff] (%p28_p4)  ;;  %152 = vst [vmem:[%s109_s24] sm:$0xff] (%p28_p4), %v151_v0  ;;  %154 = vst [vmem:[%s109_s24 + $0x8] sm:$0xff] (%p28_p4), %v153_v1 }
  0x14   : > { %v159_v4 = vld [vmem:[%s112_s23 + $0x40] sm:$0xff]  ;;  %v161_v5 = vld [vmem:[%s112_s23 + $0x48] sm:$0xff]  ;;  %156 = vst [vmem:[%s109_s24 + $0x10] sm:$0xff] %v155_v2  ;;  %158 = vst [vmem:[%s109_s24 + $0x18] sm:$0xff] %v157_v3 }
  0x15   : > { %160 = vst [vmem:[%s109_s24 + $0x20] sm:$0xff] %v159_v4  ;;  %162 = vst [vmem:[%s109_s24 + $0x28] sm:$0xff] %v161_v5 }
  0x16 PF: > { %p444_p7 = scmp.ge.s32.totalorder %s594_s11, 1  ;;  %p167_p8 = scmp.lt.s32.totalorder %s594_s11, 3 }
  0x18   : > { %p168_p9 = pnand %p444_p7, %p167_p8 }
  0x19   : > { %s174_s26 = sand.u32 (!%p168_p9), 1, %s586_s9  }
  0x1a   : > { %171 = sbr.rel (%p168_p9) target bundleno = 272 (0x110), region = 62 }
  0x1b   : > { %s690_s29 = smul.u32 (!%p168_p9), 48, %s174_s26 }
  0x1d   : > { %s176_s14 = scalar_lea.vmem (!%p168_p9), [#allocation2], %s690_s29  ;;  %s193_s15 = scalar_lea.vmem (!%p168_p9), [#allocation3], %s690_s29 }
  0x1f   : > { %v217_v6 = vld [vmem:[%s724_s1 + $0x78] sm:$0xff]  ;;  %v216_v7 = vld [vmem:[%s724_s1 + $0x70] sm:$0xff]  ;;  %v215_v8 = vld [vmem:[%s724_s1 + $0x68] sm:$0xff]  ;;  %s450_s18 = sshll.u32 (%p641_p5), %s438_s12, 4 }
  0x20   : > { %514 = vmatprep.subr.mxu1 %v217_v6  ;;  %473 = vmatprep.subr.mxu0 %v217_v6  ;;  %v214_v9 = vld [vmem:[%s724_s1 + $0x60] sm:$0xff]  ;;  %v213_v10 = vld [vmem:[%s724_s1 + $0x58] sm:$0xff]  ;;  %v212_v11 = vld [vmem:[%s724_s1 + $0x50] sm:$0xff]  ;;  %s328_s21 = scalar_lea.vmem (%p641_p5), %s725_s2, %s450_s18 }
  0x21   : > { %530 = vmatpush3.msra.mxu1 %v217_v6  ;;  %474 = vmatpush3.msra.mxu0 %v217_v6  ;;  %v211_v12 = vld [vmem:[%s724_s1 + $0x48] sm:$0xff]  ;;  %v210_v13 = vld [vmem:[%s724_s1 + $0x40] sm:$0xff]  ;;  %v209_v14 = vld [vmem:[%s724_s1 + $0x38] sm:$0xff] }
  0x22   : > { %515 = vmatprep.subr.mxu1 %v216_v7  ;;  %475 = vmatprep.subr.mxu0 %v216_v7  ;;  %v208_v15 = vld [vmem:[%s724_s1 + $0x30] sm:$0xff]  ;;  %v207_v16 = vld [vmem:[%s724_s1 + $0x28] sm:$0xff]  ;;  %v206_v17 = vld [vmem:[%s724_s1 + $0x20] sm:$0xff] }
  0x23   : > { %531 = vmatpush3.msra.mxu1 %v216_v7  ;;  %476 = vmatpush3.msra.mxu0 %v216_v7  ;;  %v205_v18 = vld [vmem:[%s724_s1 + $0x18] sm:$0xff]  ;;  %v204_v19 = vld [vmem:[%s724_s1 + $0x10] sm:$0xff]  ;;  %v203_v20 = vld [vmem:[%s724_s1 + $0x8] sm:$0xff] }
  0x24   : > { %516 = vmatprep.subr.mxu1 %v215_v8  ;;  %477 = vmatprep.subr.mxu0 %v215_v8  ;;  %v202_v21 = vld [vmem:[%s724_s1] sm:$0xff]  ;;  %v199_v23 = vld [vmem:[%s176_s14 + $0x18] sm:$0xff]  ;;  %v197_v26 = vld [vmem:[%s176_s14 + $0x8] sm:$0xff] }
  0x25   : > { %532 = vmatpush3.msra.mxu1 %v215_v8  ;;  %478 = vmatpush3.msra.mxu0 %v215_v8  ;;  %v198_v22 = vld [vmem:[%s176_s14 + $0x10] sm:$0xff]  ;;  %v196_v24 = vld [vmem:[%s176_s14] sm:$0xff]  ;;  %v201_v27 = vld [vmem:[%s176_s14 + $0x28] sm:$0xff] }
  0x26   : > { %517 = vmatprep.subr.mxu1 %v214_v9  ;;  %479 = vmatprep.subr.mxu0 %v214_v9  ;;  %v200_v25 = vld [vmem:[%s176_s14 + $0x20] sm:$0xff] }
  0x27   : > { %533 = vmatpush3.msra.mxu1 %v214_v9  ;;  %480 = vmatpush3.msra.mxu0 %v214_v9 }
  0x28   : > { %518 = vmatprep.subr.mxu1 %v213_v10  ;;  %481 = vmatprep.subr.mxu0 %v213_v10 }
  0x29   : > { %534 = vmatpush3.msra.mxu1 %v213_v10  ;;  %482 = vmatpush3.msra.mxu0 %v213_v10 }
  0x2a   : > { %519 = vmatprep.subr.mxu1 %v212_v11  ;;  %483 = vmatprep.subr.mxu0 %v212_v11 }
  0x2b   : > { %535 = vmatpush3.msra.mxu1 %v212_v11  ;;  %484 = vmatpush3.msra.mxu0 %v212_v11 }
  0x2c   : > { %520 = vmatprep.subr.mxu1 %v211_v12  ;;  %485 = vmatprep.subr.mxu0 %v211_v12 }
  0x2d   : > { %536 = vmatpush3.msra.mxu1 %v211_v12  ;;  %486 = vmatpush3.msra.mxu0 %v211_v12 }
  0x2e   : > { %521 = vmatprep.subr.mxu1 %v210_v13  ;;  %487 = vmatprep.subr.mxu0 %v210_v13 }
  0x2f   : > { %537 = vmatpush3.msra.mxu1 %v210_v13  ;;  %488 = vmatpush3.msra.mxu0 %v210_v13 }
  0x30   : > { %522 = vmatprep.subr.mxu1 %v209_v14  ;;  %489 = vmatprep.subr.mxu0 %v209_v14 }
  0x31   : > { %538 = vmatpush3.msra.mxu1 %v209_v14  ;;  %490 = vmatpush3.msra.mxu0 %v209_v14 }
  0x32   : > { %523 = vmatprep.subr.mxu1 %v208_v15  ;;  %491 = vmatprep.subr.mxu0 %v208_v15 }
  0x33   : > { %539 = vmatpush3.msra.mxu1 %v208_v15  ;;  %492 = vmatpush3.msra.mxu0 %v208_v15 }
  0x34   : > { %524 = vmatprep.subr.mxu1 %v207_v16  ;;  %493 = vmatprep.subr.mxu0 %v207_v16 }
  0x35   : > { %540 = vmatpush3.msra.mxu1 %v207_v16  ;;  %494 = vmatpush3.msra.mxu0 %v207_v16 }
  0x36   : > { %525 = vmatprep.subr.mxu1 %v206_v17  ;;  %495 = vmatprep.subr.mxu0 %v206_v17 }
  0x37   : > { %541 = vmatpush3.msra.mxu1 %v206_v17  ;;  %496 = vmatpush3.msra.mxu0 %v206_v17 }
  0x38   : > { %526 = vmatprep.subr.mxu1 %v205_v18  ;;  %497 = vmatprep.subr.mxu0 %v205_v18 }
  0x39   : > { %542 = vmatpush3.msra.mxu1 %v205_v18  ;;  %498 = vmatpush3.msra.mxu0 %v205_v18 }
  0x3a   : > { %527 = vmatprep.subr.mxu1 %v204_v19  ;;  %499 = vmatprep.subr.mxu0 %v204_v19 }
  0x3b   : > { %543 = vmatpush3.msra.mxu1 %v204_v19  ;;  %500 = vmatpush3.msra.mxu0 %v204_v19 }
  0x3c   : > { %528 = vmatprep.subr.mxu1 %v203_v20  ;;  %501 = vmatprep.subr.mxu0 %v203_v20 }
  0x3d   : > { %544 = vmatpush3.msra.mxu1 %v203_v20  ;;  %502 = vmatpush3.msra.mxu0 %v203_v20 }
  0x3e   : > { %529 = vmatprep.subr.mxu1 %v202_v21  ;;  %508 = vmatprep.mubr.f32.mxu1 %v198_v22 }
  0x3f   : > { %545 = vmatpush3.msra.mxu1 %v202_v21  ;;  %503 = vmatprep.subr.mxu0 %v202_v21 }
  0x40   : > { %509 = vmatmul.mubr.f32.vlgmr.msra.gmra.mxu1 %v199_v23  ;;  %504 = vmatpush3.msra.mxu0 %v202_v21 }
  0x41   : > { %505 = vmatprep.mubr.f32.mxu0 %v196_v24  ;;  %511 = vmatprep.mubr.f32.mxu1 %v200_v25 }
  0x42   : > { %506 = vmatmul.mubr.f32.vlgmr.msra.gmra.mxu0 %v197_v26 }
  0x44   : > { %512 = vmatmul.mubr.f32.gmra.mxu1 %v201_v27 }
 0x100   : > { %v510_v28 = vpop.f32.mrf.mxu1 }
 0x101   : > { %316 = vst [vmem:[%s193_s15 + $0x18] sm:$0xff] %v510_v28 }
 0x102   : > { %v507_v29 = vpop.f32.mrf.mxu0  ;;  %v294_v30 = vpop.f32.mrf.mxu1 }
 0x103   : > { %314 = vst [vmem:[%s193_s15 + $0x8] sm:$0xff] %v507_v29  ;;  %315 = vst [vmem:[%s193_s15 + $0x10] sm:$0xff] %v294_v30  ;;  %325 = sbr.rel (!%p641_p5) target bundleno = 272 (0x110), region = 70 }
 0x104   : > { %v284_v31 = vpop.f32.mrf.mxu0  ;;  %v513_v32 = vpop.f32.mrf.mxu1 }
 0x105   : > { %313 = vst [vmem:[%s193_s15] sm:$0xff] %v284_v31  ;;  %318 = vst [vmem:[%s193_s15 + $0x28] sm:$0xff] %v513_v32 }
 0x106   : > { %v304_v33 = vpop.f32.mrf.mxu1 }
 0x107   : > { %317 = vst [vmem:[%s193_s15 + $0x20] sm:$0xff] %v304_v33 }
 0x108   : > { %v373_v37 = vld [vmem:[%s193_s15 + $0x18] sm:$0xff] }
 0x109   : > { %374 = vst [vmem:[%s328_s21 + $0x28] sm:$0xff] %v373_v37 }
 0x10a   : > { %v369_v35 = vld [vmem:[%s193_s15 + $0x8] sm:$0xff]  ;;  %v371_v36 = vld [vmem:[%s193_s15 + $0x10] sm:$0xff] }
 0x10b   : > { %370 = vst [vmem:[%s328_s21 + $0x8] sm:$0xff] %v369_v35  ;;  %372 = vst [vmem:[%s328_s21 + $0x20] sm:$0xff] %v371_v36 }
 0x10c   : > { %v367_v34 = vld [vmem:[%s193_s15] sm:$0xff]  ;;  %v377_v39 = vld [vmem:[%s193_s15 + $0x28] sm:$0xff] }
 0x10d   : > { %368 = vst [vmem:[%s328_s21] sm:$0xff] %v367_v34  ;;  %378 = vst [vmem:[%s328_s21 + $0x48] sm:$0xff] %v377_v39 }
 0x10e   : > { %v375_v38 = vld [vmem:[%s193_s15 + $0x20] sm:$0xff] }
 0x10f   : > { %376 = vst [vmem:[%s328_s21 + $0x40] sm:$0xff] %v375_v38 }
 0x110 PF: > { %p9_p10 = scmp.ge.s32.totalorder %s628_s13, 4   ;;  %s727_s9 = smov %s590_s10 }
 0x111   : > { %s728_s10 = smov %s639_s16  ;;  %s729_s11 = smov %s628_s13 }
 0x112   :  { %11 = sbr.rel (!%p9_p10) target bundleno = 2 (0x2), region = 139 }

// kernel: vnn_resnet_pointnet_forward.9
= control target key start
LH: loop header
LB: loop body
LE: loop exit
PB: predicated region body
PF: predicated region fallthrough
CT: control target
= control target key end

     0   :  { %s1241_s18 = smov 0   ;;  %s1243_s19 = smov 0   ;;  %s1596_s0 = inlined_call_operand.vmem [shape: f32[3,32,128], index: 0, kind: input, shape index: {}]   ;;  %s1597_s1 = inlined_call_operand.vmem [shape: f32[128,192], index: 1, kind: input, shape index: {}]   ;;  %s1598_s2 = inlined_call_operand.vmem [shape: f32[128,64], index: 2, kind: input, shape index: {}]   ;;  %s1599_s3 = inlined_call_operand.vmem [shape: f32[64,64], index: 3, kind: input, shape index: {}]   ;;  %s1600_s4 = inlined_call_operand.vmem [shape: f32[64,64], index: 4, kind: input, shape index: {}]   ;;  %s1601_s5 = inlined_call_operand.vmem [shape: f32[3,32,64], index: 5, kind: output, shape index: {}]  }
   0x1   :  { %s1245_s20 = smov 0  }
   0x2 LB: > { %s985_s21 = sadd.s32 4294967295, %s1208_s20   ;;  %s1258_s22 = sadd.s32 1, %s1208_s20   ;;  %s1208_s20 = sphi %s1245_s20, %s1605_s20   ;;  %s1204_s19 = sphi %s1243_s19, %s1604_s19   ;;  %s1200_s18 = sphi %s1241_s18, %s1603_s18  }
   0x3   : > { %s19_s23 = ssub.s32 %s1208_s20, %s1258_s22  ;;  %s22_s24 = sadd.s32 1, %s1204_s19 }
   0x4   : > { %p20_p0 = scmp.eq.s32.totalorder %s19_s23, 0  ;;  %p29_p1 = scmp.ne.s32.totalorder %s1204_s19, %s1200_s18 }
   0x5   : > { %p30_p2 = scmp.eq.s32.totalorder %s1208_s20, 0  ;;  %p143_p3 = scmp.eq.s32.totalorder %s985_s21, 1 }
   0x6   : > { %s1269_s25 = scalar_select %p20_p0, %s1204_s19, %s22_s24  }
   0x7   : > { %p31_p4 = por %p30_p2, %p29_p1  ;;  %p1271_p5 = por %p143_p3, %p29_p1 }
   0x8   : > { %p988_p6 = scmp.ge.s32.totalorder %s1208_s20, 2 }
   0xa   : > { %177 = sbr.rel (%p988_p6) target bundleno = 22 (0x16), region = 32 }
   0xf   : > { %180 = sbr.rel (!%p31_p4) target bundleno = 22 (0x16), region = 36  ;;  %s182_s27 = sand.u32 (%p31_p4), 1, %s1204_s19  }
  0x10   : > { %s1008_s28 = sshll.u32 (%p31_p4), %s1208_s20, 4  ;;  %s1151_s29 = smul.u32 (%p31_p4), 48, %s182_s27 }
  0x11   : > { %s187_s7 = scalar_lea.vmem (%p31_p4), %s1596_s0, %s1008_s28 }
  0x12   : > { %v226_v0 = vld [vmem:[%s187_s7] sm:$0xff] (%p31_p4)  ;;  %v228_v1 = vld [vmem:[%s187_s7 + $0x8] sm:$0xff] (%p31_p4)  ;;  %s184_s8 = scalar_lea.vmem (%p31_p4), [#allocation2], %s1151_s29 }
  0x13   : > { %v230_v2 = vld [vmem:[%s187_s7 + $0x20] sm:$0xff] (%p31_p4)  ;;  %v232_v3 = vld [vmem:[%s187_s7 + $0x28] sm:$0xff] (%p31_p4)  ;;  %227 = vst [vmem:[%s184_s8] sm:$0xff] (%p31_p4), %v226_v0  ;;  %229 = vst [vmem:[%s184_s8 + $0x8] sm:$0xff] (%p31_p4), %v228_v1 }
  0x14   : > { %v234_v4 = vld [vmem:[%s187_s7 + $0x40] sm:$0xff]  ;;  %v236_v5 = vld [vmem:[%s187_s7 + $0x48] sm:$0xff]  ;;  %231 = vst [vmem:[%s184_s8 + $0x10] sm:$0xff] %v230_v2  ;;  %233 = vst [vmem:[%s184_s8 + $0x18] sm:$0xff] %v232_v3 }
  0x15   : > { %235 = vst [vmem:[%s184_s8 + $0x20] sm:$0xff] %v234_v4  ;;  %237 = vst [vmem:[%s184_s8 + $0x28] sm:$0xff] %v236_v5 }
  0x16 PF: > { %p991_p7 = scmp.ge.s32.totalorder %s1208_s20, 1  ;;  %p242_p8 = scmp.lt.s32.totalorder %s1208_s20, 3 }
  0x18   : > { %p243_p9 = pnand %p991_p7, %p242_p8 }
  0x19   : > { %s249_s24 = sand.u32 (!%p243_p9), 1, %s1200_s18  }
  0x1a   : > { %246 = sbr.rel (%p243_p9) target bundleno = 945 (0x3b1), region = 74 }
  0x1b   : > { %s1363_s8 = smul.u32 (!%p243_p9), 48, %s249_s24 }
  0x1d   : > { %s251_s27 = scalar_lea.vmem (!%p243_p9), [#allocation2], %s1363_s8  ;;  %s274_s13 = scalar_lea.vmem (!%p243_p9), [#allocation3], %s1363_s8 }
  0x1f   : > { %v314_v6 = vld [vmem:[%s1597_s1 + $0xf8] sm:$0xff]  ;;  %v313_v7 = vld [vmem:[%s1597_s1 + $0xf0] sm:$0xff]  ;;  %v312_v8 = vld [vmem:[%s1597_s1 + $0xe8] sm:$0xff]  ;;  %v1210_v10 = vmov 0.0   ;;  %vm577_vm2 = vcmask 523264   ;;  %s1009_s8 = sshll.u32 (%p1271_p5), %s985_s21, 4 }
  0x20   : > { %315 = vmatprep.subr.mxu0 %v314_v6  ;;  %v311_v9 = vld [vmem:[%s1597_s1 + $0xe0] sm:$0xff]  ;;  %379 = vmatprep.mubr.f32.mxu0 %v1210_v10  ;;  %v310_v11 = vld [vmem:[%s1597_s1 + $0xd8] sm:$0xff]  ;;  %v309_v12 = vld [vmem:[%s1597_s1 + $0xd0] sm:$0xff]  ;;  %s875_s16 = scalar_lea.vmem (%p1271_p5), %s1601_s5, %s1009_s8 }
  0x21   : > { %316 = vmatpush1.msra.mxu0 %v313_v7  ;;  %v308_v13 = vld [vmem:[%s1597_s1 + $0xc8] sm:$0xff]  ;;  %v307_v14 = vld [vmem:[%s1597_s1 + $0xc0] sm:$0xff]  ;;  %v306_v15 = vld [vmem:[%s1597_s1 + $0xb8] sm:$0xff] }
  0x22   : > { %317 = vmatprep.subr.mxu0 %v312_v8  ;;  %v305_v16 = vld [vmem:[%s1597_s1 + $0xb0] sm:$0xff]  ;;  %v304_v17 = vld [vmem:[%s1597_s1 + $0xa8] sm:$0xff]  ;;  %v303_v18 = vld [vmem:[%s1597_s1 + $0xa0] sm:$0xff] }
  0x23   : > { %318 = vmatpush1.msra.mxu0 %v311_v9  ;;  %v302_v19 = vld [vmem:[%s1597_s1 + $0x98] sm:$0xff]  ;;  %v301_v20 = vld [vmem:[%s1597_s1 + $0x90] sm:$0xff]  ;;  %v300_v21 = vld [vmem:[%s1597_s1 + $0x88] sm:$0xff] }
  0x24   : > { %319 = vmatprep.subr.mxu0 %v310_v11  ;;  %v299_v22 = vld [vmem:[%s1597_s1 + $0x80] sm:$0xff]  ;;  %v298_v23 = vld [vmem:[%s1597_s1 + $0x78] sm:$0xff]  ;;  %v297_v24 = vld [vmem:[%s1597_s1 + $0x70] sm:$0xff] }
  0x25   : > { %320 = vmatpush1.msra.mxu0 %v309_v12  ;;  %v296_v25 = vld [vmem:[%s1597_s1 + $0x68] sm:$0xff]  ;;  %v295_v26 = vld [vmem:[%s1597_s1 + $0x60] sm:$0xff]  ;;  %v294_v27 = vld [vmem:[%s1597_s1 + $0x58] sm:$0xff] }
  0x26   : > { %321 = vmatprep.subr.mxu0 %v308_v13  ;;  %v293_v28 = vld [vmem:[%s1597_s1 + $0x50] sm:$0xff]  ;;  %v292_v29 = vld [vmem:[%s1597_s1 + $0x48] sm:$0xff]  ;;  %v291_v30 = vld [vmem:[%s1597_s1 + $0x40] sm:$0xff] }
  0x27   : > { %322 = vmatpush1.msra.mxu0 %v307_v14  ;;  %v290_v31 = vld [vmem:[%s1597_s1 + $0x38] sm:$0xff]  ;;  %v289_v32 = vld [vmem:[%s1597_s1 + $0x30] sm:$0xff]  ;;  %v288_v33 = vld [vmem:[%s1597_s1 + $0x28] sm:$0xff] }
  0x28   : > { %323 = vmatprep.subr.mxu0 %v306_v15  ;;  %v287_v34 = vld [vmem:[%s1597_s1 + $0x20] sm:$0xff]  ;;  %v286_v35 = vld [vmem:[%s1597_s1 + $0x18] sm:$0xff]  ;;  %v285_v36 = vld [vmem:[%s1597_s1 + $0x10] sm:$0xff] }
  0x29   : > { %324 = vmatpush1.msra.mxu0 %v305_v16  ;;  %v284_v37 = vld [vmem:[%s1597_s1 + $0x8] sm:$0xff]  ;;  %v283_v38 = vld [vmem:[%s1597_s1] sm:$0xff]  ;;  %v473_v45 = vld [vmem:[%s1598_s2 + $0x78] sm:$0xff] }
  0x2a   : > { %325 = vmatprep.subr.mxu0 %v304_v17  ;;  %v1384_v39 = vld [vmem:[%s251_s27] sm:$0xff]  ;;  %v1388_v40 = vld [vmem:[%s251_s27 + $0x8] sm:$0xff]  ;;  %v1392_v41 = vld [vmem:[%s251_s27 + $0x10] sm:$0xff]  ;;  %1060 = vmatprep.subr.mxu1 %v473_v45 }
  0x2b   : > { %326 = vmatpush1.msra.mxu0 %v303_v18  ;;  %v1396_v42 = vld [vmem:[%s251_s27 + $0x18] sm:$0xff]  ;;  %v1400_v43 = vld [vmem:[%s251_s27 + $0x20] sm:$0xff]  ;;  %v1404_v44 = vld [vmem:[%s251_s27 + $0x28] sm:$0xff]  ;;  %1061 = vmatpush3.msra.mxu1 %v473_v45 }
  0x2c   : > { %327 = vmatprep.subr.mxu0 %v302_v19  ;;  %v472_v46 = vld [vmem:[%s1598_s2 + $0x70] sm:$0xff]  ;;  %v471_v47 = vld [vmem:[%s1598_s2 + $0x68] sm:$0xff]  ;;  %v470_v48 = vld [vmem:[%s1598_s2 + $0x60] sm:$0xff] }
  0x2d   : > { %328 = vmatpush1.msra.mxu0 %v301_v20  ;;  %1062 = vmatprep.subr.mxu1 %v472_v46  ;;  %v469_v49 = vld [vmem:[%s1598_s2 + $0x58] sm:$0xff]  ;;  %v468_v50 = vld [vmem:[%s1598_s2 + $0x50] sm:$0xff]  ;;  %v467_v51 = vld [vmem:[%s1598_s2 + $0x48] sm:$0xff] }
  0x2e   : > { %329 = vmatprep.subr.mxu0 %v300_v21  ;;  %1063 = vmatpush3.msra.mxu1 %v472_v46  ;;  %v466_v52 = vld [vmem:[%s1598_s2 + $0x40] sm:$0xff]  ;;  %v465_v53 = vld [vmem:[%s1598_s2 + $0x38] sm:$0xff]  ;;  %v464_v54 = vld [vmem:[%s1598_s2 + $0x30] sm:$0xff] }
  0x2f   : > { %330 = vmatpush1.msra.mxu0 %v299_v22  ;;  %1064 = vmatprep.subr.mxu1 %v471_v47  ;;  %v463_v55 = vld [vmem:[%s1598_s2 + $0x28] sm:$0xff]  ;;  %v462_v56 = vld [vmem:[%s1598_s2 + $0x20] sm:$0xff]  ;;  %v461_v57 = vld [vmem:[%s1598_s2 + $0x18] sm:$0xff] }
  0x30   : > { %331 = vmatprep.subr.mxu0 %v298_v23  ;;  %1065 = vmatpush3.msra.mxu1 %v471_v47  ;;  %v460_v58 = vld [vmem:[%s1598_s2 + $0x10] sm:$0xff]  ;;  %v459_v59 = vld [vmem:[%s1598_s2 + $0x8] sm:$0xff]  ;;  %v458_v60 = vld [vmem:[%s1598_s2] sm:$0xff] }
  0x31   : > { %332 = vmatpush1.msra.mxu0 %v297_v24  ;;  %1066 = vmatprep.subr.mxu1 %v470_v48  ;;  %v576_v61 = vld [vmem:[%s1599_s3 + $0x38] sm:$0xff] }
  0x32   : > { %333 = vmatprep.subr.mxu0 %v296_v25  ;;  %1067 = vmatpush3.msra.mxu1 %v470_v48 }
  0x33   : > { %334 = vmatpush1.msra.mxu0 %v295_v26  ;;  %1068 = vmatprep.subr.mxu1 %v469_v49 }
  0x34   : > { %335 = vmatprep.subr.mxu0 %v294_v27  ;;  %1069 = vmatpush3.msra.mxu1 %v469_v49 }
  0x35   : > { %336 = vmatpush1.msra.mxu0 %v293_v28  ;;  %1070 = vmatprep.subr.mxu1 %v468_v50 }
  0x36   : > { %337 = vmatprep.subr.mxu0 %v292_v29  ;;  %1071 = vmatpush3.msra.mxu1 %v468_v50 }
  0x37   : > { %338 = vmatpush1.msra.mxu0 %v291_v30  ;;  %1072 = vmatprep.subr.mxu1 %v467_v51 }
  0x38   : > { %339 = vmatprep.subr.mxu0 %v290_v31  ;;  %1073 = vmatpush3.msra.mxu1 %v467_v51  ;;  %v575_v51 = vld [vmem:[%s1599_s3 + $0x30] sm:$0xff] }
  0x39   : > { %340 = vmatpush1.msra.mxu0 %v289_v32  ;;  %1074 = vmatprep.subr.mxu1 %v466_v52 }
  0x3a   : > { %341 = vmatprep.subr.mxu0 %v288_v33  ;;  %1075 = vmatpush3.msra.mxu1 %v466_v52 }
  0x3b   : > { %342 = vmatpush1.msra.mxu0 %v287_v34  ;;  %1076 = vmatprep.subr.mxu1 %v465_v53 }
  0x3c   : > { %343 = vmatprep.subr.mxu0 %v286_v35  ;;  %1077 = vmatpush3.msra.mxu1 %v465_v53 }
  0x3d   : > { %344 = vmatpush1.msra.mxu0 %v285_v36  ;;  %1078 = vmatprep.subr.mxu1 %v464_v54 }
  0x3e   : > { %345 = vmatprep.subr.mxu0 %v284_v37  ;;  %1079 = vmatpush3.msra.mxu1 %v464_v54  ;;  %v572_v54 = vld [vmem:[%s1599_s3 + $0x18] sm:$0xff] }
  0x3f   : > { %346 = vmatpush1.msra.mxu0 %v283_v38  ;;  %1080 = vmatprep.subr.mxu1 %v463_v55 }
  0x40   : > { %380 = vmatmul.mubr.f32.vlgmr.msra.gmra.mxu0 %v1384_v39  ;;  %1081 = vmatpush3.msra.mxu1 %v463_v55 }
  0x41   : > { %385 = vmatprep.mubr.f32.mxu0 %v1210_v10  ;;  %1082 = vmatprep.subr.mxu1 %v462_v56 }
  0x42   : > { %1083 = vmatpush3.msra.mxu1 %v462_v56 }
  0x43   : > { %1084 = vmatprep.subr.mxu1 %v461_v57 }
  0x44   : > { %386 = vmatmul.mubr.f32.gmra.mxu0 %v1388_v40  ;;  %1085 = vmatpush3.msra.mxu1 %v461_v57 }
  0x45   : > { %391 = vmatprep.mubr.f32.mxu0 %v1210_v10  ;;  %1086 = vmatprep.subr.mxu1 %v460_v58 }
  0x46   : > { %1087 = vmatpush3.msra.mxu1 %v460_v58 }
  0x47   : > { %1088 = vmatprep.subr.mxu1 %v459_v59 }
  0x48   : > { %392 = vmatmul.mubr.f32.gmra.mxu0 %v1392_v41  ;;  %1089 = vmatpush3.msra.mxu1 %v459_v59 }
  0x49   : > { %397 = vmatprep.mubr.f32.mxu0 %v1210_v10  ;;  %1090 = vmatprep.subr.mxu1 %v458_v60 }
  0x4a   : > { %1091 = vmatpush3.msra.mxu1 %v458_v60 }
  0x4b   : > { %1101 = vmatprep.subr.mxu1 %v576_v61 }
  0x4c   : > { %398 = vmatmul.mubr.f32.gmra.mxu0 %v1396_v42 }
  0x4d   : > { %403 = vmatprep.mubr.f32.mxu0 %v1210_v10 }
  0x50   : > { %404 = vmatmul.mubr.f32.gmra.mxu0 %v1400_v43 }
  0x51   : > { %409 = vmatprep.mubr.f32.mxu0 %v1210_v10 }
  0x54   : > { %410 = vmatmul.mubr.f32.gmra.mxu0 %v1404_v44 }
 0x100   : > { %v381_v62 = vpop.f32.mrf.mxu0 }
 0x101   : > { %v426_v7 = vmul.f32 %v381_v62, %v381_v62  ;;  %v416_v22 = vmul.f32 %v381_v62, %v1384_v39 }
 0x102   : > { %v1458_v63 = vpop.f32.mrf.mxu0 }
 0x104   : > { %v387_v0 = vpop.f32.mrf.mxu0 }
 0x105   : > { %v427_v13 = vmul.f32 %v387_v0, %v387_v0  ;;  %v417_v26 = vmul.f32 %v387_v0, %v1388_v40 }
 0x106   : > { %v1460_v1 = vpop.f32.mrf.mxu0 }
 0x108   : > { %v393_v2 = vpop.f32.mrf.mxu0 }
 0x109   : > { %v428_v5 = vmul.f32 %v393_v2, %v393_v2  ;;  %v418_v21 = vmul.f32 %v393_v2, %v1392_v41 }
 0x10a   : > { %v1462_v3 = vpop.f32.mrf.mxu0 }
 0x10b   : > { %v430_v9 = vadd.f32 %v428_v5, %v426_v7  ;;  %v420_v24 = vadd.f32 %v418_v21, %v416_v22  ;;  %v736_v5 = vld [vmem:[%s1600_s4 + $0x18] sm:$0xff]  ;;  %v735_v7 = vld [vmem:[%s1600_s4 + $0x10] sm:$0xff] }
 0x10c   : > { %v399_v4 = vpop.f32.mrf.mxu0 }
 0x10d   : > { %v429_v10 = vmul.f32 %v399_v4, %v399_v4  ;;  %v419_v25 = vmul.f32 %v399_v4, %v1396_v42 }
 0x10e   : > { %v1464_v6 = vpop.f32.mrf.mxu0 }
 0x10f   : > { %v431_v16 = vadd.f32 %v429_v10, %v427_v13  ;;  %v421_v30 = vadd.f32 %v419_v25, %v417_v26 }
 0x110   : > { %v405_v8 = vpop.f32.mrf.mxu0 }
 0x111   : > { %v432_v11 = vmul.f32 %v405_v8, %v405_v8  ;;  %v422_v23 = vmul.f32 %v405_v8, %v1400_v43 }
 0x112   : > { %v1466_v12 = vpop.f32.mrf.mxu0 }
 0x113   : > { %v434_v14 = vadd.f32 %v432_v11, %v430_v9  ;;  %v424_v27 = vadd.f32 %v422_v23, %v420_v24  ;;  %v733_v9 = vld [vmem:[%s1600_s4] sm:$0xff] }
 0x114   : > { %v411_v15 = vpop.f32.mrf.mxu0 }
 0x115   : > { %v438_v17 = vadd.f32 1e-06, %v434_v14  ;;  %v433_v18 = vmul.f32 %v411_v15, %v411_v15  ;;  %v423_v28 = vmul.f32 %v411_v15, %v1404_v44  ;;  %vm436_vm0 = vcmp.ge.f32.partialorder %v424_v27, 0.0 }
 0x117   : > { %1178 = vrcp.f32 %v438_v17  ;;  %v435_v19 = vadd.f32 %v433_v18, %v431_v16  ;;  %v425_v32 = vadd.f32 %v423_v28, %v421_v30 }
 0x119   : > { %v439_v20 = vadd.f32 1e-06, %v435_v19  ;;  %vm437_vm1 = vcmp.ge.f32.partialorder %v425_v32, 0.0 }
 0x11b   : > { %1180 = vrcp.f32 %v439_v20 }
 0x124   : > { %v1179_v29 = vpop.eup %1178 }
 0x125   : > { %v442_v31 = vmul.f32 %v1179_v29, %v424_v27 }
 0x127   : > { %v444_v33 = vsel %vm436_vm0, 0.0, %v442_v31 }
 0x128   : > { %v1181_v34 = vpop.eup %1180  ;;  %v446_v35 = vmul.f32 %v444_v33, %v381_v62  ;;  %v448_v45 = vmul.f32 %v444_v33, %v393_v2  ;;  %v450_v49 = vmul.f32 %v444_v33, %v405_v8  ;;  %v740_v62 = vld [vmem:[%s1600_s4 + $0x38] sm:$0xff]  ;;  %v738_v2 = vld [vmem:[%s1600_s4 + $0x28] sm:$0xff] }
 0x129   : > { %v443_v36 = vmul.f32 %v1181_v34, %v425_v32  ;;  %1126 = vmatprep.subr.mxu0 %v740_v62  ;;  %v734_v8 = vld [vmem:[%s1600_s4 + $0x8] sm:$0xff] }
 0x12a   : > { %v452_v37 = vsub.f32 %v1384_v39, %v446_v35  ;;  %v454_v50 = vsub.f32 %v1392_v41, %v448_v45  ;;  %v574_v39 = vld [vmem:[%s1599_s3 + $0x28] sm:$0xff]  ;;  %v573_v41 = vld [vmem:[%s1599_s3 + $0x20] sm:$0xff]  ;;  %1127 = vmatpush3.msra.mxu0 %v740_v62 }
 0x12b   : > { %v445_v38 = vsel %vm437_vm1, 0.0, %v443_v36 }
 0x12c   : > { %1092 = vmatprep.mubr.f32.mxu1 %v452_v37  ;;  %v447_v46 = vmul.f32 %v445_v38, %v387_v0  ;;  %v449_v48 = vmul.f32 %v445_v38, %v399_v4  ;;  %v451_v52 = vmul.f32 %v445_v38, %v411_v15  ;;  %v739_v0 = vld [vmem:[%s1600_s4 + $0x30] sm:$0xff]  ;;  %v737_v4 = vld [vmem:[%s1600_s4 + $0x20] sm:$0xff] }
 0x12d   : > { %1128 = vmatprep.subr.mxu0 %v739_v0 }
 0x12e   : > { %v453_v47 = vsub.f32 %v1388_v40, %v447_v46  ;;  %v455_v53 = vsub.f32 %v1396_v42, %v449_v48  ;;  %v456_v40 = vsub.f32 %v1400_v43, %v450_v49  ;;  %v457_v55 = vsub.f32 %v1404_v44, %v451_v52  ;;  %v571_v42 = vld [vmem:[%s1599_s3 + $0x10] sm:$0xff]  ;;  %v570_v43 = vld [vmem:[%s1599_s3 + $0x8] sm:$0xff]  ;;  %v569_v44 = vld [vmem:[%s1599_s3] sm:$0xff]  ;;  %1129 = vmatpush3.msra.mxu0 %v739_v0 }
 0x12f   : > { %1130 = vmatprep.subr.mxu0 %v738_v2 }
 0x130   : > { %1093 = vmatmul.mubr.f32.vlgmr.msra.gmra.mxu1 %v453_v47  ;;  %1131 = vmatpush3.msra.mxu0 %v738_v2 }
 0x131   : > { %1095 = vmatprep.mubr.f32.mxu1 %v454_v50  ;;  %1102 = vmatpush3.msra.mxu1 %v576_v61 }
 0x132   : > { %1103 = vmatprep.subr.mxu1 %v575_v51  ;;  %1132 = vmatprep.subr.mxu0 %v737_v4 }
 0x133   : > { %1104 = vmatpush3.msra.mxu1 %v575_v51  ;;  %1133 = vmatpush3.msra.mxu0 %v737_v4 }
 0x134   : > { %1096 = vmatmul.mubr.f32.gmra.mxu1 %v455_v53  ;;  %1105 = vmatprep.subr.mxu1 %v574_v39 }
 0x135   : > { %1098 = vmatprep.mubr.f32.mxu1 %v456_v40  ;;  %1106 = vmatpush3.msra.mxu1 %v574_v39 }
 0x136   : > { %1107 = vmatprep.subr.mxu1 %v573_v41  ;;  %1134 = vmatprep.subr.mxu0 %v736_v5 }
 0x137   : > { %1108 = vmatpush3.msra.mxu1 %v573_v41  ;;  %1135 = vmatpush3.msra.mxu0 %v736_v5 }
 0x138   : > { %1099 = vmatmul.mubr.f32.gmra.mxu1 %v457_v55  ;;  %1109 = vmatprep.subr.mxu1 %v572_v54 }
 0x139   : > { %1110 = vmatpush3.msra.mxu1 %v572_v54  ;;  %1136 = vmatprep.subr.mxu0 %v735_v7 }
 0x13a   : > { %1111 = vmatprep.subr.mxu1 %v571_v42  ;;  %1137 = vmatpush3.msra.mxu0 %v735_v7 }
 0x13b   : > { %1112 = vmatpush3.msra.mxu1 %v571_v42  ;;  %1138 = vmatprep.subr.mxu0 %v734_v8 }
 0x13c   : > { %1113 = vmatprep.subr.mxu1 %v570_v43  ;;  %1139 = vmatpush3.msra.mxu0 %v734_v8 }
 0x13d   : > { %1114 = vmatpush3.msra.mxu1 %v570_v43  ;;  %1140 = vmatprep.subr.mxu0 %v733_v9 }
 0x13e   : > { %1115 = vmatprep.subr.mxu1 %v569_v44  ;;  %1141 = vmatpush3.msra.mxu0 %v733_v9 }
 0x13f   : > { %1116 = vmatpush3.msra.mxu1 %v569_v44 }
 0x1f0   : > { %v1501_v56 = vpop.f32.mrf.mxu1 }
 0x1f2   : > { %v1503_v57 = vpop.f32.mrf.mxu1 }
 0x1f3   : > { %1117 = vmatprep.mubr.msk.f32.mxu1 %vm577_vm2, %v1503_v57 }
 0x1f4   : > { %v1507_v58 = vpop.f32.mrf.mxu1  ;;  %1118 = vmatmul.mubr.msk.f32.vlgmr.msra.gmra.mxu1 %vm577_vm2, %v1501_v56 }
 0x1f6   : > { %v1511_v59 = vpop.f32.mrf.mxu1 }
 0x1f7   : > { %1120 = vmatprep.mubr.msk.f32.mxu1 %vm577_vm2, %v1511_v59 }
 0x1f8   : > { %v1515_v60 = vpop.f32.mrf.mxu1  ;;  %1121 = vmatmul.mubr.msk.f32.gmra.mxu1 %vm577_vm2, %v1507_v58 }
 0x1fa   : > { %v1519_v61 = vpop.f32.mrf.mxu1 }
 0x1fb   : > { %1123 = vmatprep.mubr.msk.f32.mxu1 %vm577_vm2, %v1519_v61 }
 0x1fc   : > { %1124 = vmatmul.mubr.msk.f32.gmra.mxu1 %vm577_vm2, %v1515_v60 }
 0x2b4   : > { %v1119_v10 = vpop.f32.mrf.mxu1 }
 0x2b5   : > { %v702_v16 = vmul.f32 %v1119_v10, %v1119_v10  ;;  %v692_v30 = vmul.f32 %v1119_v10, %v1501_v56 }
 0x2b6   : > { %v662_v11 = vpop.f32.mrf.mxu1 }
 0x2b7   : > { %v701_v19 = vmul.f32 %v662_v11, %v662_v11  ;;  %v691_v33 = vmul.f32 %v662_v11, %v1503_v57 }
 0x2b8   : > { %v1122_v13 = vpop.f32.mrf.mxu1 }
 0x2b9   : > { %v704_v14 = vmul.f32 %v1122_v13, %v1122_v13  ;;  %v694_v29 = vmul.f32 %v1122_v13, %v1507_v58 }
 0x2ba   : > { %v672_v15 = vpop.f32.mrf.mxu1 }
 0x2bb   : > { %v703_v17 = vmul.f32 %v672_v15, %v672_v15  ;;  %v706_v20 = vadd.f32 %v704_v14, %v702_v16  ;;  %v693_v31 = vmul.f32 %v672_v15, %v1511_v59  ;;  %v696_v34 = vadd.f32 %v694_v29, %v692_v30 }
 0x2bc   : > { %v1125_v18 = vpop.f32.mrf.mxu1 }
 0x2bd   : > { %v708_v21 = vmul.f32 %v1125_v18, %v1125_v18  ;;  %v705_v23 = vadd.f32 %v703_v17, %v701_v19  ;;  %v698_v32 = vmul.f32 %v1125_v18, %v1515_v60  ;;  %v695_v36 = vadd.f32 %v693_v31, %v691_v33 }
 0x2be   : > { %v682_v22 = vpop.f32.mrf.mxu1 }
 0x2bf   : > { %v710_v24 = vadd.f32 %v708_v21, %v706_v20  ;;  %v707_v25 = vmul.f32 %v682_v22, %v682_v22  ;;  %v697_v35 = vmul.f32 %v682_v22, %v1519_v61  ;;  %v700_v37 = vadd.f32 %v698_v32, %v696_v34 }
 0x2c1   : > { %v714_v26 = vadd.f32 1e-06, %v710_v24  ;;  %v709_v27 = vadd.f32 %v707_v25, %v705_v23  ;;  %v699_v45 = vadd.f32 %v697_v35, %v695_v36  ;;  %vm712_vm3 = vcmp.ge.f32.partialorder %v700_v37, 0.0 }
 0x2c3   : > { %1182 = vrcp.f32 %v714_v26  ;;  %v713_v28 = vadd.f32 1e-06, %v709_v27  ;;  %vm711_vm4 = vcmp.ge.f32.partialorder %v699_v45, 0.0 }
 0x2c5   : > { %1184 = vrcp.f32 %v713_v28 }
 0x2d0   : > { %v1183_v38 = vpop.eup %1182 }
 0x2d1   : > { %v718_v46 = vmul.f32 %v1183_v38, %v700_v37 }
 0x2d2   : > { %v1185_v47 = vpop.eup %1184 }
 0x2d3   : > { %v720_v48 = vsel %vm712_vm3, 0.0, %v718_v46  ;;  %v717_v49 = vmul.f32 %v1185_v47, %v699_v45 }
 0x2d4   : > { %v722_v50 = vmul.f32 %v1119_v10, %v720_v48  ;;  %v724_v40 = vmul.f32 %v1122_v13, %v720_v48  ;;  %v726_v42 = vmul.f32 %v1125_v18, %v720_v48 }
 0x2d5   : > { %v719_v51 = vsel %vm711_vm4, 0.0, %v717_v49 }
 0x2d6   : > { %v721_v39 = vmul.f32 %v719_v51, %v662_v11  ;;  %v723_v52 = vmul.f32 %v719_v51, %v672_v15  ;;  %v728_v41 = vsub.f32 %v1501_v56, %v722_v50  ;;  %v725_v54 = vmul.f32 %v719_v51, %v682_v22 }
 0x2d7   : > { %v730_v43 = vsub.f32 %v1507_v58, %v724_v40  ;;  %v732_v56 = vsub.f32 %v1515_v60, %v726_v42 }
 0x2d8   : > { %v727_v53 = vsub.f32 %v1503_v57, %v721_v39  ;;  %v729_v55 = vsub.f32 %v1511_v59, %v723_v52  ;;  %v731_v44 = vsub.f32 %v1519_v61, %v725_v54  ;;  %v413_v57 = vpop.f32.mrf.mxu0 }
 0x2da   : > { %1142 = vmatprep.mubr.msk.f32.mxu0 %vm577_vm2, %v727_v53 }
 0x2db   : > { %1143 = vmatmul.mubr.msk.f32.vlgmr.msra.gmra.mxu0 %vm577_vm2, %v728_v41 }
 0x2dc   : > { %1145 = vmatprep.mubr.msk.f32.mxu0 %vm577_vm2, %v729_v55 }
 0x2df   : > { %1146 = vmatmul.mubr.msk.f32.gmra.mxu0 %vm577_vm2, %v730_v43 }
 0x2e0   : > { %1148 = vmatprep.mubr.msk.f32.mxu0 %vm577_vm2, %v731_v44 }
 0x2e3   : > { %1149 = vmatmul.mubr.msk.f32.gmra.mxu0 %vm577_vm2, %v732_v56 }
 0x39b   : > { %v1144_v62 = vpop.f32.mrf.mxu0 }
 0x39c   : > { %v855_v59 = vadd.f32 %v1144_v62, %v1460_v1 }
 0x39d   : > { %v825_v0 = vpop.f32.mrf.mxu0 }
 0x39e   : > { %861 = vst.msk [vmem:[%s274_s13 + $0x8] sm:$0xff] %vm577_vm2, %v855_v59  ;;  %v854_v58 = vadd.f32 %v825_v0, %v1458_v63 }
 0x39f   : > { %v1147_v2 = vpop.f32.mrf.mxu0 }
 0x3a0   : > { %860 = vst.msk [vmem:[%s274_s13] sm:$0xff] %vm577_vm2, %v854_v58  ;;  %v857_v61 = vadd.f32 %v1147_v2, %v1464_v6 }
 0x3a1   : > { %v835_v4 = vpop.f32.mrf.mxu0 }
 0x3a2   : > { %863 = vst.msk [vmem:[%s274_s13 + $0x18] sm:$0xff] %vm577_vm2, %v857_v61  ;;  %v856_v60 = vadd.f32 %v835_v4, %v1462_v3 }
 0x3a3   : > { %v1150_v5 = vpop.f32.mrf.mxu0 }
 0x3a4   : > { %862 = vst.msk [vmem:[%s274_s13 + $0x10] sm:$0xff] %vm577_vm2, %v856_v60  ;;  %v859_v1 = vadd.f32 %v1150_v5, %v413_v57  ;;  %872 = sbr.rel (!%p1271_p5) target bundleno = 945 (0x3b1), region = 82 }
 0x3a5   : > { %v845_v7 = vpop.f32.mrf.mxu0  ;;  %v916_v6 = vld [vmem:[%s274_s13 + $0x8] sm:$0xff] (%p1271_p5) }
 0x3a6   : > { %865 = vst.msk [vmem:[%s274_s13 + $0x28] sm:$0xff] %vm577_vm2, %v859_v1  ;;  %v858_v8 = vadd.f32 %v845_v7, %v1466_v12  ;;  %917 = vst [vmem:[%s875_s16 + $0x8] sm:$0xff] (%p1271_p5), %v916_v6 }
 0x3a7   : > { %v914_v63 = vld [vmem:[%s274_s13] sm:$0xff] (%p1271_p5) }
 0x3a8   : > { %864 = vst.msk [vmem:[%s274_s13 + $0x20] sm:$0xff] %vm577_vm2, %v858_v8  ;;  %915 = vst [vmem:[%s875_s16] sm:$0xff] (%p1271_p5), %v914_v63 }
 0x3a9   : > { %v920_v9 = vld [vmem:[%s274_s13 + $0x18] sm:$0xff] }
 0x3aa   : > { %921 = vst [vmem:[%s875_s16 + $0x28] sm:$0xff] %v920_v9 }
 0x3ab   : > { %v918_v3 = vld [vmem:[%s274_s13 + $0x10] sm:$0xff] }
 0x3ac   : > { %919 = vst [vmem:[%s875_s16 + $0x20] sm:$0xff] %v918_v3 }
 0x3ad   : > { %v924_v11 = vld [vmem:[%s274_s13 + $0x28] sm:$0xff] }
 0x3ae   : > { %925 = vst [vmem:[%s875_s16 + $0x48] sm:$0xff] %v924_v11 }
 0x3af   : > { %v922_v10 = vld [vmem:[%s274_s13 + $0x20] sm:$0xff] }
 0x3b0   : > { %923 = vst [vmem:[%s875_s16 + $0x40] sm:$0xff] %v922_v10 }
 0x3b1 PF: > { %p12_p10 = scmp.ge.s32.totalorder %s1258_s22, 4   ;;  %s1603_s18 = smov %s1204_s19 }
 0x3b2   : > { %s1604_s19 = smov %s1269_s25  ;;  %s1605_s20 = smov %s1258_s22 }
 0x3b3   :  { %14 = sbr.rel (!%p12_p10) target bundleno = 2 (0x2), region = 151 }

// kernel: vnn_resnet_pointnet_forward.7
= control target key start
LH: loop header
LB: loop body
LE: loop exit
PB: predicated region body
PF: predicated region fallthrough
CT: control target
= control target key end

     0   :  { %s2259_s9 = smov 0   ;;  %s2261_s10 = smov 0   ;;  %s3378_s0 = inlined_call_operand.vmem [shape: f32[3,8,32,3], index: 0, kind: input, shape index: {}]   ;;  %s3379_s1 = inlined_call_operand.vmem [shape: f32[3,256], index: 1, kind: input, shape index: {}]   ;;  %s3380_s2 = inlined_call_operand.vmem [shape: f32[3,32,128], index: 2, kind: output, shape index: {}]  }
   0x1   :  { %s2263_s11 = smov 0  }
   0x2 LB: > { %s2039_s12 = sadd.s32 4294967295, %s2241_s11   ;;  %s2276_s13 = sadd.s32 1, %s2241_s11   ;;  %s2241_s11 = sphi %s2263_s11, %s3543_s11   ;;  %s2237_s10 = sphi %s2261_s10, %s3542_s10   ;;  %s2233_s9 = sphi %s2259_s9, %s3541_s9  }
   0x3   : > { %s16_s14 = ssub.s32 %s2241_s11, %s2276_s13  ;;  %s19_s15 = sadd.s32 1, %s2237_s10 }
   0x4   : > { %p17_p0 = scmp.eq.s32.totalorder %s16_s14, 0  ;;  %p26_p1 = scmp.ne.s32.totalorder %s2237_s10, %s2233_s9 }
   0x5   : > { %p27_p2 = scmp.eq.s32.totalorder %s2241_s11, 0  ;;  %p77_p3 = scmp.eq.s32.totalorder %s2039_s12, 1 }
   0x6   : > { %s2287_s16 = scalar_select %p17_p0, %s2237_s10, %s19_s15  }
   0x7   : > { %p28_p4 = por %p27_p2, %p26_p1  ;;  %p2289_p5 = por %p77_p3, %p26_p1 }
   0x8   : > { %p2042_p6 = scmp.ge.s32.totalorder %s2241_s11, 2 }
   0xa   : > { %102 = sbr.rel (%p2042_p6) target bundleno = 43 (0x2b), region = 20 }
   0xf   : > { %105 = sbr.rel (!%p28_p4) target bundleno = 43 (0x2b), region = 24  ;;  %s107_s18 = sand.u32 (%p28_p4), 1, %s2237_s10  }
  0x10   : > { %s2156_s19 = sshll.u32 (%p28_p4), %s2241_s11, 4  ;;  %s2158_s20 = smul.u32 (%p28_p4), 384, %s107_s18 }
  0x11   : > { %s2299_s23 = scalar_lea.vmem (%p28_p4), %s3378_s0, %s2156_s19 }
  0x12   : > { %v235_v0 = vld [vmem:[%s2299_s23] sm:$0xff] (%p28_p4)  ;;  %v237_v1 = vld [vmem:[%s2299_s23 + $0x8] sm:$0xff] (%p28_p4)  ;;  %s2307_s24 = scalar_lea.vmem (%p28_p4), [#allocation2], %s2158_s20 }
  0x13   : > { %v239_v2 = vld [vmem:[%s2299_s23 + $0x20] sm:$0xff] (%p28_p4)  ;;  %v241_v3 = vld [vmem:[%s2299_s23 + $0x28] sm:$0xff] (%p28_p4)  ;;  %236 = vst [vmem:[%s2307_s24] sm:$0xff] (%p28_p4), %v235_v0  ;;  %238 = vst [vmem:[%s2307_s24 + $0x8] sm:$0xff] (%p28_p4), %v237_v1 }
  0x14   : > { %v243_v4 = vld [vmem:[%s2299_s23 + $0x40] sm:$0xff]  ;;  %v245_v5 = vld [vmem:[%s2299_s23 + $0x48] sm:$0xff]  ;;  %240 = vst [vmem:[%s2307_s24 + $0x10] sm:$0xff] %v239_v2  ;;  %242 = vst [vmem:[%s2307_s24 + $0x18] sm:$0xff] %v241_v3 }
  0x15   : > { %244 = vst [vmem:[%s2307_s24 + $0x20] sm:$0xff] %v243_v4  ;;  %246 = vst [vmem:[%s2307_s24 + $0x28] sm:$0xff] %v245_v5  ;;  %v247_v6 = vld [vmem:[%s2299_s23 + $0x60] sm:$0xff]  ;;  %v249_v7 = vld [vmem:[%s2299_s23 + $0x68] sm:$0xff] }
  0x16   : > { %v251_v8 = vld [vmem:[%s2299_s23 + $0x80] sm:$0xff]  ;;  %248 = vst [vmem:[%s2307_s24 + $0x30] sm:$0xff] %v247_v6  ;;  %250 = vst [vmem:[%s2307_s24 + $0x38] sm:$0xff] %v249_v7  ;;  %v253_v9 = vld [vmem:[%s2299_s23 + $0x88] sm:$0xff] }
  0x17   : > { %252 = vst [vmem:[%s2307_s24 + $0x40] sm:$0xff] %v251_v8  ;;  %v255_v10 = vld [vmem:[%s2299_s23 + $0xa0] sm:$0xff]  ;;  %v257_v11 = vld [vmem:[%s2299_s23 + $0xa8] sm:$0xff]  ;;  %254 = vst [vmem:[%s2307_s24 + $0x48] sm:$0xff] %v253_v9 }
  0x18   : > { %256 = vst [vmem:[%s2307_s24 + $0x50] sm:$0xff] %v255_v10  ;;  %258 = vst [vmem:[%s2307_s24 + $0x58] sm:$0xff] %v257_v11  ;;  %v259_v12 = vld [vmem:[%s2299_s23 + $0xc0] sm:$0xff]  ;;  %v261_v13 = vld [vmem:[%s2299_s23 + $0xc8] sm:$0xff] }
  0x19   : > { %v263_v14 = vld [vmem:[%s2299_s23 + $0xe0] sm:$0xff]  ;;  %260 = vst [vmem:[%s2307_s24 + $0x60] sm:$0xff] %v259_v12  ;;  %262 = vst [vmem:[%s2307_s24 + $0x68] sm:$0xff] %v261_v13  ;;  %v265_v15 = vld [vmem:[%s2299_s23 + $0xe8] sm:$0xff] }
  0x1a   : > { %264 = vst [vmem:[%s2307_s24 + $0x70] sm:$0xff] %v263_v14  ;;  %v267_v16 = vld [vmem:[%s2299_s23 + $0x100] sm:$0xff]  ;;  %v269_v17 = vld [vmem:[%s2299_s23 + $0x108] sm:$0xff]  ;;  %266 = vst [vmem:[%s2307_s24 + $0x78] sm:$0xff] %v265_v15 }
  0x1b   : > { %268 = vst [vmem:[%s2307_s24 + $0x80] sm:$0xff] %v267_v16  ;;  %270 = vst [vmem:[%s2307_s24 + $0x88] sm:$0xff] %v269_v17  ;;  %v271_v18 = vld [vmem:[%s2299_s23 + $0x120] sm:$0xff]  ;;  %v273_v19 = vld [vmem:[%s2299_s23 + $0x128] sm:$0xff] }
  0x1c   : > { %v275_v20 = vld [vmem:[%s2299_s23 + $0x140] sm:$0xff]  ;;  %272 = vst [vmem:[%s2307_s24 + $0x90] sm:$0xff] %v271_v18  ;;  %274 = vst [vmem:[%s2307_s24 + $0x98] sm:$0xff] %v273_v19  ;;  %v277_v21 = vld [vmem:[%s2299_s23 + $0x148] sm:$0xff] }
  0x1d   : > { %276 = vst [vmem:[%s2307_s24 + $0xa0] sm:$0xff] %v275_v20  ;;  %v279_v22 = vld [vmem:[%s2299_s23 + $0x160] sm:$0xff]  ;;  %v281_v23 = vld [vmem:[%s2299_s23 + $0x168] sm:$0xff]  ;;  %278 = vst [vmem:[%s2307_s24 + $0xa8] sm:$0xff] %v277_v21 }
  0x1e   : > { %280 = vst [vmem:[%s2307_s24 + $0xb0] sm:$0xff] %v279_v22  ;;  %282 = vst [vmem:[%s2307_s24 + $0xb8] sm:$0xff] %v281_v23  ;;  %v283_v24 = vld [vmem:[%s2299_s23 + $0x180] sm:$0xff]  ;;  %v285_v25 = vld [vmem:[%s2299_s23 + $0x188] sm:$0xff] }
  0x1f   : > { %v287_v26 = vld [vmem:[%s2299_s23 + $0x1a0] sm:$0xff]  ;;  %284 = vst [vmem:[%s2307_s24 + $0xc0] sm:$0xff] %v283_v24  ;;  %286 = vst [vmem:[%s2307_s24 + $0xc8] sm:$0xff] %v285_v25  ;;  %v289_v27 = vld [vmem:[%s2299_s23 + $0x1a8] sm:$0xff] }
  0x20   : > { %288 = vst [vmem:[%s2307_s24 + $0xd0] sm:$0xff] %v287_v26  ;;  %v291_v28 = vld [vmem:[%s2299_s23 + $0x1c0] sm:$0xff]  ;;  %v293_v29 = vld [vmem:[%s2299_s23 + $0x1c8] sm:$0xff]  ;;  %290 = vst [vmem:[%s2307_s24 + $0xd8] sm:$0xff] %v289_v27 }
  0x21   : > { %292 = vst [vmem:[%s2307_s24 + $0xe0] sm:$0xff] %v291_v28  ;;  %294 = vst [vmem:[%s2307_s24 + $0xe8] sm:$0xff] %v293_v29  ;;  %v295_v30 = vld [vmem:[%s2299_s23 + $0x1e0] sm:$0xff]  ;;  %v297_v31 = vld [vmem:[%s2299_s23 + $0x1e8] sm:$0xff] }
  0x22   : > { %v299_v32 = vld [vmem:[%s2299_s23 + $0x200] sm:$0xff]  ;;  %296 = vst [vmem:[%s2307_s24 + $0xf0] sm:$0xff] %v295_v30  ;;  %298 = vst [vmem:[%s2307_s24 + $0xf8] sm:$0xff] %v297_v31  ;;  %v301_v33 = vld [vmem:[%s2299_s23 + $0x208] sm:$0xff] }
  0x23   : > { %300 = vst [vmem:[%s2307_s24 + $0x100] sm:$0xff] %v299_v32  ;;  %v303_v34 = vld [vmem:[%s2299_s23 + $0x220] sm:$0xff]  ;;  %v305_v35 = vld [vmem:[%s2299_s23 + $0x228] sm:$0xff]  ;;  %302 = vst [vmem:[%s2307_s24 + $0x108] sm:$0xff] %v301_v33 }
  0x24   : > { %304 = vst [vmem:[%s2307_s24 + $0x110] sm:$0xff] %v303_v34  ;;  %306 = vst [vmem:[%s2307_s24 + $0x118] sm:$0xff] %v305_v35  ;;  %v307_v36 = vld [vmem:[%s2299_s23 + $0x240] sm:$0xff]  ;;  %v309_v37 = vld [vmem:[%s2299_s23 + $0x248] sm:$0xff] }
  0x25   : > { %v311_v38 = vld [vmem:[%s2299_s23 + $0x260] sm:$0xff]  ;;  %308 = vst [vmem:[%s2307_s24 + $0x120] sm:$0xff] %v307_v36  ;;  %310 = vst [vmem:[%s2307_s24 + $0x128] sm:$0xff] %v309_v37  ;;  %v313_v39 = vld [vmem:[%s2299_s23 + $0x268] sm:$0xff] }
  0x26   : > { %312 = vst [vmem:[%s2307_s24 + $0x130] sm:$0xff] %v311_v38  ;;  %v315_v40 = vld [vmem:[%s2299_s23 + $0x280] sm:$0xff]  ;;  %v317_v41 = vld [vmem:[%s2299_s23 + $0x288] sm:$0xff]  ;;  %314 = vst [vmem:[%s2307_s24 + $0x138] sm:$0xff] %v313_v39 }
  0x27   : > { %316 = vst [vmem:[%s2307_s24 + $0x140] sm:$0xff] %v315_v40  ;;  %318 = vst [vmem:[%s2307_s24 + $0x148] sm:$0xff] %v317_v41  ;;  %v319_v42 = vld [vmem:[%s2299_s23 + $0x2a0] sm:$0xff]  ;;  %v321_v43 = vld [vmem:[%s2299_s23 + $0x2a8] sm:$0xff] }
  0x28   : > { %v323_v44 = vld [vmem:[%s2299_s23 + $0x2c0] sm:$0xff]  ;;  %320 = vst [vmem:[%s2307_s24 + $0x150] sm:$0xff] %v319_v42  ;;  %322 = vst [vmem:[%s2307_s24 + $0x158] sm:$0xff] %v321_v43  ;;  %v325_v45 = vld [vmem:[%s2299_s23 + $0x2c8] sm:$0xff] }
  0x29   : > { %324 = vst [vmem:[%s2307_s24 + $0x160] sm:$0xff] %v323_v44  ;;  %v327_v46 = vld [vmem:[%s2299_s23 + $0x2e0] sm:$0xff]  ;;  %v329_v47 = vld [vmem:[%s2299_s23 + $0x2e8] sm:$0xff]  ;;  %326 = vst [vmem:[%s2307_s24 + $0x168] sm:$0xff] %v325_v45 }
  0x2a   : > { %328 = vst [vmem:[%s2307_s24 + $0x170] sm:$0xff] %v327_v46  ;;  %330 = vst [vmem:[%s2307_s24 + $0x178] sm:$0xff] %v329_v47 }
  0x2b PF: > { %p2045_p7 = scmp.ge.s32.totalorder %s2241_s11, 1  ;;  %p335_p8 = scmp.lt.s32.totalorder %s2241_s11, 3 }
  0x2d   : > { %p336_p9 = pnand %p2045_p7, %p335_p8 }
  0x2f   : > { %339 = sbr.rel (%p336_p9) target bundleno = 422 (0x1a6), region = 62 }
  0x34   : > { %v2404_v48 = vld [vmem:[%s3379_s1] sm:$0x77]  ;;  %vm392_vm0 = vcmask 1042432   ;;  %s342_s27 = sand.u32 1, %s2233_s9   ;;  %v2243_v50 = vmov 0.0   ;;  %vm373_vm1 = vcmask 23552  }
  0x35   : > { %v2409_v49 = vcombine.high %v2404_v48, %v2404_v48  ;;  %461 = vmatprep.mubr.f32.mxu0 %v2243_v50  ;;  %653 = vmatprep.mubr.f32.mxu1 %v2243_v50  ;;  %s2159_s28 = smul.u32 384, %s342_s27  ;;  %s2157_s4 = sshll.u32 (%p2289_p5), %s2039_s12, 4 }
  0x36   : > { %s2160_s30 = smul.u32 48, %s342_s27  ;;  %s1929_s7 = scalar_lea.vmem (%p2289_p5), %s3380_s2, %s2157_s4 }
  0x37   : > { %2046 = vmatprep.subr.msk.mxu0 %vm392_vm0, %v2409_v49  ;;  %2060 = vmatprep.subr.msk.mxu1 %vm392_vm0, %v2409_v49  ;;  %s2423_s29 = scalar_lea.vmem [#allocation2], %s2159_s28 }
  0x38   : > { %2047 = vmatpush1.msk.msra.mxu0 %vm392_vm0, %v2404_v48  ;;  %2061 = vmatpush1.msk.msra.mxu1 %vm392_vm0, %v2404_v48  ;;  %v365_v51 = vld [vmem:[%s2423_s29] sm:$0xff]  ;;  %v2054_v52 = vld [vmem:[%s2423_s29 + $0x10] sm:$0xff]  ;;  %v366_v53 = vld [vmem:[%s2423_s29 + $0x8] sm:$0xff]  ;;  %s361_s3 = scalar_lea.vmem [#allocation3], %s2160_s30 }
  0x39   : > { %2048 = vmatmul.mubr.msk.f32.vlgmr.msra.gmra.mxu0 %vm373_vm1, %v365_v51  ;;  %2062 = vmatmul.mubr.msk.f32.vlgmr.msra.gmra.mxu1 %vm373_vm1, %v2054_v52  ;;  %v2055_v54 = vld [vmem:[%s2423_s29 + $0x18] sm:$0xff]  ;;  %v367_v55 = vld [vmem:[%s2423_s29 + $0x80] sm:$0xff]  ;;  %v2056_v56 = vld [vmem:[%s2423_s29 + $0x90] sm:$0xff] }
  0x3a   : > { %2074 = vmatprep.subr.msk.mxu0 %vm392_vm0, %v2409_v49  ;;  %2088 = vmatprep.subr.msk.mxu1 %vm392_vm0, %v2409_v49  ;;  %v368_v57 = vld [vmem:[%s2423_s29 + $0x88] sm:$0xff]  ;;  %v2057_v58 = vld [vmem:[%s2423_s29 + $0x98] sm:$0xff]  ;;  %v369_v59 = vld [vmem:[%s2423_s29 + $0x100] sm:$0xff] }
  0x3b   : > { %2075 = vmatpush1.msk.msra.mxu0 %vm392_vm0, %v2404_v48  ;;  %467 = vmatprep.mubr.f32.mxu0 %v2243_v50  ;;  %v2058_v60 = vld [vmem:[%s2423_s29 + $0x110] sm:$0xff]  ;;  %v370_v61 = vld [vmem:[%s2423_s29 + $0x108] sm:$0xff]  ;;  %v2059_v62 = vld [vmem:[%s2423_s29 + $0x118] sm:$0xff] }
  0x3c   : > { %659 = vmatprep.mubr.f32.mxu1 %v2243_v50  ;;  %2089 = vmatpush1.msk.msra.mxu1 %vm392_vm0, %v2404_v48  ;;  %v2068_v63 = vld [vmem:[%s2423_s29 + $0x20] sm:$0xff]  ;;  %v2082_v0 = vld [vmem:[%s2423_s29 + $0x30] sm:$0xff]  ;;  %v2069_v1 = vld [vmem:[%s2423_s29 + $0x28] sm:$0xff] }
  0x3d   : > { %2049 = vmatmul.mubr.msk.f32.gmra.mxu0 %vm373_vm1, %v366_v53  ;;  %2063 = vmatmul.mubr.msk.f32.gmra.mxu1 %vm373_vm1, %v2055_v54  ;;  %v2083_v2 = vld [vmem:[%s2423_s29 + $0x38] sm:$0xff]  ;;  %v2070_v3 = vld [vmem:[%s2423_s29 + $0xa0] sm:$0xff]  ;;  %v2084_v4 = vld [vmem:[%s2423_s29 + $0xb0] sm:$0xff] }
  0x3e   : > { %473 = vmatprep.mubr.f32.mxu0 %v2243_v50  ;;  %665 = vmatprep.mubr.f32.mxu1 %v2243_v50  ;;  %v2071_v5 = vld [vmem:[%s2423_s29 + $0xa8] sm:$0xff]  ;;  %v2085_v6 = vld [vmem:[%s2423_s29 + $0xb8] sm:$0xff]  ;;  %v2072_v7 = vld [vmem:[%s2423_s29 + $0x120] sm:$0xff] }
  0x3f   : > { %2102 = vmatprep.subr.msk.mxu0 %vm392_vm0, %v2409_v49  ;;  %2116 = vmatprep.subr.msk.mxu1 %vm392_vm0, %v2409_v49  ;;  %v2086_v8 = vld [vmem:[%s2423_s29 + $0x130] sm:$0xff]  ;;  %v2073_v9 = vld [vmem:[%s2423_s29 + $0x128] sm:$0xff]  ;;  %v2087_v10 = vld [vmem:[%s2423_s29 + $0x138] sm:$0xff] }
  0x40   : > { %v2096_v11 = vld [vmem:[%s2423_s29 + $0x40] sm:$0xff]  ;;  %v2110_v12 = vld [vmem:[%s2423_s29 + $0x50] sm:$0xff]  ;;  %v2097_v13 = vld [vmem:[%s2423_s29 + $0x48] sm:$0xff] }
  0x41   : > { %2050 = vmatmul.mubr.msk.f32.gmra.mxu0 %vm373_vm1, %v367_v55  ;;  %2064 = vmatmul.mubr.msk.f32.gmra.mxu1 %vm373_vm1, %v2056_v56  ;;  %v2111_v14 = vld [vmem:[%s2423_s29 + $0x58] sm:$0xff]  ;;  %v2098_v15 = vld [vmem:[%s2423_s29 + $0xc0] sm:$0xff]  ;;  %v2112_v16 = vld [vmem:[%s2423_s29 + $0xd0] sm:$0xff] }
  0x42   : > { %479 = vmatprep.mubr.f32.mxu0 %v2243_v50  ;;  %671 = vmatprep.mubr.f32.mxu1 %v2243_v50  ;;  %v2099_v17 = vld [vmem:[%s2423_s29 + $0xc8] sm:$0xff]  ;;  %v2113_v18 = vld [vmem:[%s2423_s29 + $0xd8] sm:$0xff]  ;;  %v2100_v19 = vld [vmem:[%s2423_s29 + $0x140] sm:$0xff] }
  0x43   : > { %v2114_v20 = vld [vmem:[%s2423_s29 + $0x150] sm:$0xff]  ;;  %v2101_v21 = vld [vmem:[%s2423_s29 + $0x148] sm:$0xff]  ;;  %v2115_v22 = vld [vmem:[%s2423_s29 + $0x158] sm:$0xff] }
  0x44   : > { %v2124_v23 = vld [vmem:[%s2423_s29 + $0x60] sm:$0xff]  ;;  %v2138_v24 = vld [vmem:[%s2423_s29 + $0x70] sm:$0xff]  ;;  %v2125_v25 = vld [vmem:[%s2423_s29 + $0x68] sm:$0xff] }
  0x45   : > { %2051 = vmatmul.mubr.msk.f32.gmra.mxu0 %vm373_vm1, %v368_v57  ;;  %2065 = vmatmul.mubr.msk.f32.gmra.mxu1 %vm373_vm1, %v2057_v58  ;;  %v2139_v26 = vld [vmem:[%s2423_s29 + $0x78] sm:$0xff]  ;;  %v2126_v27 = vld [vmem:[%s2423_s29 + $0xe0] sm:$0xff]  ;;  %v2140_v28 = vld [vmem:[%s2423_s29 + $0xf0] sm:$0xff] }
  0x46   : > { %485 = vmatprep.mubr.f32.mxu0 %v2243_v50  ;;  %677 = vmatprep.mubr.f32.mxu1 %v2243_v50  ;;  %v2127_v29 = vld [vmem:[%s2423_s29 + $0xe8] sm:$0xff]  ;;  %v2141_v30 = vld [vmem:[%s2423_s29 + $0xf8] sm:$0xff]  ;;  %v2128_v31 = vld [vmem:[%s2423_s29 + $0x160] sm:$0xff] }
  0x47   : > { %v2142_v32 = vld [vmem:[%s2423_s29 + $0x170] sm:$0xff]  ;;  %v2129_v33 = vld [vmem:[%s2423_s29 + $0x168] sm:$0xff]  ;;  %v2143_v34 = vld [vmem:[%s2423_s29 + $0x178] sm:$0xff] }
  0x49   : > { %2052 = vmatmul.mubr.msk.f32.gmra.mxu0 %vm373_vm1, %v369_v59  ;;  %2066 = vmatmul.mubr.msk.f32.gmra.mxu1 %vm373_vm1, %v2058_v60 }
  0x4a   : > { %491 = vmatprep.mubr.f32.mxu0 %v2243_v50  ;;  %683 = vmatprep.mubr.f32.mxu1 %v2243_v50 }
  0x4d   : > { %2053 = vmatmul.mubr.msk.f32.gmra.mxu0 %vm373_vm1, %v370_v61  ;;  %2067 = vmatmul.mubr.msk.f32.gmra.mxu1 %vm373_vm1, %v2059_v62 }
  0x4e   : > { %845 = vmatprep.mubr.f32.mxu0 %v2243_v50  ;;  %1037 = vmatprep.mubr.f32.mxu1 %v2243_v50 }
  0x51   : > { %2076 = vmatmul.mubr.msk.f32.vlgmr.msra.gmra.mxu0 %vm373_vm1, %v2068_v63  ;;  %2090 = vmatmul.mubr.msk.f32.vlgmr.msra.gmra.mxu1 %vm373_vm1, %v2082_v0 }
  0x52   : > { %2103 = vmatpush1.msk.msra.mxu0 %vm392_vm0, %v2404_v48  ;;  %851 = vmatprep.mubr.f32.mxu0 %v2243_v50 }
  0x53   : > { %1043 = vmatprep.mubr.f32.mxu1 %v2243_v50  ;;  %2117 = vmatpush1.msk.msra.mxu1 %vm392_vm0, %v2404_v48 }
  0x54   : > { %2130 = vmatprep.subr.msk.mxu0 %vm392_vm0, %v2409_v49  ;;  %2144 = vmatprep.subr.msk.mxu1 %vm392_vm0, %v2409_v49 }
  0x55   : > { %2077 = vmatmul.mubr.msk.f32.gmra.mxu0 %vm373_vm1, %v2069_v1  ;;  %2091 = vmatmul.mubr.msk.f32.gmra.mxu1 %vm373_vm1, %v2083_v2 }
  0x56   : > { %857 = vmatprep.mubr.f32.mxu0 %v2243_v50  ;;  %1049 = vmatprep.mubr.f32.mxu1 %v2243_v50 }
  0x59   : > { %2078 = vmatmul.mubr.msk.f32.gmra.mxu0 %vm373_vm1, %v2070_v3  ;;  %2092 = vmatmul.mubr.msk.f32.gmra.mxu1 %vm373_vm1, %v2084_v4 }
  0x5a   : > { %863 = vmatprep.mubr.f32.mxu0 %v2243_v50  ;;  %1055 = vmatprep.mubr.f32.mxu1 %v2243_v50 }
  0x5d   : > { %2079 = vmatmul.mubr.msk.f32.gmra.mxu0 %vm373_vm1, %v2071_v5  ;;  %2093 = vmatmul.mubr.msk.f32.gmra.mxu1 %vm373_vm1, %v2085_v6 }
  0x5e   : > { %869 = vmatprep.mubr.f32.mxu0 %v2243_v50  ;;  %1061 = vmatprep.mubr.f32.mxu1 %v2243_v50 }
  0x61   : > { %2080 = vmatmul.mubr.msk.f32.gmra.mxu0 %vm373_vm1, %v2072_v7  ;;  %2094 = vmatmul.mubr.msk.f32.gmra.mxu1 %vm373_vm1, %v2086_v8 }
  0x62   : > { %875 = vmatprep.mubr.f32.mxu0 %v2243_v50  ;;  %1067 = vmatprep.mubr.f32.mxu1 %v2243_v50 }
  0x65   : > { %2081 = vmatmul.mubr.msk.f32.gmra.mxu0 %vm373_vm1, %v2073_v9  ;;  %2095 = vmatmul.mubr.msk.f32.gmra.mxu1 %vm373_vm1, %v2087_v10 }
  0x66   : > { %1229 = vmatprep.mubr.f32.mxu0 %v2243_v50  ;;  %1421 = vmatprep.mubr.f32.mxu1 %v2243_v50 }
  0x69   : > { %2104 = vmatmul.mubr.msk.f32.vlgmr.msra.gmra.mxu0 %vm373_vm1, %v2096_v11  ;;  %2118 = vmatmul.mubr.msk.f32.vlgmr.msra.gmra.mxu1 %vm373_vm1, %v2110_v12 }
  0x6a   : > { %2131 = vmatpush1.msk.msra.mxu0 %vm392_vm0, %v2404_v48  ;;  %1235 = vmatprep.mubr.f32.mxu0 %v2243_v50 }
  0x6b   : > { %1427 = vmatprep.mubr.f32.mxu1 %v2243_v50  ;;  %2145 = vmatpush1.msk.msra.mxu1 %vm392_vm0, %v2404_v48 }
  0x6d   : > { %2105 = vmatmul.mubr.msk.f32.gmra.mxu0 %vm373_vm1, %v2097_v13  ;;  %2119 = vmatmul.mubr.msk.f32.gmra.mxu1 %vm373_vm1, %v2111_v14 }
  0x6e   : > { %1241 = vmatprep.mubr.f32.mxu0 %v2243_v50  ;;  %1433 = vmatprep.mubr.f32.mxu1 %v2243_v50 }
  0x71   : > { %2106 = vmatmul.mubr.msk.f32.gmra.mxu0 %vm373_vm1, %v2098_v15  ;;  %2120 = vmatmul.mubr.msk.f32.gmra.mxu1 %vm373_vm1, %v2112_v16 }
  0x72   : > { %1247 = vmatprep.mubr.f32.mxu0 %v2243_v50  ;;  %1439 = vmatprep.mubr.f32.mxu1 %v2243_v50 }
  0x75   : > { %2107 = vmatmul.mubr.msk.f32.gmra.mxu0 %vm373_vm1, %v2099_v17  ;;  %2121 = vmatmul.mubr.msk.f32.gmra.mxu1 %vm373_vm1, %v2113_v18 }
  0x76   : > { %1253 = vmatprep.mubr.f32.mxu0 %v2243_v50  ;;  %1445 = vmatprep.mubr.f32.mxu1 %v2243_v50 }
  0x79   : > { %2108 = vmatmul.mubr.msk.f32.gmra.mxu0 %vm373_vm1, %v2100_v19  ;;  %2122 = vmatmul.mubr.msk.f32.gmra.mxu1 %vm373_vm1, %v2114_v20 }
  0x7a   : > { %1259 = vmatprep.mubr.f32.mxu0 %v2243_v50  ;;  %1451 = vmatprep.mubr.f32.mxu1 %v2243_v50 }
  0x7d   : > { %2109 = vmatmul.mubr.msk.f32.gmra.mxu0 %vm373_vm1, %v2101_v21  ;;  %2123 = vmatmul.mubr.msk.f32.gmra.mxu1 %vm373_vm1, %v2115_v22 }
  0x7e   : > { %1613 = vmatprep.mubr.f32.mxu0 %v2243_v50  ;;  %1805 = vmatprep.mubr.f32.mxu1 %v2243_v50 }
  0x81   : > { %2132 = vmatmul.mubr.msk.f32.vlgmr.msra.gmra.mxu0 %vm373_vm1, %v2124_v23  ;;  %2146 = vmatmul.mubr.msk.f32.vlgmr.msra.gmra.mxu1 %vm373_vm1, %v2138_v24 }
  0x82   : > { %1619 = vmatprep.mubr.f32.mxu0 %v2243_v50  ;;  %1811 = vmatprep.mubr.f32.mxu1 %v2243_v50 }
  0x85   : > { %2133 = vmatmul.mubr.msk.f32.gmra.mxu0 %vm373_vm1, %v2125_v25  ;;  %2147 = vmatmul.mubr.msk.f32.gmra.mxu1 %vm373_vm1, %v2139_v26 }
  0x86   : > { %1625 = vmatprep.mubr.f32.mxu0 %v2243_v50  ;;  %1817 = vmatprep.mubr.f32.mxu1 %v2243_v50 }
  0x89   : > { %2134 = vmatmul.mubr.msk.f32.gmra.mxu0 %vm373_vm1, %v2126_v27  ;;  %2148 = vmatmul.mubr.msk.f32.gmra.mxu1 %vm373_vm1, %v2140_v28 }
  0x8a   : > { %1631 = vmatprep.mubr.f32.mxu0 %v2243_v50  ;;  %1823 = vmatprep.mubr.f32.mxu1 %v2243_v50 }
  0x8d   : > { %2135 = vmatmul.mubr.msk.f32.gmra.mxu0 %vm373_vm1, %v2127_v29  ;;  %2149 = vmatmul.mubr.msk.f32.gmra.mxu1 %vm373_vm1, %v2141_v30 }
  0x8e   : > { %1637 = vmatprep.mubr.f32.mxu0 %v2243_v50  ;;  %1829 = vmatprep.mubr.f32.mxu1 %v2243_v50 }
  0x91   : > { %2136 = vmatmul.mubr.msk.f32.gmra.mxu0 %vm373_vm1, %v2128_v31  ;;  %2150 = vmatmul.mubr.msk.f32.gmra.mxu1 %vm373_vm1, %v2142_v32 }
  0x92   : > { %1643 = vmatprep.mubr.f32.mxu0 %v2243_v50  ;;  %1835 = vmatprep.mubr.f32.mxu1 %v2243_v50 }
  0x95   : > { %2137 = vmatmul.mubr.msk.f32.gmra.mxu0 %vm373_vm1, %v2129_v33  ;;  %2151 = vmatmul.mubr.msk.f32.gmra.mxu1 %vm373_vm1, %v2143_v34 }
  0xf9   : > { %v2591_v35 = vpop.f32.mrf.mxu0  ;;  %v2593_v36 = vpop.f32.mrf.mxu1 }
  0xfb   : > { %v2595_v37 = vpop.f32.mrf.mxu0  ;;  %v2597_v38 = vpop.f32.mrf.mxu1 }
  0xfc   : > { %v498_v39 = vmul.f32 %v2595_v37, %v2591_v35  ;;  %v690_v40 = vmul.f32 %v2597_v38, %v2593_v36  ;;  %v508_v49 = vmul.f32 %v2595_v37, %v2595_v37  ;;  %v700_v50 = vmul.f32 %v2597_v38, %v2597_v38 }
  0xfd   : > { %v2603_v41 = vpop.f32.mrf.mxu0  ;;  %v2605_v42 = vpop.f32.mrf.mxu1 }
  0xff   : > { %v2607_v43 = vpop.f32.mrf.mxu0  ;;  %v2609_v44 = vpop.f32.mrf.mxu1 }
 0x100   : > { %v499_v45 = vmul.f32 %v2607_v43, %v2603_v41  ;;  %v691_v46 = vmul.f32 %v2609_v44, %v2605_v42  ;;  %v509_v63 = vmul.f32 %v2607_v43, %v2607_v43  ;;  %v701_v0 = vmul.f32 %v2609_v44, %v2609_v44 }
 0x101   : > { %v2615_v47 = vpop.f32.mrf.mxu0  ;;  %v2617_v48 = vpop.f32.mrf.mxu1 }
 0x103   : > { %v2623_v51 = vpop.f32.mrf.mxu0  ;;  %v2625_v52 = vpop.f32.mrf.mxu1 }
 0x104   : > { %v500_v53 = vmul.f32 %v2623_v51, %v2615_v47  ;;  %v510_v54 = vmul.f32 %v2623_v51, %v2623_v51  ;;  %v692_v55 = vmul.f32 %v2625_v52, %v2617_v48  ;;  %v702_v56 = vmul.f32 %v2625_v52, %v2625_v52 }
 0x105   : > { %v2635_v57 = vpop.f32.mrf.mxu0  ;;  %v2637_v58 = vpop.f32.mrf.mxu1 }
 0x106   : > { %v502_v59 = vadd.f32 %v500_v53, %v498_v39  ;;  %v512_v60 = vadd.f32 %v510_v54, %v508_v49  ;;  %v694_v61 = vadd.f32 %v692_v55, %v690_v40  ;;  %v704_v62 = vadd.f32 %v702_v56, %v700_v50 }
 0x107   : > { %v2643_v1 = vpop.f32.mrf.mxu0  ;;  %v2645_v2 = vpop.f32.mrf.mxu1 }
 0x108   : > { %v501_v3 = vmul.f32 %v2643_v1, %v2635_v57  ;;  %v511_v4 = vmul.f32 %v2643_v1, %v2643_v1  ;;  %v693_v5 = vmul.f32 %v2645_v2, %v2637_v58  ;;  %v703_v6 = vmul.f32 %v2645_v2, %v2645_v2 }
 0x109   : > { %v2655_v7 = vpop.f32.mrf.mxu0  ;;  %v2657_v8 = vpop.f32.mrf.mxu1 }
 0x10a   : > { %v503_v9 = vadd.f32 %v501_v3, %v499_v45  ;;  %v513_v10 = vadd.f32 %v511_v4, %v509_v63  ;;  %v695_v11 = vadd.f32 %v693_v5, %v691_v46  ;;  %v705_v12 = vadd.f32 %v703_v6, %v701_v0 }
 0x10b   : > { %v2659_v13 = vpop.f32.mrf.mxu0  ;;  %v2661_v14 = vpop.f32.mrf.mxu1  ;;  %v2724_v5 = vmul.f32 0.2, %v2591_v35 }
 0x10c   : > { %v504_v15 = vmul.f32 %v2659_v13, %v2655_v7  ;;  %v514_v16 = vmul.f32 %v2659_v13, %v2659_v13  ;;  %v696_v17 = vmul.f32 %v2661_v14, %v2657_v8  ;;  %v706_v18 = vmul.f32 %v2661_v14, %v2661_v14 }
 0x10d   : > { %v2671_v19 = vpop.f32.mrf.mxu0  ;;  %v2673_v20 = vpop.f32.mrf.mxu1 }
 0x10e   : > { %v2675_v21 = vadd.f32 %v504_v15, %v502_v59  ;;  %v516_v22 = vadd.f32 %v514_v16, %v512_v60  ;;  %v2677_v23 = vadd.f32 %v696_v17, %v694_v61  ;;  %v708_v24 = vadd.f32 %v706_v18, %v704_v62 }
 0x10f   : > { %v2679_v25 = vpop.f32.mrf.mxu0  ;;  %v2681_v26 = vpop.f32.mrf.mxu1  ;;  %v2741_v16 = vmul.f32 0.2, %v2605_v42  ;;  %v542_v17 = vmul.f32 0.2, %v2615_v47  ;;  %v2745_v18 = vmul.f32 0.2, %v2617_v48 }
 0x110   : > { %v520_v27 = vadd.f32 1e-06, %v516_v22  ;;  %v712_v28 = vadd.f32 1e-06, %v708_v24  ;;  %v505_v29 = vmul.f32 %v2679_v25, %v2671_v19  ;;  %v515_v30 = vmul.f32 %v2679_v25, %v2679_v25 }
 0x111   : > { %v697_v31 = vmul.f32 %v2681_v26, %v2673_v20  ;;  %v707_v32 = vmul.f32 %v2681_v26, %v2681_v26  ;;  %v2691_v33 = vpop.f32.mrf.mxu0  ;;  %v2693_v34 = vpop.f32.mrf.mxu1  ;;  %vm518_vm2 = vcmp.ge.f32.partialorder %v2675_v21, 0.0  ;;  %vm710_vm3 = vcmp.ge.f32.partialorder %v2677_v23, 0.0 }
 0x112   : > { %3431 = vst [vmem:[#allocation4_spill] sm:$0xff] %v2691_v33  ;;  %3432 = vst [vmem:[#allocation5_spill] sm:$0xff] %v2693_v34  ;;  %2187 = vrcp.f32 %v520_v27  ;;  %v2695_v39 = vadd.f32 %v505_v29, %v503_v9  ;;  %v517_v40 = vadd.f32 %v515_v30, %v513_v10  ;;  %v2731_v10 = vmul.f32 0.2, %v2593_v36 }
 0x113   : > { %2189 = vrcp.f32 %v712_v28  ;;  %v2697_v45 = vadd.f32 %v697_v31, %v695_v11  ;;  %v2699_v46 = vpop.f32.mrf.mxu0  ;;  %v2701_v49 = vpop.f32.mrf.mxu1  ;;  %v709_v50 = vadd.f32 %v707_v32, %v705_v12  ;;  %v2734_v11 = vmul.f32 0.2, %v2603_v41 }
 0x114   : > { %3433 = vst [vmem:[#allocation6_spill] sm:$0xff] %v2699_v46  ;;  %v882_v53 = vmul.f32 %v2699_v46, %v2691_v33  ;;  %v1074_v54 = vmul.f32 %v2701_v49, %v2693_v34  ;;  %v521_v55 = vadd.f32 1e-06, %v517_v40  ;;  %v2752_v27 = vmul.f32 0.2, %v2635_v57 }
 0x115   : > { %v2707_v56 = vpop.f32.mrf.mxu0  ;;  %v2709_v59 = vpop.f32.mrf.mxu1  ;;  %v713_v60 = vadd.f32 1e-06, %v709_v50  ;;  %v2755_v28 = vmul.f32 0.2, %v2637_v58  ;;  %v544_v32 = vmul.f32 0.2, %v2655_v7 }
 0x116   : > { %3434 = vst [vmem:[#allocation7_spill] sm:$0xff] %v2707_v56  ;;  %3435 = vst [vmem:[#allocation8_spill] sm:$0xff] %v2709_v59  ;;  %2191 = vrcp.f32 %v521_v55  ;;  %v736_v40 = vmul.f32 0.2, %v2657_v8  ;;  %v2764_v50 = vmul.f32 0.2, %v2671_v19 }
 0x117   : > { %v2711_v61 = vpop.f32.mrf.mxu0  ;;  %v2713_v62 = vpop.f32.mrf.mxu1  ;;  %2193 = vrcp.f32 %v713_v60  ;;  %vm519_vm4 = vcmp.ge.f32.partialorder %v2695_v39, 0.0  ;;  %vm711_vm5 = vcmp.ge.f32.partialorder %v2697_v45, 0.0 }
 0x118   : > { %v883_v63 = vmul.f32 %v2711_v61, %v2707_v56  ;;  %v1075_v0 = vmul.f32 %v2713_v62, %v2709_v59 }
 0x119   : > { %v2719_v3 = vpop.f32.mrf.mxu0  ;;  %v2721_v4 = vpop.f32.mrf.mxu1 }
 0x11a   : > { %3436 = vst [vmem:[#allocation9_spill] sm:$0xff] %v2719_v3  ;;  %3437 = vst [vmem:[#allocation10_spill] sm:$0xff] %v2721_v4 }
 0x11b   : > { %v2726_v6 = vpop.f32.mrf.mxu0  ;;  %v2728_v9 = vpop.f32.mrf.mxu1 }
 0x11c   : > { %v884_v12 = vmul.f32 %v2726_v6, %v2719_v3  ;;  %v1076_v15 = vmul.f32 %v2728_v9, %v2721_v4 }
 0x11d   : > { %v2747_v22 = vpop.f32.mrf.mxu0  ;;  %v2749_v24 = vpop.f32.mrf.mxu1 }
 0x11e   : > { %3438 = vst [vmem:[#allocation11_spill] sm:$0xff] %v2747_v22  ;;  %3439 = vst [vmem:[#allocation12_spill] sm:$0xff] %v2749_v24  ;;  %v2757_v29 = vadd.f32 %v884_v12, %v882_v53  ;;  %v2759_v30 = vadd.f32 %v1076_v15, %v1074_v54  ;;  %v2772_v53 = vmul.f32 0.2, %v2673_v20 }
 0x11f   : > { %v2188_v31 = vpop.eup %2187  ;;  %v2766_v55 = vpop.f32.mrf.mxu0 }
 0x120   : > { %3440 = vst [vmem:[#allocation13_spill] sm:$0xff] %v2757_v29  ;;  %3441 = vst [vmem:[#allocation14_spill] sm:$0xff] %v2759_v30  ;;  %v2768_v60 = vpop.f32.mrf.mxu1  ;;  %v2190_v4 = vpop.eup %2189  ;;  %v524_v3 = vmul.f32 %v2188_v31, %v2675_v21  ;;  %v885_v54 = vmul.f32 %v2766_v55, %v2747_v22  ;;  %v2783_v30 = vmul.f32 %v2699_v46, %v2699_v46 }
 0x121   : > { %v1077_v12 = vmul.f32 %v2768_v60, %v2749_v24  ;;  %v716_v15 = vmul.f32 %v2190_v4, %v2677_v23  ;;  %v2785_v31 = vpop.f32.mrf.mxu0 }
 0x122   : > { %v2787_v59 = vpop.f32.mrf.mxu1  ;;  %v526_v56 = vsel %vm518_vm2, 0.0, %v524_v3  ;;  %v2790_v22 = vadd.f32 %v885_v54, %v883_v63 }
 0x123   : > { %3442 = vst [vmem:[#allocation15_spill] sm:$0xff] %v2787_v59  ;;  %v2792_v24 = vadd.f32 %v1077_v12, %v1075_v0  ;;  %v528_v21 = vmul.f32 %v526_v56, %v2595_v37  ;;  %v530_v29 = vmul.f32 %v526_v56, %v2623_v51  ;;  %v532_v23 = vmul.f32 %v526_v56, %v2659_v13  ;;  %v2797_v46 = vpop.f32.mrf.mxu0  ;;  %v2192_v33 = vpop.eup %2191 }
 0x124   : > { %v718_v4 = vsel %vm710_vm3, 0.0, %v716_v15  ;;  %v2799_v34 = vpop.f32.mrf.mxu1  ;;  %v2194_v0 = vpop.eup %2193  ;;  %v525_v56 = vmul.f32 %v2192_v33, %v2695_v39  ;;  %v898_v39 = vmul.f32 %v2797_v46, %v2797_v46 }
 0x125   : > { %3443 = vst [vmem:[#allocation16_spill] sm:$0xff] %v2792_v24  ;;  %v720_v3 = vmul.f32 %v718_v4, %v2597_v38  ;;  %v722_v59 = vmul.f32 %v718_v4, %v2625_v52  ;;  %v724_v63 = vmul.f32 %v718_v4, %v2661_v14  ;;  %v534_v37 = vsub.f32 %v2591_v35, %v528_v21  ;;  %v2809_v54 = vpop.f32.mrf.mxu0 }
 0x126   : > { %v536_v51 = vsub.f32 %v2615_v47, %v530_v29  ;;  %v538_v13 = vsub.f32 %v2655_v7, %v532_v23  ;;  %v2811_v12 = vpop.f32.mrf.mxu1  ;;  %v717_v15 = vmul.f32 %v2194_v0, %v2697_v45  ;;  %v1084_v47 = vmul.f32 %v2701_v49, %v2701_v49 }
 0x127   : > { %3444 = vst [vmem:[#allocation17_spill] sm:$0xff] %v2811_v12  ;;  %v726_v38 = vsub.f32 %v2593_v36, %v720_v3  ;;  %v728_v52 = vsub.f32 %v2617_v48, %v722_v59  ;;  %v730_v14 = vsub.f32 %v2657_v8, %v724_v63  ;;  %v546_v4 = vmul.f32 0.8, %v534_v37  ;;  %v2819_v7 = vpop.f32.mrf.mxu0 }
 0x128   : > { %v548_v35 = vmul.f32 0.8, %v536_v51  ;;  %v550_v21 = vmul.f32 0.8, %v538_v13  ;;  %v2821_v33 = vpop.f32.mrf.mxu1  ;;  %v894_v36 = vmul.f32 %v2726_v6, %v2726_v6  ;;  %v527_v3 = vsel %vm519_vm4, 0.0, %v525_v56 }
 0x129   : > { %v738_v29 = vmul.f32 0.8, %v726_v38  ;;  %v740_v23 = vmul.f32 0.8, %v728_v52  ;;  %v742_v24 = vmul.f32 0.8, %v730_v14  ;;  %v552_v48 = vadd.f32 %v546_v4, %v2724_v5  ;;  %v2828_v63 = vpop.f32.mrf.mxu0 }
 0x12a   : > { %v554_v8 = vadd.f32 %v548_v35, %v542_v17  ;;  %v556_v59 = vadd.f32 %v550_v21, %v544_v32  ;;  %3445 = vst [vmem:[#allocation18_spill] sm:$0xff] %v2828_v63  ;;  %v2830_v0 = vpop.f32.mrf.mxu1  ;;  %v529_v38 = vmul.f32 %v527_v3, %v2607_v43  ;;  %v531_v52 = vmul.f32 %v527_v3, %v2643_v1 }
 0x12b   : > { %3446 = vst [vmem:[#allocation19_spill] sm:$0xff] %v2830_v0  ;;  %v744_v37 = vadd.f32 %v738_v29, %v2731_v10  ;;  %v746_v51 = vadd.f32 %v740_v23, %v2745_v18  ;;  %v748_v13 = vadd.f32 %v742_v24, %v736_v40  ;;  %v533_v5 = vmul.f32 %v527_v3, %v2679_v25  ;;  %v2841_v32 = vpop.f32.mrf.mxu0 }
 0x12c   : > { %v719_v17 = vsel %vm711_vm5, 0.0, %v717_v15  ;;  %3447 = vst [vmem:[#allocation20_spill] sm:$0xff] %v2841_v32  ;;  %v2843_v56 = vpop.f32.mrf.mxu1  ;;  %v535_v43 = vsub.f32 %v2603_v41, %v529_v38  ;;  %v537_v1 = vsub.f32 %v2635_v57, %v531_v52  ;;  %v896_v21 = vadd.f32 %v894_v36, %v2783_v30 }
 0x12d   : > { %3448 = vst [vmem:[#allocation21_spill] sm:$0xff] %v2843_v56  ;;  %v2845_v10 = vadd.f32 %v744_v37, %v552_v48  ;;  %v2847_v18 = vadd.f32 %v746_v51, %v554_v8  ;;  %v2849_v24 = vadd.f32 %v748_v13, %v556_v59  ;;  %v539_v25 = vsub.f32 %v2671_v19, %v533_v5  ;;  %v2856_v14 = vpop.f32.mrf.mxu0 }
 0x12e   : > { %v721_v45 = vmul.f32 %v719_v17, %v2609_v44  ;;  %v723_v40 = vmul.f32 %v719_v17, %v2645_v2  ;;  %3449 = vst [vmem:[#allocation22_spill] sm:$0xff] %v2856_v14  ;;  %v2858_v15 = vpop.f32.mrf.mxu1  ;;  %v547_v4 = vmul.f32 0.8, %v535_v43  ;;  %v725_v35 = vmul.f32 %v719_v17, %v2681_v26 }
 0x12f   : > { %3450 = vst [vmem:[#allocation23_spill] sm:$0xff] %v2858_v15  ;;  %v1086_v41 = vmul.f32 %v2728_v9, %v2728_v9  ;;  %v549_v29 = vmul.f32 0.8, %v537_v1  ;;  %v551_v57 = vmul.f32 0.8, %v539_v25  ;;  %v2866_v23 = vpop.f32.mrf.mxu0  ;;  %v895_v26 = vmul.f32 %v2766_v55, %v2766_v55 }
 0x130   : > { %v727_v19 = vsub.f32 %v2605_v42, %v721_v45  ;;  %v729_v44 = vsub.f32 %v2637_v58, %v723_v40  ;;  %3451 = vst [vmem:[#allocation24_spill] sm:$0xff] %v2866_v23  ;;  %v2868_v2 = vpop.f32.mrf.mxu1  ;;  %v553_v48 = vadd.f32 %v547_v4, %v2734_v11  ;;  %v731_v8 = vsub.f32 %v2673_v20, %v725_v35 }
 0x131   : > { %3452 = vst [vmem:[#allocation25_spill] sm:$0xff] %v2868_v2  ;;  %v900_v30 = vadd.f32 %v898_v39, %v896_v21  ;;  %v555_v36 = vadd.f32 %v549_v29, %v2752_v27  ;;  %v557_v59 = vadd.f32 %v551_v57, %v2764_v50  ;;  %v2876_v37 = vpop.f32.mrf.mxu0  ;;  %v1088_v13 = vadd.f32 %v1086_v41, %v1084_v47 }
 0x132   : > { %v739_v3 = vmul.f32 0.8, %v727_v19  ;;  %v741_v42 = vmul.f32 0.8, %v729_v44  ;;  %3453 = vst [vmem:[#allocation26_spill] sm:$0xff] %v2876_v37  ;;  %v2878_v58 = vpop.f32.mrf.mxu1  ;;  %v1090_v20 = vmul.f32 %v2799_v34, %v2799_v34  ;;  %v893_v27 = vmul.f32 %v2711_v61, %v2711_v61  ;;  %v3462_v44 = vld [vmem:[#allocation15_spill] sm:$0xff] }
 0x133   : > { %3454 = vst [vmem:[#allocation27_spill] sm:$0xff] %v2878_v58  ;;  %v743_v51 = vmul.f32 0.8, %v731_v8  ;;  %v904_v38 = vadd.f32 1e-06, %v900_v30  ;;  %v1087_v50 = vmul.f32 %v2768_v60, %v2768_v60  ;;  %v2888_v5 = vpop.f32.mrf.mxu0  ;;  %v1085_v39 = vmul.f32 %v2713_v62, %v2713_v62 }
 0x134   : > { %v745_v11 = vadd.f32 %v739_v3, %v2741_v16  ;;  %v747_v52 = vadd.f32 %v741_v42, %v2755_v28  ;;  %3455 = vst [vmem:[#allocation28_spill] sm:$0xff] %v2888_v5  ;;  %v2890_v17 = vpop.f32.mrf.mxu1  ;;  %v1092_v43 = vadd.f32 %v1090_v20, %v1088_v13  ;;  %v897_v1 = vadd.f32 %v895_v26, %v893_v27  ;;  %v3464_v3 = vld [vmem:[#allocation5_spill] sm:$0xff]  ;;  %v3467_v27 = vld [vmem:[#allocation7_spill] sm:$0xff] }
 0x135   : > { %3456 = vst [vmem:[#allocation29_spill] sm:$0xff] %v2890_v17  ;;  %v749_v47 = vadd.f32 %v743_v51, %v2772_v53  ;;  %2195 = vrcp.f32 %v904_v38  ;;  %v899_v25 = vmul.f32 %v2819_v7, %v2819_v7  ;;  %v2901_v45 = vpop.f32.mrf.mxu0  ;;  %v1089_v35 = vadd.f32 %v1087_v50, %v1085_v39  ;;  %v3466_v13 = vld [vmem:[#allocation13_spill] sm:$0xff] }
 0x136   : > { %v2895_v16 = vadd.f32 %v745_v11, %v553_v48  ;;  %v2897_v28 = vadd.f32 %v747_v52, %v555_v36  ;;  %3459 = vst [vmem:[#allocation32_spill] sm:$0xff] %v2901_v45  ;;  %v2903_v40 = vpop.f32.mrf.mxu1  ;;  %v1096_v53 = vadd.f32 1e-06, %v1092_v43  ;;  %v888_v21 = vmul.f32 %v2797_v46, %v2785_v31  ;;  %v3463_v36 = vld [vmem:[#allocation4_spill] sm:$0xff]  ;;  %v3470_v43 = vld [vmem:[#allocation9_spill] sm:$0xff] }
 0x137   : > { %3460 = vst [vmem:[#allocation33_spill] sm:$0xff] %v2903_v40  ;;  %v2905_v4 = vadd.f32 %v749_v47, %v557_v59  ;;  %v901_v41 = vadd.f32 %v899_v25, %v897_v1  ;;  %v1091_v29 = vmul.f32 %v2821_v33, %v2821_v33  ;;  %v2911_v57 = vpop.f32.mrf.mxu0  ;;  %v1080_v48 = vmul.f32 %v2799_v34, %v3462_v44  ;;  %v3468_v47 = vld [vmem:[#allocation8_spill] sm:$0xff]  ;;  %v3471_v25 = vld [vmem:[#allocation14_spill] sm:$0xff] }
 0x138   : > { %3457 = vst [vmem:[#allocation30_spill] sm:$0xff] %v2895_v16  ;;  %3458 = vst [vmem:[#allocation31_spill] sm:$0xff] %v2897_v28  ;;  %v2913_v19 = vpop.f32.mrf.mxu1  ;;  %2197 = vrcp.f32 %v1096_v53  ;;  %v2920_v59 = vmul.f32 0.2, %v3463_v36  ;;  %v2923_v42 = vmul.f32 0.2, %v3464_v3  ;;  %v890_v38 = vadd.f32 %v888_v21, %v3466_v13 }
 0x139   : > { %3461 = vst [vmem:[#allocation34_spill] sm:$0xff] %v2905_v4  ;;  %v905_v8 = vadd.f32 1e-06, %v901_v41  ;;  %v1093_v26 = vadd.f32 %v1091_v29, %v1089_v35  ;;  %v2917_v30 = vpop.f32.mrf.mxu0  ;;  %v889_v20 = vmul.f32 %v2819_v7, %v2809_v54  ;;  %v2933_v50 = vmul.f32 0.2, %v3467_v27  ;;  %v3472_v35 = vld [vmem:[#allocation10_spill] sm:$0xff] }
 0x13a   : > { %v2925_v51 = vpop.f32.mrf.mxu1  ;;  %v2936_v39 = vmul.f32 0.2, %v3468_v47  ;;  %v2939_v1 = vmul.f32 0.2, %v3470_v43  ;;  %v1082_v53 = vadd.f32 %v1080_v48, %v3471_v25  ;;  %v2943_v21 = vmul.f32 0.2, %v3472_v35 }
 0x13b   : > { %3465 = vst [vmem:[#allocation15_spill] sm:$0xff] %v2925_v51  ;;  %2199 = vrcp.f32 %v905_v8  ;;  %v1097_v11 = vadd.f32 1e-06, %v1093_v26  ;;  %v2930_v52 = vpop.f32.mrf.mxu0  ;;  %v3473_v41 = vld [vmem:[#allocation11_spill] sm:$0xff]  ;;  %v1081_v8 = vmul.f32 %v2821_v33, %v2811_v12  ;;  %v3475_v26 = vld [vmem:[#allocation12_spill] sm:$0xff]  ;;  %vm902_vm6 = vcmp.ge.f32.partialorder %v890_v38, 0.0 }
 0x13c   : > { %3469 = vst [vmem:[#allocation4_spill] sm:$0xff] %v2936_v39  ;;  %v2946_v29 = vmul.f32 0.2, %v3473_v41  ;;  %v2951_v13 = vmul.f32 0.2, %v3475_v26  ;;  %v2959_v48 = vpop.f32.mrf.mxu1  ;;  %v2965_v14 = vadd.f32 %v889_v20, %v2790_v22  ;;  %vm1094_vm7 = vcmp.ge.f32.partialorder %v1082_v53, 0.0 }
 0x13d   : > { %2201 = vrcp.f32 %v1097_v11  ;;  %v2954_v15 = vmul.f32 0.2, %v2785_v31  ;;  %v2957_v40 = vmul.f32 0.2, %v3462_v44  ;;  %3477 = vst [vmem:[#allocation7_spill] sm:$0xff] %v2959_v48  ;;  %v1278_v11 = vmul.f32 %v2888_v5, %v2888_v5  ;;  %v2969_v45 = vpop.f32.mrf.mxu0  ;;  %v3481_v28 = vld [vmem:[#allocation16_spill] sm:$0xff] }
 0x13e   : > { %3474 = vst [vmem:[#allocation5_spill] sm:$0xff] %v2946_v29  ;;  %3476 = vst [vmem:[#allocation13_spill] sm:$0xff] %v2951_v13  ;;  %v2962_v25 = vmul.f32 0.2, %v2809_v54  ;;  %v2972_v13 = vmul.f32 0.2, %v2811_v12  ;;  %v1268_v39 = vmul.f32 %v2888_v5, %v2876_v37  ;;  %v1470_v4 = vmul.f32 %v2890_v17, %v2890_v17 }
 0x13f   : > { %3479 = vst [vmem:[#allocation9_spill] sm:$0xff] %v2969_v45  ;;  %v2979_v16 = vadd.f32 %v1081_v8, %v3481_v28  ;;  %v1266_v22 = vmul.f32 %v2841_v32, %v2828_v63  ;;  %v1276_v20 = vmul.f32 %v2841_v32, %v2841_v32  ;;  %v1458_v45 = vmul.f32 %v2843_v56, %v2830_v0  ;;  %v2993_v8 = vpop.f32.mrf.mxu1 }
 0x140   : > { %3478 = vst [vmem:[#allocation8_spill] sm:$0xff] %v2962_v25  ;;  %3480 = vst [vmem:[#allocation14_spill] sm:$0xff] %v2972_v13  ;;  %v1468_v37 = vmul.f32 %v2843_v56, %v2843_v56  ;;  %v1277_v5 = vmul.f32 %v2866_v23, %v2866_v23  ;;  %v1460_v28 = vmul.f32 %v2890_v17, %v2878_v58  ;;  %vm903_vm8 = vcmp.ge.f32.partialorder %v2965_v14, 0.0  ;;  %v3004_v56 = vpop.f32.mrf.mxu0 }
 0x141   : > { %3482 = vst [vmem:[#allocation10_spill] sm:$0xff] %v2993_v8  ;;  %v2998_v63 = vmul.f32 %v2868_v2, %v2868_v2  ;;  %v1280_v32 = vadd.f32 %v1278_v11, %v1276_v20  ;;  %v1474_v0 = vmul.f32 %v2959_v48, %v2959_v48  ;;  %v3007_v17 = vadd.f32 %v1268_v39, %v1266_v22  ;;  %v3484_v2 = vld [vmem:[#allocation6_spill] sm:$0xff] }
 0x142   : > { %v2196_v51 = vpop.eup %2195  ;;  %v1472_v58 = vadd.f32 %v1470_v4, %v1468_v37  ;;  %v1279_v8 = vmul.f32 %v2911_v57, %v2911_v57  ;;  %vm1095_vm9 = vcmp.ge.f32.partialorder %v2979_v16, 0.0  ;;  %v3015_v48 = vadd.f32 %v1460_v28, %v1458_v45  ;;  %v3021_v4 = vpop.f32.mrf.mxu1 }
 0x143   : > { %v908_v13 = vmul.f32 %v2196_v51, %v890_v38  ;;  %3483 = vst [vmem:[#allocation11_spill] sm:$0xff] %v2998_v63  ;;  %v1282_v51 = vmul.f32 %v2930_v52, %v2930_v52  ;;  %v3019_v38 = vmul.f32 %v2913_v19, %v2913_v19 }
 0x144   : > { %v1476_v37 = vadd.f32 %v1474_v0, %v1472_v58  ;;  %v3029_v45 = vadd.f32 %v1279_v8, %v1277_v5 }
 0x145   : > { %v910_v23 = vsel %vm902_vm6, 0.0, %v908_v13  ;;  %v2198_v12 = vpop.eup %2197  ;;  %v1284_v25 = vadd.f32 %v1282_v51, %v1280_v32  ;;  %v3026_v32 = vpop.f32.mrf.mxu0  ;;  %v1272_v13 = vmul.f32 %v2930_v52, %v2917_v30 }
 0x146   : > { %v912_v63 = vmul.f32 %v910_v23, %v3484_v2  ;;  %v914_v11 = vmul.f32 %v910_v23, %v2726_v6  ;;  %v916_v20 = vmul.f32 %v910_v23, %v2797_v46  ;;  %v1100_v29 = vmul.f32 %v2198_v12, %v1082_v53  ;;  %3485 = vst [vmem:[#allocation12_spill] sm:$0xff] %v3026_v32  ;;  %v3037_v53 = vpop.f32.mrf.mxu1 }
 0x147   : > { %v1288_v46 = vadd.f32 1e-06, %v1284_v25  ;;  %v1480_v0 = vadd.f32 1e-06, %v1476_v37  ;;  %3486 = vst [vmem:[#allocation16_spill] sm:$0xff] %v3037_v53 }
 0x148   : > { %v918_v39 = vsub.f32 %v3463_v36, %v912_v63  ;;  %v920_v2 = vsub.f32 %v3470_v43, %v914_v11  ;;  %v922_v6 = vsub.f32 %v2785_v31, %v916_v20  ;;  %v2200_v12 = vpop.eup %2199  ;;  %v1102_v23 = vsel %vm1094_vm7, 0.0, %v1100_v29  ;;  %v3043_v11 = vpop.f32.mrf.mxu0 }
 0x149   : > { %v1104_v63 = vmul.f32 %v1102_v23, %v2701_v49  ;;  %v1106_v31 = vmul.f32 %v1102_v23, %v2728_v9  ;;  %v1108_v43 = vmul.f32 %v1102_v23, %v2799_v34  ;;  %v909_v25 = vmul.f32 %v2200_v12, %v2965_v14  ;;  %3487 = vst [vmem:[#allocation6_spill] sm:$0xff] %v3043_v11 }
 0x14a   : > { %v930_v58 = vmul.f32 0.8, %v918_v39  ;;  %v932_v22 = vmul.f32 0.8, %v920_v2  ;;  %v934_v28 = vmul.f32 0.8, %v922_v6  ;;  %v2202_v36 = vpop.eup %2201  ;;  %2203 = vrcp.f32 %v1288_v46  ;;  %v3055_v6 = vpop.f32.mrf.mxu1 }
 0x14b   : > { %v1110_v51 = vsub.f32 %v3464_v3, %v1104_v63  ;;  %v1112_v49 = vsub.f32 %v3472_v35, %v1106_v31  ;;  %v1114_v9 = vsub.f32 %v3462_v44, %v1108_v43  ;;  %v911_v34 = vsel %vm903_vm8, 0.0, %v909_v25  ;;  %3488 = vst [vmem:[#allocation35_spill] sm:$0xff] %v3055_v6  ;;  %v3491_v43 = vld [vmem:[#allocation8_spill] sm:$0xff] }
 0x14c   : > { %v936_v5 = vadd.f32 %v930_v58, %v2920_v59  ;;  %v938_v29 = vadd.f32 %v932_v22, %v2939_v1  ;;  %v940_v8 = vadd.f32 %v934_v28, %v2954_v15  ;;  %v1101_v20 = vmul.f32 %v2202_v36, %v2979_v16  ;;  %v3076_v22 = vpop.f32.mrf.mxu1 }
 0x14d   : > { %v1122_v15 = vmul.f32 0.8, %v1110_v51  ;;  %v1124_v39 = vmul.f32 0.8, %v1112_v49  ;;  %v1126_v3 = vmul.f32 0.8, %v1114_v9  ;;  %v913_v2 = vmul.f32 %v911_v34, %v2711_v61 }
 0x14e   : > { %v942_v37 = vadd.f32 %v936_v5, %v2845_v10  ;;  %v944_v59 = vadd.f32 %v938_v29, %v2847_v18  ;;  %v946_v1 = vadd.f32 %v940_v8, %v2849_v24  ;;  %v915_v35 = vmul.f32 %v911_v34, %v2766_v55  ;;  %v3061_v18 = vpop.f32.mrf.mxu0  ;;  %v3492_v5 = vld [vmem:[#allocation17_spill] sm:$0xff]  ;;  %v3495_v9 = vld [vmem:[#allocation15_spill] sm:$0xff] }
 0x14f   : > { %v1128_v14 = vadd.f32 %v1122_v15, %v2923_v42  ;;  %v917_v44 = vmul.f32 %v911_v34, %v2819_v7  ;;  %v1103_v10 = vsel %vm1095_vm9, 0.0, %v1101_v20  ;;  %2205 = vrcp.f32 %v1480_v0  ;;  %3489 = vst [vmem:[#allocation36_spill] sm:$0xff] %v3061_v18  ;;  %v3496_v34 = vld [vmem:[#allocation7_spill] sm:$0xff]  ;;  %v3498_v15 = vld [vmem:[#allocation4_spill] sm:$0xff] }
 0x150   : > { %v1130_v24 = vadd.f32 %v1124_v39, %v2943_v21  ;;  %v1132_v46 = vadd.f32 %v1126_v3, %v2957_v40  ;;  %v919_v61 = vsub.f32 %v3467_v27, %v913_v2  ;;  %v921_v55 = vsub.f32 %v3473_v41, %v915_v35  ;;  %v3499_v3 = vld [vmem:[#allocation13_spill] sm:$0xff] }
 0x151   : > { %v3067_v12 = vadd.f32 %v1128_v14, %v942_v37  ;;  %v923_v42 = vsub.f32 %v2809_v54, %v917_v44  ;;  %v1105_v7 = vmul.f32 %v1103_v10, %v2713_v62  ;;  %v1107_v16 = vmul.f32 %v1103_v10, %v2768_v60  ;;  %v3081_v54 = vpop.f32.mrf.mxu0  ;;  %v3490_v60 = vld [vmem:[#allocation5_spill] sm:$0xff]  ;;  %v3095_v37 = vpop.f32.mrf.mxu1  ;;  %v3500_v14 = vld [vmem:[#allocation11_spill] sm:$0xff] }
 0x152   : > { %v3072_v23 = vadd.f32 %v1130_v24, %v944_v59  ;;  %v3074_v0 = vadd.f32 %v1132_v46, %v946_v1  ;;  %v931_v58 = vmul.f32 0.8, %v919_v61  ;;  %v933_v21 = vmul.f32 0.8, %v921_v55  ;;  %v3501_v46 = vld [vmem:[#allocation14_spill] sm:$0xff] }
 0x153   : > { %v935_v40 = vmul.f32 0.8, %v923_v42  ;;  %v1109_v27 = vmul.f32 %v1103_v10, %v2821_v33  ;;  %v1111_v41 = vsub.f32 %v3468_v47, %v1105_v7  ;;  %v1113_v28 = vsub.f32 %v3475_v26, %v1107_v16  ;;  %v3493_v47 = vld [vmem:[#allocation30_spill] sm:$0xff]  ;;  %v3494_v26 = vld [vmem:[#allocation31_spill] sm:$0xff]  ;;  %v3100_v35 = vpop.f32.mrf.mxu0 }
 0x154   : > { %v937_v62 = vadd.f32 %v931_v58, %v2933_v50  ;;  %v939_v63 = vadd.f32 %v933_v21, %v3490_v60  ;;  %v1274_v36 = vadd.f32 %v1272_v13, %v3007_v17  ;;  %v1283_v31 = vmul.f32 %v3004_v56, %v3004_v56  ;;  %v3497_v13 = vld [vmem:[#allocation34_spill] sm:$0xff]  ;;  %v3111_v58 = vpop.f32.mrf.mxu1 }
 0x155   : > { %v941_v25 = vadd.f32 %v935_v40, %v3491_v43  ;;  %v1115_v29 = vsub.f32 %v3492_v5, %v1109_v27  ;;  %v1123_v33 = vmul.f32 0.8, %v1111_v41  ;;  %v1125_v8 = vmul.f32 0.8, %v1113_v28  ;;  %v3117_v41 = vpop.f32.mrf.mxu0 }
 0x156   : > { %v943_v51 = vadd.f32 %v937_v62, %v3493_v47  ;;  %v945_v49 = vadd.f32 %v939_v63, %v3494_v26  ;;  %v1464_v50 = vmul.f32 %v3496_v34, %v3495_v9  ;;  %v1285_v20 = vadd.f32 %v1283_v31, %v3029_v45  ;;  %v3504_v62 = vld [vmem:[#allocation18_spill] sm:$0xff]  ;;  %v3120_v43 = vpop.f32.mrf.mxu1 }
 0x157   : > { %v2204_v17 = vpop.eup %2203  ;;  %v947_v59 = vadd.f32 %v941_v25, %v3497_v13  ;;  %v1127_v1 = vmul.f32 0.8, %v1115_v29  ;;  %v1129_v39 = vadd.f32 %v1123_v33, %v3498_v15  ;;  %v1131_v2 = vadd.f32 %v1125_v8, %v3499_v3  ;;  %v3505_v25 = vld [vmem:[#allocation32_spill] sm:$0xff]  ;;  %v3125_v33 = vpop.f32.mrf.mxu0  ;;  %v3506_v8 = vld [vmem:[#allocation22_spill] sm:$0xff]  ;;  %v3511_v3 = vld [vmem:[#allocation19_spill] sm:$0xff] }
 0x158   : > { %v1473_v44 = vadd.f32 %v3019_v38, %v3500_v14  ;;  %v1292_v10 = vmul.f32 %v2204_v17, %v1274_v36  ;;  %v1289_v24 = vadd.f32 1e-06, %v1285_v20  ;;  %v1475_v45 = vmul.f32 %v3021_v4, %v3021_v4  ;;  %v3503_v38 = vld [vmem:[#allocation20_spill] sm:$0xff]  ;;  %v3509_v20 = vld [vmem:[#allocation9_spill] sm:$0xff]  ;;  %v3135_v13 = vpop.f32.mrf.mxu1 }
 0x159   : > { %v1133_v61 = vadd.f32 %v1127_v1, %v3501_v46  ;;  %v3107_v55 = vadd.f32 %v1129_v39, %v943_v51  ;;  %v3109_v42 = vadd.f32 %v1131_v2, %v945_v49  ;;  %vm1286_vm10 = vcmp.ge.f32.partialorder %v1274_v36, 0.0  ;;  %v3508_v49 = vld [vmem:[#allocation21_spill] sm:$0xff]  ;;  %v3141_v14 = vpop.f32.mrf.mxu0 }
 0x15a   : > { %v1294_v7 = vsel %vm1286_vm10, 0.0, %v1292_v10  ;;  %2207 = vrcp.f32 %v1289_v24  ;;  %v1477_v16 = vadd.f32 %v1475_v45, %v1473_v44  ;;  %v1466_v27 = vadd.f32 %v1464_v50, %v3015_v48  ;;  %v3507_v48 = vld [vmem:[#allocation24_spill] sm:$0xff]  ;;  %v3510_v1 = vld [vmem:[#allocation33_spill] sm:$0xff]  ;;  %v3512_v10 = vld [vmem:[#allocation23_spill] sm:$0xff] }
 0x15b   : > { %v3113_v21 = vadd.f32 %v1133_v61, %v947_v59  ;;  %v1296_v40 = vmul.f32 %v1294_v7, %v3503_v38  ;;  %v1308_v36 = vmul.f32 0.2, %v3504_v62  ;;  %v1269_v5 = vmul.f32 %v2911_v57, %v3505_v25  ;;  %v3513_v24 = vld [vmem:[#allocation25_spill] sm:$0xff] }
 0x15c   : > { %v2206_v28 = vpop.eup %2205  ;;  %v1481_v31 = vadd.f32 1e-06, %v1477_v16  ;;  %vm1478_vm11 = vcmp.ge.f32.partialorder %v1466_v27, 0.0  ;;  %v1267_v47 = vmul.f32 %v3507_v48, %v3506_v8  ;;  %v1273_v17 = vmul.f32 %v3004_v56, %v3509_v20  ;;  %v3514_v16 = vld [vmem:[#allocation10_spill] sm:$0xff] }
 0x15d   : > { %3502 = vst [vmem:[#allocation5_spill] sm:$0xff] %v3113_v21  ;;  %v1302_v60 = vsub.f32 %v3504_v62, %v1296_v40  ;;  %v1484_v63 = vmul.f32 %v2206_v28, %v1466_v27  ;;  %v1461_v15 = vmul.f32 %v2913_v19, %v3510_v1  ;;  %v1500_v44 = vmul.f32 0.2, %v3511_v3  ;;  %v3515_v40 = vld [vmem:[#allocation28_spill] sm:$0xff]  ;;  %v3149_v28 = vpop.f32.mrf.mxu1 }
 0x15e   : > { %2209 = vrcp.f32 %v1481_v31  ;;  %v1271_v59 = vadd.f32 %v1269_v5, %v1267_v47  ;;  %v1459_v45 = vmul.f32 %v3513_v24, %v3512_v10  ;;  %v1465_v38 = vmul.f32 %v3021_v4, %v3514_v16  ;;  %v3152_v31 = vpop.f32.mrf.mxu0 }
 0x15f   : > { %v1314_v29 = vmul.f32 0.8, %v1302_v60  ;;  %v3129_v51 = vsel %vm1478_vm11, 0.0, %v1484_v63  ;;  %v1298_v27 = vmul.f32 %v1294_v7, %v3515_v40  ;;  %v1300_v60 = vmul.f32 %v1294_v7, %v2930_v52 }
 0x160   : > { %v1488_v50 = vmul.f32 %v3129_v51, %v3508_v49  ;;  %v1275_v61 = vadd.f32 %v1273_v17, %v1271_v59  ;;  %v3156_v5 = vmul.f32 0.2, %v3512_v10  ;;  %v3518_v49 = vld [vmem:[#allocation27_spill] sm:$0xff]  ;;  %v3165_v52 = vmul.f32 0.2, %v3505_v25 }
 0x161   : > { %v1320_v26 = vadd.f32 %v1314_v29, %v1308_v36  ;;  %v1309_v36 = vmul.f32 0.2, %v3506_v8  ;;  %v3517_v29 = vld [vmem:[#allocation26_spill] sm:$0xff]  ;;  %v3184_v40 = vmul.f32 0.2, %v3509_v20 }
 0x162   : > { %v1494_v2 = vsub.f32 %v3511_v3, %v1488_v50  ;;  %3516 = vst [vmem:[#allocation8_spill] sm:$0xff] %v3156_v5  ;;  %v1310_v47 = vmul.f32 0.2, %v3517_v29  ;;  %v3160_v50 = vmul.f32 0.2, %v3518_v49  ;;  %vm1287_vm12 = vcmp.ge.f32.partialorder %v1275_v61, 0.0 }
 0x163   : > { %v1326_v39 = vadd.f32 %v1320_v26, %v3067_v12  ;;  %v1463_v12 = vadd.f32 %v1461_v15, %v1459_v45  ;;  %v1304_v7 = vsub.f32 %v3517_v29, %v1298_v27  ;;  %v1662_v3 = vmul.f32 %v3117_v41, %v3117_v41 }
 0x164   : > { %v1506_v46 = vmul.f32 0.8, %v1494_v2  ;;  %v3170_v2 = vpop.f32.mrf.mxu1  ;;  %v1312_v45 = vmul.f32 0.2, %v2917_v30  ;;  %v3187_v27 = vmul.f32 0.2, %v3514_v16  ;;  %v3200_v29 = vmul.f32 %v3043_v11, %v3026_v32 }
 0x165   : > { %v1467_v59 = vadd.f32 %v1465_v38, %v1463_v12  ;;  %v3181_v38 = vmul.f32 0.2, %v3495_v9 }
 0x166   : > { %v1512_v63 = vadd.f32 %v1506_v46, %v1500_v44  ;;  %v3173_v44 = vmul.f32 0.2, %v3510_v1  ;;  %3521 = vst [vmem:[#allocation31_spill] sm:$0xff] %v3187_v27  ;;  %v3204_v27 = vpop.f32.mrf.mxu1 }
 0x167   : > { %v2208_v62 = vpop.eup %2207  ;;  %vm1479_vm13 = vcmp.ge.f32.partialorder %v1467_v59, 0.0 }
 0x168   : > { %v1293_v26 = vmul.f32 %v2208_v62, %v1275_v61  ;;  %v3162_v17 = vadd.f32 %v1512_v63, %v1326_v39  ;;  %3520 = vst [vmem:[#allocation30_spill] sm:$0xff] %v3173_v44  ;;  %v1306_v39 = vsub.f32 %v2917_v30, %v1300_v60  ;;  %v3178_v61 = vpop.f32.mrf.mxu0  ;;  %v1660_v62 = vmul.f32 %v3043_v11, %v3043_v11  ;;  %v3232_v21 = vpop.f32.mrf.mxu1 }
 0x169   : > { %v3193_v30 = vmul.f32 0.2, %v3026_v32  ;;  %v1316_v63 = vmul.f32 0.8, %v1304_v7  ;;  %v3213_v7 = vmul.f32 0.2, %v3061_v18 }
 0x16a   : > { %3519 = vst [vmem:[#allocation17_spill] sm:$0xff] %v3162_v17  ;;  %v1295_v15 = vsel %vm1287_vm12, 0.0, %v1293_v26  ;;  %v1664_v26 = vadd.f32 %v1662_v3, %v1660_v62  ;;  %v1666_v17 = vmul.f32 %v3178_v61, %v3178_v61  ;;  %v3216_v32 = vmul.f32 0.2, %v3076_v22 }
 0x16b   : > { %v1297_v46 = vmul.f32 %v1295_v15, %v3507_v48  ;;  %3522 = vst [vmem:[#allocation15_spill] sm:$0xff] %v3193_v30  ;;  %v3196_v48 = vmul.f32 0.2, %v3037_v53  ;;  %v2210_v60 = vpop.eup %2209  ;;  %v3208_v30 = vmul.f32 %v3055_v6, %v3037_v53  ;;  %3524 = vst [vmem:[#allocation34_spill] sm:$0xff] %v3213_v7  ;;  %v3220_v3 = vmul.f32 %v3081_v54, %v3061_v18  ;;  %v3526_v7 = vld [vmem:[#allocation29_spill] sm:$0xff] }
 0x16c   : > { %3525 = vst [vmem:[#allocation4_spill] sm:$0xff] %v3216_v32  ;;  %v1668_v62 = vadd.f32 %v1666_v17, %v1664_v26  ;;  %v1485_v44 = vmul.f32 %v2210_v60, %v1467_v59  ;;  %v1661_v53 = vmul.f32 %v3081_v54, %v3081_v54  ;;  %v1322_v11 = vadd.f32 %v1316_v63, %v1310_v47 }
 0x16d   : > { %v1303_v12 = vsub.f32 %v3506_v8, %v1297_v46  ;;  %3523 = vst [vmem:[#allocation7_spill] sm:$0xff] %v3196_v48  ;;  %v1318_v8 = vmul.f32 0.8, %v1306_v39  ;;  %v1852_v48 = vmul.f32 %v3055_v6, %v3055_v6  ;;  %v3222_v39 = vpop.f32.mrf.mxu0  ;;  %v1854_v6 = vmul.f32 %v3120_v43, %v3120_v43 }
 0x16e   : > { %v1490_v5 = vmul.f32 %v3129_v51, %v3526_v7  ;;  %v1492_v32 = vmul.f32 %v3129_v51, %v3496_v34  ;;  %v1672_v18 = vadd.f32 1e-06, %v1668_v62  ;;  %v3239_v60 = vmul.f32 %v3095_v37, %v3076_v22 }
 0x16f   : > { %v1315_v46 = vmul.f32 0.8, %v1303_v12  ;;  %v1324_v17 = vadd.f32 %v1318_v8, %v1312_v45  ;;  %v1663_v47 = vmul.f32 %v3141_v14, %v3141_v14  ;;  %v1299_v63 = vmul.f32 %v1295_v15, %v2911_v57  ;;  %v3247_v51 = vpop.f32.mrf.mxu0 }
 0x170   : > { %v1301_v26 = vmul.f32 %v1295_v15, %v3004_v56  ;;  %v1855_v34 = vmul.f32 %v3149_v28, %v3149_v28  ;;  %2211 = vrcp.f32 %v1672_v18  ;;  %v1853_v45 = vmul.f32 %v3095_v37, %v3095_v37  ;;  %v3260_v18 = vpop.f32.mrf.mxu1 }
 0x171   : > { %v1321_v12 = vadd.f32 %v1315_v46, %v1309_v36  ;;  %v1856_v8 = vadd.f32 %v1854_v6, %v1852_v48  ;;  %v1858_v46 = vmul.f32 %v3204_v27, %v3204_v27  ;;  %v1328_v7 = vadd.f32 %v1322_v11, %v3072_v23 }
 0x172   : > { %v1496_v57 = vsub.f32 %v3518_v49, %v1490_v5  ;;  %v1498_v56 = vsub.f32 %v3495_v9, %v1492_v32  ;;  %v3258_v15 = vmul.f32 0.2, %v3100_v35  ;;  %v1652_v59 = vmul.f32 %v3117_v41, %v3100_v35 }
 0x173   : > { %v3235_v36 = vadd.f32 %v1321_v12, %v3107_v55  ;;  %v1487_v55 = vsel %vm1479_vm13, 0.0, %v1485_v44  ;;  %v1665_v44 = vadd.f32 %v1663_v47, %v1661_v53  ;;  %v1860_v62 = vadd.f32 %v1858_v46, %v1856_v8 }
 0x174   : > { %v1667_v6 = vmul.f32 %v3247_v51, %v3247_v51  ;;  %v1305_v48 = vsub.f32 %v3505_v25, %v1299_v63  ;;  %v1307_v11 = vsub.f32 %v3509_v20, %v1301_v26  ;;  %v1489_v23 = vmul.f32 %v1487_v55, %v3513_v24 }
 0x175   : > { %v1857_v32 = vadd.f32 %v1855_v34, %v1853_v45  ;;  %v1491_v9 = vmul.f32 %v1487_v55, %v2913_v19  ;;  %v1864_v5 = vadd.f32 1e-06, %v1860_v62  ;;  %v1859_v12 = vmul.f32 %v3260_v18, %v3260_v18 }
 0x176   : > { %v1669_v49 = vadd.f32 %v1667_v6, %v1665_v44  ;;  %v1330_v53 = vadd.f32 %v1324_v17, %v3074_v0  ;;  %v1508_v47 = vmul.f32 0.8, %v1496_v57  ;;  %v1510_v8 = vmul.f32 0.8, %v1498_v56 }
 0x177   : > { %v1844_v46 = vmul.f32 %v3120_v43, %v3111_v58  ;;  %v1656_v25 = vmul.f32 %v3178_v61, %v3152_v31  ;;  %2213 = vrcp.f32 %v1864_v5  ;;  %v1861_v24 = vadd.f32 %v1859_v12, %v1857_v32 }
 0x178   : > { %v1673_v20 = vadd.f32 1e-06, %v1669_v49  ;;  %v1317_v63 = vmul.f32 0.8, %v1305_v48  ;;  %v1319_v19 = vmul.f32 0.8, %v1307_v11  ;;  %v1493_v26 = vmul.f32 %v1487_v55, %v3021_v4 }
 0x179   : > { %v1654_v34 = vadd.f32 %v1652_v59, %v3200_v29  ;;  %v1495_v45 = vsub.f32 %v3512_v10, %v1489_v23  ;;  %v1497_v0 = vsub.f32 %v3510_v1, %v1491_v9  ;;  %v1865_v17 = vadd.f32 1e-06, %v1861_v24  ;;  %v3527_v49 = vld [vmem:[#allocation5_spill] sm:$0xff] }
 0x17a   : > { %2215 = vrcp.f32 %v1673_v20  ;;  %v1514_v57 = vadd.f32 %v1508_v47, %v3160_v50  ;;  %v1516_v56 = vadd.f32 %v1510_v8, %v3181_v38  ;;  %v3284_v44 = vmul.f32 0.2, %v3111_v58  ;;  %v3528_v8 = vld [vmem:[#allocation8_spill] sm:$0xff] }
 0x17b   : > { %v3287_v62 = vmul.f32 0.2, %v3125_v33  ;;  %v1653_v4 = vmul.f32 %v3141_v14, %v3125_v33  ;;  %v1845_v10 = vmul.f32 %v3149_v28, %v3135_v13  ;;  %v1658_v29 = vadd.f32 %v1656_v25, %v1654_v34  ;;  %v3529_v25 = vld [vmem:[#allocation6_spill] sm:$0xff] }
 0x17c   : > { %2217 = vrcp.f32 %v1865_v17  ;;  %v1323_v1 = vadd.f32 %v1317_v63, %v3165_v52  ;;  %v1325_v50 = vadd.f32 %v1319_v19, %v3184_v40  ;;  %v1499_v38 = vsub.f32 %v3514_v16, %v1493_v26 }
 0x17d   : > { %v1846_v55 = vadd.f32 %v1844_v46, %v3208_v30  ;;  %v2212_v59 = vpop.eup %2211  ;;  %v1520_v6 = vadd.f32 %v1514_v57, %v1328_v7  ;;  %v1522_v48 = vadd.f32 %v1516_v56, %v1330_v53  ;;  %v1507_v11 = vmul.f32 0.8, %v1495_v45 }
 0x17e   : > { %v1509_v23 = vmul.f32 0.8, %v1497_v0  ;;  %v1676_v32 = vmul.f32 %v2212_v59, %v1658_v29  ;;  %v1848_v9 = vmul.f32 %v3204_v27, %v3170_v2  ;;  %v1657_v5 = vmul.f32 %v3247_v51, %v3222_v39 }
 0x17f   : > { %v1849_v52 = vmul.f32 %v3260_v18, %v3232_v21  ;;  %v1655_v40 = vadd.f32 %v1653_v4, %v3220_v3  ;;  %v1847_v16 = vadd.f32 %v1845_v10, %v3239_v60  ;;  %v1696_v30 = vmul.f32 0.2, %v3152_v31  ;;  %v3530_v3 = vld [vmem:[#allocation30_spill] sm:$0xff]  ;;  %v3532_v4 = vld [vmem:[#allocation31_spill] sm:$0xff] }
 0x180   : > { %vm1670_vm14 = vcmp.ge.f32.partialorder %v1658_v29, 0.0  ;;  %v1329_v7 = vadd.f32 %v1323_v1, %v3109_v42  ;;  %v1331_v12 = vadd.f32 %v1325_v50, %v3527_v49  ;;  %v1511_v53 = vmul.f32 0.8, %v1499_v38  ;;  %v3531_v42 = vld [vmem:[#allocation12_spill] sm:$0xff]  ;;  %v3535_v49 = vld [vmem:[#allocation17_spill] sm:$0xff] }
 0x181   : > { %v1678_v47 = vsel %vm1670_vm14, 0.0, %v1676_v32  ;;  %v1513_v46 = vadd.f32 %v1507_v11, %v3528_v8  ;;  %v1515_v19 = vadd.f32 %v1509_v23, %v3530_v3  ;;  %v1850_v60 = vadd.f32 %v1848_v9, %v1846_v55 }
 0x182   : > { %v1680_v20 = vmul.f32 %v1678_v47, %v3529_v25  ;;  %v1682_v24 = vmul.f32 %v1678_v47, %v3117_v41  ;;  %v1684_v63 = vmul.f32 %v1678_v47, %v3178_v61  ;;  %v1659_v26 = vadd.f32 %v1657_v5, %v1655_v40  ;;  %v3534_v5 = vld [vmem:[#allocation35_spill] sm:$0xff] }
 0x183   : > { %v1851_v34 = vadd.f32 %v1849_v52, %v1847_v16  ;;  %v1888_v45 = vmul.f32 0.2, %v3170_v2  ;;  %v1517_v10 = vadd.f32 %v1511_v53, %v3532_v4  ;;  %v3319_v41 = vadd.f32 %v1513_v46, %v3235_v36  ;;  %v3536_v46 = vld [vmem:[#allocation16_spill] sm:$0xff] }
 0x184   : > { %v1686_v0 = vsub.f32 %v3531_v42, %v1680_v20  ;;  %v1688_v17 = vsub.f32 %v3100_v35, %v1682_v24  ;;  %v1690_v57 = vsub.f32 %v3152_v31, %v1684_v63  ;;  %v2214_v56 = vpop.eup %2213  ;;  %v3321_v61 = vadd.f32 %v1515_v19, %v1329_v7  ;;  %v3533_v35 = vld [vmem:[#allocation15_spill] sm:$0xff] }
 0x185   : > { %v1697_v29 = vmul.f32 0.2, %v3222_v39  ;;  %v1868_v55 = vmul.f32 %v2214_v56, %v1850_v60  ;;  %v3324_v11 = vadd.f32 %v1517_v10, %v1331_v12  ;;  %vm1862_vm15 = vcmp.ge.f32.partialorder %v1850_v60, 0.0 }
 0x186   : > { %v1698_v1 = vmul.f32 0.8, %v1686_v0  ;;  %v1700_v50 = vmul.f32 0.8, %v1688_v17  ;;  %v1702_v38 = vmul.f32 0.8, %v1690_v57 }
 0x187   : > { %v2216_v59 = vpop.eup %2215  ;;  %vm1671_vm0 = vcmp.ge.f32.partialorder %v1659_v26, 0.0  ;;  %vm1863_vm1 = vcmp.ge.f32.partialorder %v1851_v34, 0.0  ;;  %v1870_v32 = vsel %vm1862_vm15, 0.0, %v1868_v55 }
 0x188   : > { %v1704_v31 = vadd.f32 %v1698_v1, %v3533_v35  ;;  %v1706_v23 = vadd.f32 %v1700_v50, %v3258_v15  ;;  %v1708_v36 = vadd.f32 %v1702_v38, %v1696_v30  ;;  %v1872_v52 = vmul.f32 %v1870_v32, %v3534_v5 }
 0x189   : > { %v2218_v9 = vpop.eup %2217  ;;  %v1874_v40 = vmul.f32 %v1870_v32, %v3120_v43  ;;  %v1876_v16 = vmul.f32 %v1870_v32, %v3204_v27  ;;  %v1677_v7 = vmul.f32 %v2216_v59, %v1659_v26  ;;  %v1887_v35 = vmul.f32 0.2, %v3135_v13  ;;  %v3540_v32 = vld [vmem:[#allocation4_spill] sm:$0xff] }
 0x18a   : > { %v1710_v12 = vadd.f32 %v1704_v31, %v3535_v49  ;;  %v1712_v53 = vadd.f32 %v1706_v23, %v1520_v6  ;;  %v1714_v47 = vadd.f32 %v1708_v36, %v1522_v48  ;;  %v1869_v8 = vmul.f32 %v2218_v9, %v1851_v34 }
 0x18b   : > { %v1878_v25 = vsub.f32 %v3536_v46, %v1872_v52  ;;  %v1880_v15 = vsub.f32 %v3111_v58, %v1874_v40  ;;  %v1882_v30 = vsub.f32 %v3170_v2, %v1876_v16  ;;  %v1679_v20 = vsel %vm1671_vm0, 0.0, %v1677_v7  ;;  %v3537_v58 = vld [vmem:[#allocation36_spill] sm:$0xff] }
 0x18c   : > { %v1681_v24 = vmul.f32 %v1679_v20, %v3081_v54  ;;  %v1683_v43 = vmul.f32 %v1679_v20, %v3141_v14  ;;  %v1685_v27 = vmul.f32 %v1679_v20, %v3247_v51  ;;  %v1871_v63 = vsel %vm1863_vm1, 0.0, %v1869_v8  ;;  %v3538_v14 = vld [vmem:[#allocation7_spill] sm:$0xff] }
 0x18d   : > { %v1890_v3 = vmul.f32 0.8, %v1878_v25  ;;  %v1892_v6 = vmul.f32 0.8, %v1880_v15  ;;  %v1894_v48 = vmul.f32 0.8, %v1882_v30  ;;  %v1873_v19 = vmul.f32 %v1871_v63, %v3095_v37 }
 0x18e   : > { %v1687_v60 = vsub.f32 %v3537_v58, %v1681_v24  ;;  %v1689_v2 = vsub.f32 %v3125_v33, %v1683_v43  ;;  %v1691_v26 = vsub.f32 %v3222_v39, %v1685_v27  ;;  %v1875_v54 = vmul.f32 %v1871_v63, %v3149_v28  ;;  %v3539_v39 = vld [vmem:[#allocation34_spill] sm:$0xff] }
 0x18f   : > { %v1896_v42 = vadd.f32 %v1890_v3, %v3538_v14  ;;  %v1898_v51 = vadd.f32 %v1892_v6, %v3284_v44  ;;  %v1900_v34 = vadd.f32 %v1894_v48, %v1888_v45  ;;  %v1877_v0 = vmul.f32 %v1871_v63, %v3260_v18 }
 0x190   : > { %v1699_v17 = vmul.f32 0.8, %v1687_v60  ;;  %v1701_v57 = vmul.f32 0.8, %v1689_v2  ;;  %v1703_v37 = vmul.f32 0.8, %v1691_v26  ;;  %v1879_v56 = vsub.f32 %v3076_v22, %v1873_v19 }
 0x191   : > { %v1902_v4 = vadd.f32 %v1896_v42, %v1710_v12  ;;  %v1904_v10 = vadd.f32 %v1898_v51, %v1712_v53  ;;  %v1906_v1 = vadd.f32 %v1900_v34, %v1714_v47  ;;  %v1881_v33 = vsub.f32 %v3135_v13, %v1875_v54 }
 0x192   : > { %v1705_v50 = vadd.f32 %v1699_v17, %v3539_v39  ;;  %v1707_v28 = vadd.f32 %v1701_v57, %v3287_v62  ;;  %v1709_v38 = vadd.f32 %v1703_v37, %v1697_v29  ;;  %v1883_v44 = vsub.f32 %v3232_v21, %v1877_v0 }
 0x193   : > { %v1908_v45 = vmul.f32 0.125, %v1902_v4  ;;  %v1910_v55 = vmul.f32 0.125, %v1904_v10  ;;  %v1912_v18 = vmul.f32 0.125, %v1906_v1  ;;  %v1891_v59 = vmul.f32 0.8, %v1879_v56 }
 0x194   : > { %v1711_v22 = vadd.f32 %v1705_v50, %v3319_v41  ;;  %v1713_v31 = vadd.f32 %v1707_v28, %v3321_v61  ;;  %v1893_v23 = vmul.f32 0.8, %v1881_v33  ;;  %v1889_v62 = vmul.f32 0.2, %v3232_v21 }
 0x195   : > { %1914 = vst [vmem:[%s361_s3] sm:$0xff] %v1908_v45  ;;  %1916 = vst [vmem:[%s361_s3 + $0x10] sm:$0xff] %v1910_v55  ;;  %v1715_v29 = vadd.f32 %v1709_v38, %v3324_v11  ;;  %v1895_v36 = vmul.f32 0.8, %v1883_v44  ;;  %v1897_v9 = vadd.f32 %v1891_v59, %v3540_v32 }
 0x196   : > { %1918 = vst [vmem:[%s361_s3 + $0x20] sm:$0xff] %v1912_v18  ;;  %v1899_v5 = vadd.f32 %v1893_v23, %v1887_v35 }
 0x197   : > { %v1901_v52 = vadd.f32 %v1895_v36, %v1889_v62  ;;  %v1903_v40 = vadd.f32 %v1897_v9, %v1711_v22 }
 0x198   : > { %v1905_v13 = vadd.f32 %v1899_v5, %v1713_v31 }
 0x199   : > { %v1907_v16 = vadd.f32 %v1901_v52, %v1715_v29  ;;  %v1909_v41 = vmul.f32 0.125, %v1903_v40  ;;  %1926 = sbr.rel (!%p2289_p5) target bundleno = 422 (0x1a6), region = 70 }
 0x19a   : > { %v1911_v7 = vmul.f32 0.125, %v1905_v13 }
 0x19b   : > { %v1913_v61 = vmul.f32 0.125, %v1907_v16  ;;  %1915 = vst [vmem:[%s361_s3 + $0x8] sm:$0xff] %v1909_v41 }
 0x19c   : > { %1917 = vst [vmem:[%s361_s3 + $0x18] sm:$0xff] %v1911_v7  ;;  %v1968_v21 = vld [vmem:[%s361_s3] sm:$0xff] (%p2289_p5)  ;;  %v1972_v49 = vld [vmem:[%s361_s3 + $0x10] sm:$0xff] (%p2289_p5) }
 0x19d   : > { %1919 = vst [vmem:[%s361_s3 + $0x28] sm:$0xff] %v1913_v61  ;;  %v1976_v53 = vld [vmem:[%s361_s3 + $0x20] sm:$0xff] (%p2289_p5)  ;;  %1969 = vst [vmem:[%s1929_s7] sm:$0xff] (%p2289_p5), %v1968_v21 }
 0x19e   : > { %1973 = vst [vmem:[%s1929_s7 + $0x20] sm:$0xff] %v1972_v49  ;;  %1977 = vst [vmem:[%s1929_s7 + $0x40] sm:$0xff] %v1976_v53 }
 0x1a2   : > { %v1970_v11 = vld [vmem:[%s361_s3 + $0x8] sm:$0xff] }
 0x1a3   : > { %v1974_v12 = vld [vmem:[%s361_s3 + $0x18] sm:$0xff]  ;;  %1971 = vst [vmem:[%s1929_s7 + $0x8] sm:$0xff] %v1970_v11 }
 0x1a4   : > { %v1978_v47 = vld [vmem:[%s361_s3 + $0x28] sm:$0xff]  ;;  %1975 = vst [vmem:[%s1929_s7 + $0x28] sm:$0xff] %v1974_v12 }
 0x1a5   : > { %1979 = vst [vmem:[%s1929_s7 + $0x48] sm:$0xff] %v1978_v47 }
 0x1a6 PF: > { %p9_p10 = scmp.ge.s32.totalorder %s2276_s13, 4   ;;  %s3541_s9 = smov %s2237_s10 }
 0x1a7   : > { %s3542_s10 = smov %s2287_s16  ;;  %s3543_s11 = smov %s2276_s13 }
 0x1a8   :  { %11 = sbr.rel (!%p9_p10) target bundleno = 2 (0x2), region = 146 }

</bundles_post_ra>
